<compile_context>
chip_gen: v7x
topology: tpu7x:2x2x1
jax: 0.10.0
libtpu: 0.0.40
codegen_flags: <defaults>
</compile_context>

<pallas_src>
import functools
import math

import jax
import jax.numpy as jnp
from jax.experimental import pallas as pl
from jax.experimental.pallas import tpu as pltpu


# ----------------------------------------------------------------------------
# Single fused kernel: conv stack + PE (layer 0) and all transformer layers.
# Grid iterates layers; the activation carry lives in the resident output block.
# ----------------------------------------------------------------------------
def _text_encoder_kernel(x_ref, pe_ref, cw_ref, cs_ref, csh_ref, mask_ref,
                         qkv_w_ref, qkv_b_ref, out_w_ref, out_b_ref,
                         ln1_g_ref, ln1_b_ref, ff1_w_ref, ff1_b_ref,
                         ff2_w_ref, ff2_b_ref, ln2_g_ref, ln2_b_ref,
                         o_ref, *, nhead, eps):
    layer = pl.program_id(0)
    N, W, C = x_ref.shape
    K = cw_ref.shape[1] // C
    M = N * W
    Dh = C // nhead
    scale = 1.0 / math.sqrt(Dh)

    # ---- layer-0 prologue: 3x (conv k=5 -> folded BN -> relu), then + PE ----
    @pl.when(layer == 0)
    def _():
        pad = (K - 1) // 2
        zeros = jnp.zeros((pad, C), jnp.float32)
        nblocks = cw_ref.shape[0]
        # N is tiny here; static unroll.  TODO(synk): for large N use a batched
        # (N, W, K*C) im2col / pltpu.roll-based shifts instead of per-batch slices.
        for b in range(N):
            hb = x_ref[b]                                         # (W, C) f32
            for blk in range(nblocks):
                hp = jnp.concatenate([zeros, hb, zeros], axis=0)  # edge padding
                # im2col: one (W, K*C) @ (K*C, C) MXU contraction per block
                cols = jnp.concatenate([hp[k:k + W, :] for k in range(K)], axis=-1)
                y = jnp.dot(cols.astype(jnp.bfloat16), cw_ref[blk],
                            preferred_element_type=jnp.float32)
                hb = jnp.maximum(y * cs_ref[blk] + csh_ref[blk], 0.0)
            o_ref[b] = hb + pe_ref[...]                           # PE add folded in

    # ---- transformer encoder layer `layer` (post-norm, relu FFN) ----
    h = o_ref[...].reshape(M, C)                                  # resident carry

    def ln(v, g, b):
        mu = jnp.mean(v, axis=-1, keepdims=True)
        vc = v - mu
        var = jnp.mean(vc * vc, axis=-1, keepdims=True)
        return vc * jax.lax.rsqrt(var + eps) * g + b

    # multi-head self attention
    qkv = jnp.dot(h.astype(jnp.bfloat16), qkv_w_ref[0],
                  preferred_element_type=jnp.float32) + qkv_b_ref[0]   # (M, 3C)
    q3 = qkv[:, 0:C].reshape(N, W, C).astype(jnp.bfloat16)
    k3 = qkv[:, C:2 * C].reshape(N, W, C).astype(jnp.bfloat16)
    v3 = qkv[:, 2 * C:3 * C].reshape(N, W, C).astype(jnp.bfloat16)
    # additive key-padding bias, broadcast ONCE (hoisted out of the head loop)
    bias = jax.lax.broadcast_in_dim(mask_ref[...], (N, W, W), (0, 2))

    heads = []
    for hh in range(nhead):                    # per-head, batched over N
        c0 = hh * Dh
        s = jnp.einsum('nqd,nkd->nqk', q3[:, :, c0:c0 + Dh], k3[:, :, c0:c0 + Dh],
                       preferred_element_type=jnp.float32) * scale + bias
        m = jnp.max(s, axis=-1, keepdims=True)
        p = jnp.exp(s - m)
        p = p * pl.reciprocal(jnp.sum(p, axis=-1, keepdims=True), approx=True)
        heads.append(jnp.einsum('nqk,nkd->nqd', p.astype(jnp.bfloat16),
                                v3[:, :, c0:c0 + Dh],
                                preferred_element_type=jnp.float32))
    attn = jnp.concatenate(heads, axis=-1).reshape(M, C)          # lane-dense once

    attn = jnp.dot(attn.astype(jnp.bfloat16), out_w_ref[0],
                   preferred_element_type=jnp.float32) + out_b_ref[0]
    h = ln(h + attn, ln1_g_ref[0], ln1_b_ref[0])                  # post-norm #1

    # feed forward
    f = jnp.maximum(jnp.dot(h.astype(jnp.bfloat16), ff1_w_ref[0],
                            preferred_element_type=jnp.float32) + ff1_b_ref[0], 0.0)
    f = jnp.dot(f.astype(jnp.bfloat16), ff2_w_ref[0],
                preferred_element_type=jnp.float32) + ff2_b_ref[0]
    h = ln(h + f, ln2_g_ref[0], ln2_b_ref[0])                     # post-norm #2

    # write back to the resident output block (HBM writeback happens once,
    # after the last grid step)
    o_ref[...] = h.reshape(N, W, C)


# ----------------------------------------------------------------------------
# Model forward (only glue ops outside the single Pallas kernel)
# ----------------------------------------------------------------------------
def text_encoder_forward(tokens, x_masks, params, nhead=8):
    """tokens: (N, W) int32, x_masks: (N, W) bool (True = padded key).
    Returns (N, C, W) like the PyTorch module."""
    N, W = tokens.shape
    C = params["embed"].shape[1]
    layers = params["layers"]
    L = len(layers)

    # embedding lookup (gather glue in XLA)
    x = jnp.take(params["embed"], tokens, axis=0)                       # (N, W, C)
    pe = params["pe"][:W]                                               # (W, C)

    # conv-block weights: (3, K*C, C) bf16 im2col weights + folded BN scale/shift
    cw = jnp.stack([cb["w"].reshape(-1, C) for cb in params["convblocks"]]
                   ).astype(jnp.bfloat16)
    cs = jnp.stack([cb["scale"].reshape(1, C) for cb in params["convblocks"]])
    csh = jnp.stack([cb["shift"].reshape(1, C) for cb in params["convblocks"]])
    KC = cw.shape[1]

    # additive key-padding bias, kept at (N, W); broadcast inside the kernel
    mask_bias = jnp.where(x_masks, -1e30, 0.0).astype(jnp.float32)

    # per-layer weights stacked with a leading layer axis; matmul weights -> bf16
    qkv_w = jnp.stack([lp["in_w"] for lp in layers]).astype(jnp.bfloat16)
    qkv_b = jnp.stack([lp["in_b"].reshape(1, -1) for lp in layers])
    out_w = jnp.stack([lp["out_w"] for lp in layers]).astype(jnp.bfloat16)
    out_b = jnp.stack([lp["out_b"].reshape(1, -1) for lp in layers])
    ln1_g = jnp.stack([lp["ln1_g"].reshape(1, -1) for lp in layers])
    ln1_b = jnp.stack([lp["ln1_b"].reshape(1, -1) for lp in layers])
    ff1_w = jnp.stack([lp["ff1_w"] for lp in layers]).astype(jnp.bfloat16)
    ff1_b = jnp.stack([lp["ff1_b"].reshape(1, -1) for lp in layers])
    ff2_w = jnp.stack([lp["ff2_w"] for lp in layers]).astype(jnp.bfloat16)
    ff2_b = jnp.stack([lp["ff2_b"].reshape(1, -1) for lp in layers])
    ln2_g = jnp.stack([lp["ln2_g"].reshape(1, -1) for lp in layers])
    ln2_b = jnp.stack([lp["ln2_b"].reshape(1, -1) for lp in layers])
    C3 = qkv_w.shape[2]
    F = ff1_w.shape[2]

    def full(shape):
        return pl.BlockSpec(shape, lambda l: (0,) * len(shape))

    def per_layer(shape):
        return pl.BlockSpec((1,) + shape, lambda l: (l, 0, 0))

    kern = functools.partial(_text_encoder_kernel, nhead=nhead, eps=1e-5)
    y = pl.pallas_call(
        kern,
        out_shape=jax.ShapeDtypeStruct((N, W, C), jnp.float32),
        grid=(L,),
        in_specs=[
            full((N, W, C)),              # embedding output (used at layer 0 only)
            full((W, C)),                 # positional encoding
            full((3, KC, C)),             # conv im2col weights (bf16)
            full((3, 1, C)),              # conv folded-BN scale
            full((3, 1, C)),              # conv folded-BN shift
            full((N, W)),                 # key-padding bias
            per_layer((C, C3)),           # qkv_w (bf16)
            per_layer((1, C3)),           # qkv_b
            per_layer((C, C)),            # out_w (bf16)
            per_layer((1, C)),            # out_b
            per_layer((1, C)),            # ln1_g
            per_layer((1, C)),            # ln1_b
            per_layer((C, F)),            # ff1_w (bf16)
            per_layer((1, F)),            # ff1_b
            per_layer((F, C)),            # ff2_w (bf16)
            per_layer((1, C)),            # ff2_b
            per_layer((1, C)),            # ln2_g
            per_layer((1, C)),            # ln2_b
        ],
        out_specs=full((N, W, C)),        # constant index -> resident activation carry
        compiler_params=pltpu.CompilerParams(dimension_semantics=("arbitrary",)),
    )(x, pe, cw, cs, csh, mask_bias, qkv_w, qkv_b, out_w, out_b,
      ln1_g, ln1_b, ff1_w, ff1_b, ff2_w, ff2_b, ln2_g, ln2_b)

    # Kernel writes lane-dense (N, W, C); module contract is (N, C, W).
    # TODO(synk): skip this transpose if the downstream consumer accepts (N, W, C).
    return y.transpose(0, 2, 1)


# ----------------------------------------------------------------------------
# Deterministic synthetic parameter init
# ----------------------------------------------------------------------------
def make_params(key, vocab_size, C, n_layers=6, ffn=2048, kconv=5, max_len=512):
    def nrm(k, shape, s=0.02):
        return (s * jax.random.normal(k, shape)).astype(jnp.float32)

    keys = iter(jax.random.split(key, 256))
    params = {}
    params["embed"] = jax.random.normal(next(keys), (vocab_size, C)).astype(jnp.float32)

    # positional encoding table
    # TODO(synk): table capped at max_len rows; inputs with W > max_len would need a bigger table.
    position = jnp.arange(max_len, dtype=jnp.float32)[:, None]
    div_term = jnp.exp(jnp.arange(0, C, 2, dtype=jnp.float32) * (-math.log(10000.0) / C))
    pe = jnp.zeros((max_len, C), jnp.float32)
    pe = pe.at[:, 0::2].set(jnp.sin(position * div_term))
    pe = pe.at[:, 1::2].set(jnp.cos(position * div_term))
    params["pe"] = pe

    # conv blocks: fold conv bias + BatchNorm (running stats) into scale/shift
    convblocks = []
    for _ in range(3):
        w = nrm(next(keys), (kconv, C, C))                 # (K, C_in, C_out)
        conv_b = nrm(next(keys), (C,))
        gamma = 1.0 + nrm(next(keys), (C,), 0.1)
        beta = nrm(next(keys), (C,), 0.1)
        rmean = nrm(next(keys), (C,), 0.1)
        rvar = 1.0 + jnp.abs(nrm(next(keys), (C,), 0.1))
        scale = gamma / jnp.sqrt(rvar + 1e-5)
        shift = beta + (conv_b - rmean) * scale
        convblocks.append({"w": w, "scale": scale, "shift": shift})
    params["convblocks"] = convblocks

    layers = []
    for _ in range(n_layers):
        layers.append({
            "in_w": nrm(next(keys), (C, 3 * C)),
            "in_b": nrm(next(keys), (3 * C,)),
            "out_w": nrm(next(keys), (C, C)),
            "out_b": nrm(next(keys), (C,)),
            "ln1_g": 1.0 + nrm(next(keys), (C,), 0.1),
            "ln1_b": nrm(next(keys), (C,), 0.1),
            "ff1_w": nrm(next(keys), (C, ffn)),
            "ff1_b": nrm(next(keys), (ffn,)),
            "ff2_w": nrm(next(keys), (ffn, C)),
            "ff2_b": nrm(next(keys), (C,)),
            "ln2_g": 1.0 + nrm(next(keys), (C,), 0.1),
            "ln2_b": nrm(next(keys), (C,), 0.1),
        })
    params["layers"] = layers
    return params


# ----------------------------------------------------------------------------
if __name__ == "__main__":
    key = jax.random.PRNGKey(0)
    k_par, k_tok = jax.random.split(key)

    VOCAB, C, N, W = 50, 128, 2, 8          # small shapes; d_model=128, nhead=8
    params = make_params(k_par, VOCAB, C)

    tokens = jax.random.randint(k_tok, (N, W), 0, VOCAB, dtype=jnp.int32)
    # key padding mask: True = padded position (batch 1 has 3 padded tokens)
    x_masks = jnp.array([[False] * W,
                         [False] * (W - 3) + [True] * 3], dtype=bool)

    out = jax.jit(text_encoder_forward)(tokens, x_masks, params)
    out = jax.block_until_ready(out)
    assert out.shape == (N, C, W), out.shape
    assert bool(jnp.all(jnp.isfinite(out)))
    print("KERNEL_OK")
</pallas_src>

<mosaic_0001>
module attributes {stable_mosaic.version = 11 : i64} {
  func.func @_text_encoder_kernel(%arg0: i32, %arg1: memref<2x8x128xf32, #tpu.memory_space<vmem>>, %arg2: memref<8x128xf32, #tpu.memory_space<vmem>>, %arg3: memref<3x640x128xbf16, #tpu.memory_space<vmem>>, %arg4: memref<3x1x128xf32, #tpu.memory_space<vmem>>, %arg5: memref<3x1x128xf32, #tpu.memory_space<vmem>>, %arg6: memref<2x8xf32, #tpu.memory_space<vmem>>, %arg7: memref<1x128x384xbf16, #tpu.memory_space<vmem>>, %arg8: memref<1x1x384xf32, #tpu.memory_space<vmem>>, %arg9: memref<1x128x128xbf16, #tpu.memory_space<vmem>>, %arg10: memref<1x1x128xf32, #tpu.memory_space<vmem>>, %arg11: memref<1x1x128xf32, #tpu.memory_space<vmem>>, %arg12: memref<1x1x128xf32, #tpu.memory_space<vmem>>, %arg13: memref<1x128x2048xbf16, #tpu.memory_space<vmem>>, %arg14: memref<1x1x2048xf32, #tpu.memory_space<vmem>>, %arg15: memref<1x2048x128xbf16, #tpu.memory_space<vmem>>, %arg16: memref<1x1x128xf32, #tpu.memory_space<vmem>>, %arg17: memref<1x1x128xf32, #tpu.memory_space<vmem>>, %arg18: memref<1x1x128xf32, #tpu.memory_space<vmem>>, %arg19: memref<2x8x128xf32, #tpu.memory_space<vmem>>) attributes {dimension_semantics = [#tpu.dimension_semantics<arbitrary>], iteration_bounds = array<i64: 6>, scalar_prefetch = 0 : i64, scratch_operands = 0 : i64, tpu.core_type = #tpu.core_type<tc>, window_params = [{pipeline_mode = #tpu.pipeline_mode<synchronous>, transform_indices = @transform_0, window_bounds = array<i64: 2, 8, 128>}, {pipeline_mode = #tpu.pipeline_mode<synchronous>, transform_indices = @transform_1, window_bounds = array<i64: 8, 128>}, {pipeline_mode = #tpu.pipeline_mode<synchronous>, transform_indices = @transform_2, window_bounds = array<i64: 3, 640, 128>}, {pipeline_mode = #tpu.pipeline_mode<synchronous>, transform_indices = @transform_3, window_bounds = array<i64: 3, 1, 128>}, {pipeline_mode = #tpu.pipeline_mode<synchronous>, transform_indices = @transform_4, window_bounds = array<i64: 3, 1, 128>}, {pipeline_mode = #tpu.pipeline_mode<synchronous>, transform_indices = @transform_5, window_bounds = array<i64: 2, 8>}, {transform_indices = @transform_6, window_bounds = array<i64: 1, 128, 384>}, {transform_indices = @transform_7, window_bounds = array<i64: 1, 1, 384>}, {transform_indices = @transform_8, window_bounds = array<i64: 1, 128, 128>}, {transform_indices = @transform_9, window_bounds = array<i64: 1, 1, 128>}, {transform_indices = @transform_10, window_bounds = array<i64: 1, 1, 128>}, {transform_indices = @transform_11, window_bounds = array<i64: 1, 1, 128>}, {transform_indices = @transform_12, window_bounds = array<i64: 1, 128, 2048>}, {transform_indices = @transform_13, window_bounds = array<i64: 1, 1, 2048>}, {transform_indices = @transform_14, window_bounds = array<i64: 1, 2048, 128>}, {transform_indices = @transform_15, window_bounds = array<i64: 1, 1, 128>}, {transform_indices = @transform_16, window_bounds = array<i64: 1, 1, 128>}, {transform_indices = @transform_17, window_bounds = array<i64: 1, 1, 128>}, {pipeline_mode = #tpu.pipeline_mode<synchronous>, transform_indices = @transform_18, window_bounds = array<i64: 2, 8, 128>}]} {
    %c0_i32 = arith.constant 0 : i32
    %0 = arith.cmpi eq, %arg0, %c0_i32 : i32
    %1 = arith.extui %0 : i1 to i32
    %c0_i32_0 = arith.constant 0 : i32
    %2 = arith.cmpi ne, %1, %c0_i32_0 : i32
    scf.if %2 {
      %cst_98 = arith.constant 0.000000e+00 : f32
      %257 = vector.broadcast %cst_98 : f32 to vector<2x128xf32>
      %c0_99 = arith.constant 0 : index
      %c0_100 = arith.constant 0 : index
      %c0_101 = arith.constant 0 : index
      %258 = vector.load %arg1[%c0_99, %c0_100, %c0_101] : memref<2x8x128xf32, #tpu.memory_space<vmem>>, vector<1x8x128xf32>
      %259 = vector.shape_cast %258 : vector<1x8x128xf32> to vector<8x128xf32>
      %260 = tpu.concatenate %257, %259, %257 in 0 : vector<2x128xf32>, vector<8x128xf32>, vector<2x128xf32> -> vector<12x128xf32>
      %261 = vector.extract_strided_slice %260 {offsets = [0, 0], sizes = [8, 128], strides = [1, 1]} : vector<12x128xf32> to vector<8x128xf32>
      %262 = vector.extract_strided_slice %260 {offsets = [1, 0], sizes = [8, 128], strides = [1, 1]} : vector<12x128xf32> to vector<8x128xf32>
      %263 = vector.extract_strided_slice %260 {offsets = [2, 0], sizes = [8, 128], strides = [1, 1]} : vector<12x128xf32> to vector<8x128xf32>
      %264 = vector.extract_strided_slice %260 {offsets = [3, 0], sizes = [8, 128], strides = [1, 1]} : vector<12x128xf32> to vector<8x128xf32>
      %265 = vector.extract_strided_slice %260 {offsets = [4, 0], sizes = [8, 128], strides = [1, 1]} : vector<12x128xf32> to vector<8x128xf32>
      %266 = tpu.concatenate %261, %262, %263, %264, %265 in 1 : vector<8x128xf32>, vector<8x128xf32>, vector<8x128xf32>, vector<8x128xf32>, vector<8x128xf32> -> vector<8x640xf32>
      %267 = arith.truncf %266 : vector<8x640xf32> to vector<8x640xbf16>
      %c0_102 = arith.constant 0 : index
      %c0_103 = arith.constant 0 : index
      %c0_104 = arith.constant 0 : index
      %268 = vector.load %arg3[%c0_102, %c0_103, %c0_104] : memref<3x640x128xbf16, #tpu.memory_space<vmem>>, vector<1x640x128xbf16>
      %269 = vector.shape_cast %268 : vector<1x640x128xbf16> to vector<640x128xbf16>
      %cst_105 = arith.constant dense<0.000000e+00> : vector<8x128xf32>
      %270 = tpu.matmul %267, %269, %cst_105 {dimension_numbers = #tpu.dot_dimension_numbers<[1], [0], [0], [1], [0, 0, 1, 1], [], []>} : vector<8x640xbf16>, vector<640x128xbf16>, vector<8x128xf32> -> vector<8x128xf32>
      %c0_106 = arith.constant 0 : index
      %c0_107 = arith.constant 0 : index
      %c0_108 = arith.constant 0 : index
      %271 = vector.load %arg4[%c0_106, %c0_107, %c0_108] : memref<3x1x128xf32, #tpu.memory_space<vmem>>, vector<1x1x128xf32>
      %272 = vector.shape_cast %271 : vector<1x1x128xf32> to vector<1x128xf32>
      %273 = vector.broadcast %272 : vector<1x128xf32> to vector<8x128xf32>
      %274 = arith.mulf %270, %273 : vector<8x128xf32>
      %c0_109 = arith.constant 0 : index
      %c0_110 = arith.constant 0 : index
      %c0_111 = arith.constant 0 : index
      %275 = vector.load %arg5[%c0_109, %c0_110, %c0_111] : memref<3x1x128xf32, #tpu.memory_space<vmem>>, vector<1x1x128xf32>
      %276 = vector.shape_cast %275 : vector<1x1x128xf32> to vector<1x128xf32>
      %277 = vector.broadcast %276 : vector<1x128xf32> to vector<8x128xf32>
      %278 = arith.addf %274, %277 : vector<8x128xf32>
      %cst_112 = arith.constant 0.000000e+00 : f32
      %279 = vector.broadcast %cst_112 : f32 to vector<8x128xf32>
      %280 = arith.maximumf %278, %279 : vector<8x128xf32>
      %281 = tpu.concatenate %257, %280, %257 in 0 : vector<2x128xf32>, vector<8x128xf32>, vector<2x128xf32> -> vector<12x128xf32>
      %282 = vector.extract_strided_slice %281 {offsets = [0, 0], sizes = [8, 128], strides = [1, 1]} : vector<12x128xf32> to vector<8x128xf32>
      %283 = vector.extract_strided_slice %281 {offsets = [1, 0], sizes = [8, 128], strides = [1, 1]} : vector<12x128xf32> to vector<8x128xf32>
      %284 = vector.extract_strided_slice %281 {offsets = [2, 0], sizes = [8, 128], strides = [1, 1]} : vector<12x128xf32> to vector<8x128xf32>
      %285 = vector.extract_strided_slice %281 {offsets = [3, 0], sizes = [8, 128], strides = [1, 1]} : vector<12x128xf32> to vector<8x128xf32>
      %286 = vector.extract_strided_slice %281 {offsets = [4, 0], sizes = [8, 128], strides = [1, 1]} : vector<12x128xf32> to vector<8x128xf32>
      %287 = tpu.concatenate %282, %283, %284, %285, %286 in 1 : vector<8x128xf32>, vector<8x128xf32>, vector<8x128xf32>, vector<8x128xf32>, vector<8x128xf32> -> vector<8x640xf32>
      %288 = arith.truncf %287 : vector<8x640xf32> to vector<8x640xbf16>
      %c1 = arith.constant 1 : index
      %c0_113 = arith.constant 0 : index
      %c0_114 = arith.constant 0 : index
      %289 = vector.load %arg3[%c1, %c0_113, %c0_114] : memref<3x640x128xbf16, #tpu.memory_space<vmem>>, vector<1x640x128xbf16>
      %290 = vector.shape_cast %289 : vector<1x640x128xbf16> to vector<640x128xbf16>
      %cst_115 = arith.constant dense<0.000000e+00> : vector<8x128xf32>
      %291 = tpu.matmul %288, %290, %cst_115 {dimension_numbers = #tpu.dot_dimension_numbers<[1], [0], [0], [1], [0, 0, 1, 1], [], []>} : vector<8x640xbf16>, vector<640x128xbf16>, vector<8x128xf32> -> vector<8x128xf32>
      %c1_116 = arith.constant 1 : index
      %c0_117 = arith.constant 0 : index
      %c0_118 = arith.constant 0 : index
      %292 = vector.load %arg4[%c1_116, %c0_117, %c0_118] : memref<3x1x128xf32, #tpu.memory_space<vmem>>, vector<1x1x128xf32>
      %293 = vector.shape_cast %292 : vector<1x1x128xf32> to vector<1x128xf32>
      %294 = vector.broadcast %293 : vector<1x128xf32> to vector<8x128xf32>
      %295 = arith.mulf %291, %294 : vector<8x128xf32>
      %c1_119 = arith.constant 1 : index
      %c0_120 = arith.constant 0 : index
      %c0_121 = arith.constant 0 : index
      %296 = vector.load %arg5[%c1_119, %c0_120, %c0_121] : memref<3x1x128xf32, #tpu.memory_space<vmem>>, vector<1x1x128xf32>
      %297 = vector.shape_cast %296 : vector<1x1x128xf32> to vector<1x128xf32>
      %298 = vector.broadcast %297 : vector<1x128xf32> to vector<8x128xf32>
      %299 = arith.addf %295, %298 : vector<8x128xf32>
      %cst_122 = arith.constant 0.000000e+00 : f32
      %300 = vector.broadcast %cst_122 : f32 to vector<8x128xf32>
      %301 = arith.maximumf %299, %300 : vector<8x128xf32>
      %302 = tpu.concatenate %257, %301, %257 in 0 : vector<2x128xf32>, vector<8x128xf32>, vector<2x128xf32> -> vector<12x128xf32>
      %303 = vector.extract_strided_slice %302 {offsets = [0, 0], sizes = [8, 128], strides = [1, 1]} : vector<12x128xf32> to vector<8x128xf32>
      %304 = vector.extract_strided_slice %302 {offsets = [1, 0], sizes = [8, 128], strides = [1, 1]} : vector<12x128xf32> to vector<8x128xf32>
      %305 = vector.extract_strided_slice %302 {offsets = [2, 0], sizes = [8, 128], strides = [1, 1]} : vector<12x128xf32> to vector<8x128xf32>
      %306 = vector.extract_strided_slice %302 {offsets = [3, 0], sizes = [8, 128], strides = [1, 1]} : vector<12x128xf32> to vector<8x128xf32>
      %307 = vector.extract_strided_slice %302 {offsets = [4, 0], sizes = [8, 128], strides = [1, 1]} : vector<12x128xf32> to vector<8x128xf32>
      %308 = tpu.concatenate %303, %304, %305, %306, %307 in 1 : vector<8x128xf32>, vector<8x128xf32>, vector<8x128xf32>, vector<8x128xf32>, vector<8x128xf32> -> vector<8x640xf32>
      %309 = arith.truncf %308 : vector<8x640xf32> to vector<8x640xbf16>
      %c2 = arith.constant 2 : index
      %c0_123 = arith.constant 0 : index
      %c0_124 = arith.constant 0 : index
      %310 = vector.load %arg3[%c2, %c0_123, %c0_124] : memref<3x640x128xbf16, #tpu.memory_space<vmem>>, vector<1x640x128xbf16>
      %311 = vector.shape_cast %310 : vector<1x640x128xbf16> to vector<640x128xbf16>
      %cst_125 = arith.constant dense<0.000000e+00> : vector<8x128xf32>
      %312 = tpu.matmul %309, %311, %cst_125 {dimension_numbers = #tpu.dot_dimension_numbers<[1], [0], [0], [1], [0, 0, 1, 1], [], []>} : vector<8x640xbf16>, vector<640x128xbf16>, vector<8x128xf32> -> vector<8x128xf32>
      %c2_126 = arith.constant 2 : index
      %c0_127 = arith.constant 0 : index
      %c0_128 = arith.constant 0 : index
      %313 = vector.load %arg4[%c2_126, %c0_127, %c0_128] : memref<3x1x128xf32, #tpu.memory_space<vmem>>, vector<1x1x128xf32>
      %314 = vector.shape_cast %313 : vector<1x1x128xf32> to vector<1x128xf32>
      %315 = vector.broadcast %314 : vector<1x128xf32> to vector<8x128xf32>
      %316 = arith.mulf %312, %315 : vector<8x128xf32>
      %c2_129 = arith.constant 2 : index
      %c0_130 = arith.constant 0 : index
      %c0_131 = arith.constant 0 : index
      %317 = vector.load %arg5[%c2_129, %c0_130, %c0_131] : memref<3x1x128xf32, #tpu.memory_space<vmem>>, vector<1x1x128xf32>
      %318 = vector.shape_cast %317 : vector<1x1x128xf32> to vector<1x128xf32>
      %319 = vector.broadcast %318 : vector<1x128xf32> to vector<8x128xf32>
      %320 = arith.addf %316, %319 : vector<8x128xf32>
      %cst_132 = arith.constant 0.000000e+00 : f32
      %321 = vector.broadcast %cst_132 : f32 to vector<8x128xf32>
      %322 = arith.maximumf %320, %321 : vector<8x128xf32>
      %c0_133 = arith.constant 0 : index
      %c0_134 = arith.constant 0 : index
      %323 = vector.load %arg2[%c0_133, %c0_134] : memref<8x128xf32, #tpu.memory_space<vmem>>, vector<8x128xf32>
      %324 = arith.addf %322, %323 : vector<8x128xf32>
      %c0_135 = arith.constant 0 : index
      %c0_136 = arith.constant 0 : index
      %c0_137 = arith.constant 0 : index
      %325 = vector.load %arg19[%c0_135, %c0_136, %c0_137] : memref<2x8x128xf32, #tpu.memory_space<vmem>>, vector<1x8x128xf32>
      %326 = vector.shape_cast %325 : vector<1x8x128xf32> to vector<8x128xf32>
      %327 = vector.shape_cast %324 : vector<8x128xf32> to vector<1x8x128xf32>
      tpu.vector_store %arg19[%c0_135, %c0_136, %c0_137], %327 {strides = array<i32>} : memref<2x8x128xf32, #tpu.memory_space<vmem>>, vector<1x8x128xf32>,
      %c1_138 = arith.constant 1 : index
      %c0_139 = arith.constant 0 : index
      %c0_140 = arith.constant 0 : index
      %328 = vector.load %arg1[%c1_138, %c0_139, %c0_140] : memref<2x8x128xf32, #tpu.memory_space<vmem>>, vector<1x8x128xf32>
      %329 = vector.shape_cast %328 : vector<1x8x128xf32> to vector<8x128xf32>
      %330 = tpu.concatenate %257, %329, %257 in 0 : vector<2x128xf32>, vector<8x128xf32>, vector<2x128xf32> -> vector<12x128xf32>
      %331 = vector.extract_strided_slice %330 {offsets = [0, 0], sizes = [8, 128], strides = [1, 1]} : vector<12x128xf32> to vector<8x128xf32>
      %332 = vector.extract_strided_slice %330 {offsets = [1, 0], sizes = [8, 128], strides = [1, 1]} : vector<12x128xf32> to vector<8x128xf32>
      %333 = vector.extract_strided_slice %330 {offsets = [2, 0], sizes = [8, 128], strides = [1, 1]} : vector<12x128xf32> to vector<8x128xf32>
      %334 = vector.extract_strided_slice %330 {offsets = [3, 0], sizes = [8, 128], strides = [1, 1]} : vector<12x128xf32> to vector<8x128xf32>
      %335 = vector.extract_strided_slice %330 {offsets = [4, 0], sizes = [8, 128], strides = [1, 1]} : vector<12x128xf32> to vector<8x128xf32>
      %336 = tpu.concatenate %331, %332, %333, %334, %335 in 1 : vector<8x128xf32>, vector<8x128xf32>, vector<8x128xf32>, vector<8x128xf32>, vector<8x128xf32> -> vector<8x640xf32>
      %337 = arith.truncf %336 : vector<8x640xf32> to vector<8x640xbf16>
      %c0_141 = arith.constant 0 : index
      %c0_142 = arith.constant 0 : index
      %c0_143 = arith.constant 0 : index
      %338 = vector.load %arg3[%c0_141, %c0_142, %c0_143] : memref<3x640x128xbf16, #tpu.memory_space<vmem>>, vector<1x640x128xbf16>
      %339 = vector.shape_cast %338 : vector<1x640x128xbf16> to vector<640x128xbf16>
      %cst_144 = arith.constant dense<0.000000e+00> : vector<8x128xf32>
      %340 = tpu.matmul %337, %339, %cst_144 {dimension_numbers = #tpu.dot_dimension_numbers<[1], [0], [0], [1], [0, 0, 1, 1], [], []>} : vector<8x640xbf16>, vector<640x128xbf16>, vector<8x128xf32> -> vector<8x128xf32>
      %c0_145 = arith.constant 0 : index
      %c0_146 = arith.constant 0 : index
      %c0_147 = arith.constant 0 : index
      %341 = vector.load %arg4[%c0_145, %c0_146, %c0_147] : memref<3x1x128xf32, #tpu.memory_space<vmem>>, vector<1x1x128xf32>
      %342 = vector.shape_cast %341 : vector<1x1x128xf32> to vector<1x128xf32>
      %343 = vector.broadcast %342 : vector<1x128xf32> to vector<8x128xf32>
      %344 = arith.mulf %340, %343 : vector<8x128xf32>
      %c0_148 = arith.constant 0 : index
      %c0_149 = arith.constant 0 : index
      %c0_150 = arith.constant 0 : index
      %345 = vector.load %arg5[%c0_148, %c0_149, %c0_150] : memref<3x1x128xf32, #tpu.memory_space<vmem>>, vector<1x1x128xf32>
      %346 = vector.shape_cast %345 : vector<1x1x128xf32> to vector<1x128xf32>
      %347 = vector.broadcast %346 : vector<1x128xf32> to vector<8x128xf32>
      %348 = arith.addf %344, %347 : vector<8x128xf32>
      %cst_151 = arith.constant 0.000000e+00 : f32
      %349 = vector.broadcast %cst_151 : f32 to vector<8x128xf32>
      %350 = arith.maximumf %348, %349 : vector<8x128xf32>
      %351 = tpu.concatenate %257, %350, %257 in 0 : vector<2x128xf32>, vector<8x128xf32>, vector<2x128xf32> -> vector<12x128xf32>
      %352 = vector.extract_strided_slice %351 {offsets = [0, 0], sizes = [8, 128], strides = [1, 1]} : vector<12x128xf32> to vector<8x128xf32>
      %353 = vector.extract_strided_slice %351 {offsets = [1, 0], sizes = [8, 128], strides = [1, 1]} : vector<12x128xf32> to vector<8x128xf32>
      %354 = vector.extract_strided_slice %351 {offsets = [2, 0], sizes = [8, 128], strides = [1, 1]} : vector<12x128xf32> to vector<8x128xf32>
      %355 = vector.extract_strided_slice %351 {offsets = [3, 0], sizes = [8, 128], strides = [1, 1]} : vector<12x128xf32> to vector<8x128xf32>
      %356 = vector.extract_strided_slice %351 {offsets = [4, 0], sizes = [8, 128], strides = [1, 1]} : vector<12x128xf32> to vector<8x128xf32>
      %357 = tpu.concatenate %352, %353, %354, %355, %356 in 1 : vector<8x128xf32>, vector<8x128xf32>, vector<8x128xf32>, vector<8x128xf32>, vector<8x128xf32> -> vector<8x640xf32>
      %358 = arith.truncf %357 : vector<8x640xf32> to vector<8x640xbf16>
      %c1_152 = arith.constant 1 : index
      %c0_153 = arith.constant 0 : index
      %c0_154 = arith.constant 0 : index
      %359 = vector.load %arg3[%c1_152, %c0_153, %c0_154] : memref<3x640x128xbf16, #tpu.memory_space<vmem>>, vector<1x640x128xbf16>
      %360 = vector.shape_cast %359 : vector<1x640x128xbf16> to vector<640x128xbf16>
      %cst_155 = arith.constant dense<0.000000e+00> : vector<8x128xf32>
      %361 = tpu.matmul %358, %360, %cst_155 {dimension_numbers = #tpu.dot_dimension_numbers<[1], [0], [0], [1], [0, 0, 1, 1], [], []>} : vector<8x640xbf16>, vector<640x128xbf16>, vector<8x128xf32> -> vector<8x128xf32>
      %c1_156 = arith.constant 1 : index
      %c0_157 = arith.constant 0 : index
      %c0_158 = arith.constant 0 : index
      %362 = vector.load %arg4[%c1_156, %c0_157, %c0_158] : memref<3x1x128xf32, #tpu.memory_space<vmem>>, vector<1x1x128xf32>
      %363 = vector.shape_cast %362 : vector<1x1x128xf32> to vector<1x128xf32>
      %364 = vector.broadcast %363 : vector<1x128xf32> to vector<8x128xf32>
      %365 = arith.mulf %361, %364 : vector<8x128xf32>
      %c1_159 = arith.constant 1 : index
      %c0_160 = arith.constant 0 : index
      %c0_161 = arith.constant 0 : index
      %366 = vector.load %arg5[%c1_159, %c0_160, %c0_161] : memref<3x1x128xf32, #tpu.memory_space<vmem>>, vector<1x1x128xf32>
      %367 = vector.shape_cast %366 : vector<1x1x128xf32> to vector<1x128xf32>
      %368 = vector.broadcast %367 : vector<1x128xf32> to vector<8x128xf32>
      %369 = arith.addf %365, %368 : vector<8x128xf32>
      %cst_162 = arith.constant 0.000000e+00 : f32
      %370 = vector.broadcast %cst_162 : f32 to vector<8x128xf32>
      %371 = arith.maximumf %369, %370 : vector<8x128xf32>
      %372 = tpu.concatenate %257, %371, %257 in 0 : vector<2x128xf32>, vector<8x128xf32>, vector<2x128xf32> -> vector<12x128xf32>
      %373 = vector.extract_strided_slice %372 {offsets = [0, 0], sizes = [8, 128], strides = [1, 1]} : vector<12x128xf32> to vector<8x128xf32>
      %374 = vector.extract_strided_slice %372 {offsets = [1, 0], sizes = [8, 128], strides = [1, 1]} : vector<12x128xf32> to vector<8x128xf32>
      %375 = vector.extract_strided_slice %372 {offsets = [2, 0], sizes = [8, 128], strides = [1, 1]} : vector<12x128xf32> to vector<8x128xf32>
      %376 = vector.extract_strided_slice %372 {offsets = [3, 0], sizes = [8, 128], strides = [1, 1]} : vector<12x128xf32> to vector<8x128xf32>
      %377 = vector.extract_strided_slice %372 {offsets = [4, 0], sizes = [8, 128], strides = [1, 1]} : vector<12x128xf32> to vector<8x128xf32>
      %378 = tpu.concatenate %373, %374, %375, %376, %377 in 1 : vector<8x128xf32>, vector<8x128xf32>, vector<8x128xf32>, vector<8x128xf32>, vector<8x128xf32> -> vector<8x640xf32>
      %379 = arith.truncf %378 : vector<8x640xf32> to vector<8x640xbf16>
      %c2_163 = arith.constant 2 : index
      %c0_164 = arith.constant 0 : index
      %c0_165 = arith.constant 0 : index
      %380 = vector.load %arg3[%c2_163, %c0_164, %c0_165] : memref<3x640x128xbf16, #tpu.memory_space<vmem>>, vector<1x640x128xbf16>
      %381 = vector.shape_cast %380 : vector<1x640x128xbf16> to vector<640x128xbf16>
      %cst_166 = arith.constant dense<0.000000e+00> : vector<8x128xf32>
      %382 = tpu.matmul %379, %381, %cst_166 {dimension_numbers = #tpu.dot_dimension_numbers<[1], [0], [0], [1], [0, 0, 1, 1], [], []>} : vector<8x640xbf16>, vector<640x128xbf16>, vector<8x128xf32> -> vector<8x128xf32>
      %c2_167 = arith.constant 2 : index
      %c0_168 = arith.constant 0 : index
      %c0_169 = arith.constant 0 : index
      %383 = vector.load %arg4[%c2_167, %c0_168, %c0_169] : memref<3x1x128xf32, #tpu.memory_space<vmem>>, vector<1x1x128xf32>
      %384 = vector.shape_cast %383 : vector<1x1x128xf32> to vector<1x128xf32>
      %385 = vector.broadcast %384 : vector<1x128xf32> to vector<8x128xf32>
      %386 = arith.mulf %382, %385 : vector<8x128xf32>
      %c2_170 = arith.constant 2 : index
      %c0_171 = arith.constant 0 : index
      %c0_172 = arith.constant 0 : index
      %387 = vector.load %arg5[%c2_170, %c0_171, %c0_172] : memref<3x1x128xf32, #tpu.memory_space<vmem>>, vector<1x1x128xf32>
      %388 = vector.shape_cast %387 : vector<1x1x128xf32> to vector<1x128xf32>
      %389 = vector.broadcast %388 : vector<1x128xf32> to vector<8x128xf32>
      %390 = arith.addf %386, %389 : vector<8x128xf32>
      %cst_173 = arith.constant 0.000000e+00 : f32
      %391 = vector.broadcast %cst_173 : f32 to vector<8x128xf32>
      %392 = arith.maximumf %390, %391 : vector<8x128xf32>
      %c0_174 = arith.constant 0 : index
      %c0_175 = arith.constant 0 : index
      %393 = vector.load %arg2[%c0_174, %c0_175] : memref<8x128xf32, #tpu.memory_space<vmem>>, vector<8x128xf32>
      %394 = arith.addf %392, %393 : vector<8x128xf32>
      %c1_176 = arith.constant 1 : index
      %c0_177 = arith.constant 0 : index
      %c0_178 = arith.constant 0 : index
      %395 = vector.load %arg19[%c1_176, %c0_177, %c0_178] : memref<2x8x128xf32, #tpu.memory_space<vmem>>, vector<1x8x128xf32>
      %396 = vector.shape_cast %395 : vector<1x8x128xf32> to vector<8x128xf32>
      %397 = vector.shape_cast %394 : vector<8x128xf32> to vector<1x8x128xf32>
      tpu.vector_store %arg19[%c1_176, %c0_177, %c0_178], %397 {strides = array<i32>} : memref<2x8x128xf32, #tpu.memory_space<vmem>>, vector<1x8x128xf32>,
    } else {
    }
    %c0 = arith.constant 0 : index
    %c0_1 = arith.constant 0 : index
    %c0_2 = arith.constant 0 : index
    %3 = vector.load %arg19[%c0, %c0_1, %c0_2] : memref<2x8x128xf32, #tpu.memory_space<vmem>>, vector<2x8x128xf32>
    %4 = vector.shape_cast %3 : vector<2x8x128xf32> to vector<16x128xf32>
    %5 = arith.truncf %4 : vector<16x128xf32> to vector<16x128xbf16>
    %c0_3 = arith.constant 0 : index
    %c0_4 = arith.constant 0 : index
    %c0_5 = arith.constant 0 : index
    %6 = vector.load %arg7[%c0_3, %c0_4, %c0_5] : memref<1x128x384xbf16, #tpu.memory_space<vmem>>, vector<1x128x384xbf16>
    %7 = vector.shape_cast %6 : vector<1x128x384xbf16> to vector<128x384xbf16>
    %cst = arith.constant dense<0.000000e+00> : vector<16x384xf32>
    %8 = tpu.matmul %5, %7, %cst {dimension_numbers = #tpu.dot_dimension_numbers<[1], [0], [0], [1], [0, 0, 1, 1], [], []>} : vector<16x128xbf16>, vector<128x384xbf16>, vector<16x384xf32> -> vector<16x384xf32>
    %c0_6 = arith.constant 0 : index
    %c0_7 = arith.constant 0 : index
    %c0_8 = arith.constant 0 : index
    %9 = vector.load %arg8[%c0_6, %c0_7, %c0_8] : memref<1x1x384xf32, #tpu.memory_space<vmem>>, vector<1x1x384xf32>
    %10 = vector.shape_cast %9 : vector<1x1x384xf32> to vector<1x384xf32>
    %11 = vector.broadcast %10 : vector<1x384xf32> to vector<16x384xf32>
    %12 = arith.addf %8, %11 : vector<16x384xf32>
    %13 = vector.extract_strided_slice %12 {offsets = [0, 0], sizes = [16, 128], strides = [1, 1]} : vector<16x384xf32> to vector<16x128xf32>
    %14 = vector.shape_cast %13 : vector<16x128xf32> to vector<2x8x128xf32>
    %15 = arith.truncf %14 : vector<2x8x128xf32> to vector<2x8x128xbf16>
    %16 = vector.extract_strided_slice %12 {offsets = [0, 128], sizes = [16, 128], strides = [1, 1]} : vector<16x384xf32> to vector<16x128xf32>
    %17 = vector.shape_cast %16 : vector<16x128xf32> to vector<2x8x128xf32>
    %18 = arith.truncf %17 : vector<2x8x128xf32> to vector<2x8x128xbf16>
    %19 = vector.extract_strided_slice %12 {offsets = [0, 256], sizes = [16, 128], strides = [1, 1]} : vector<16x384xf32> to vector<16x128xf32>
    %20 = vector.shape_cast %19 : vector<16x128xf32> to vector<2x8x128xf32>
    %21 = arith.truncf %20 : vector<2x8x128xf32> to vector<2x8x128xbf16>
    %c0_9 = arith.constant 0 : index
    %c0_10 = arith.constant 0 : index
    %22 = vector.load %arg6[%c0_9, %c0_10] : memref<2x8xf32, #tpu.memory_space<vmem>>, vector<2x8xf32>
    %23 = vector.shape_cast %22 : vector<2x8xf32> to vector<2x1x8xf32>
    %24 = vector.broadcast %23 : vector<2x1x8xf32> to vector<2x8x8xf32>
    %25 = vector.extract_strided_slice %15 {offsets = [0, 0, 0], sizes = [2, 8, 16], strides = [1, 1, 1]} : vector<2x8x128xbf16> to vector<2x8x16xbf16>
    %26 = vector.extract_strided_slice %18 {offsets = [0, 0, 0], sizes = [2, 8, 16], strides = [1, 1, 1]} : vector<2x8x128xbf16> to vector<2x8x16xbf16>
    "tpu.trace_start"() <{level = 10 : i32, message = "nqd,nkd->nqk"}> : () -> ()
    %cst_11 = arith.constant dense<0.000000e+00> : vector<2x8x8xf32>
    %27 = tpu.matmul %25, %26, %cst_11 {dimension_numbers = #tpu.dot_dimension_numbers<[2], [2], [1], [1], [0, 0, 0, 1, 1, 1], [0], [0]>} : vector<2x8x16xbf16>, vector<2x8x16xbf16>, vector<2x8x8xf32> -> vector<2x8x8xf32>
    "tpu.trace_stop"() : () -> ()
    %cst_12 = arith.constant 2.500000e-01 : f32
    %28 = vector.broadcast %cst_12 : f32 to vector<2x8x8xf32>
    %29 = arith.mulf %27, %28 : vector<2x8x8xf32>
    %30 = arith.addf %29, %24 : vector<2x8x8xf32>
    %cst_13 = arith.constant dense<0xFF800000> : vector<2x8xf32>
    %31 = vector.multi_reduction <maximumf>, %30, %cst_13 [2] : vector<2x8x8xf32> to vector<2x8xf32>
    %32 = vector.shape_cast %31 : vector<2x8xf32> to vector<2x8x1xf32>
    %33 = vector.broadcast %32 : vector<2x8x1xf32> to vector<2x8x8xf32>
    %34 = arith.subf %30, %33 : vector<2x8x8xf32>
    %35 = math.exp %34 : vector<2x8x8xf32>
    %cst_14 = arith.constant dense<0.000000e+00> : vector<2x8xf32>
    %36 = vector.multi_reduction <add>, %35, %cst_14 [2] : vector<2x8x8xf32> to vector<2x8xf32>
    %37 = vector.shape_cast %36 : vector<2x8xf32> to vector<2x8x1xf32>
    %38 = tpu.reciprocal %37 {approx = true} : vector<2x8x1xf32> -> vector<2x8x1xf32>
    %39 = vector.broadcast %38 : vector<2x8x1xf32> to vector<2x8x8xf32>
    %40 = arith.mulf %35, %39 : vector<2x8x8xf32>
    %41 = arith.truncf %40 : vector<2x8x8xf32> to vector<2x8x8xbf16>
    %42 = vector.extract_strided_slice %21 {offsets = [0, 0, 0], sizes = [2, 8, 16], strides = [1, 1, 1]} : vector<2x8x128xbf16> to vector<2x8x16xbf16>
    "tpu.trace_start"() <{level = 10 : i32, message = "nqk,nkd->nqd"}> : () -> ()
    %cst_15 = arith.constant dense<0.000000e+00> : vector<2x8x16xf32>
    %43 = tpu.matmul %41, %42, %cst_15 {dimension_numbers = #tpu.dot_dimension_numbers<[2], [1], [1], [2], [0, 0, 0, 1, 1, 2], [0], [0]>} : vector<2x8x8xbf16>, vector<2x8x16xbf16>, vector<2x8x16xf32> -> vector<2x8x16xf32>
    "tpu.trace_stop"() : () -> ()
    %44 = vector.extract_strided_slice %15 {offsets = [0, 0, 16], sizes = [2, 8, 16], strides = [1, 1, 1]} : vector<2x8x128xbf16> to vector<2x8x16xbf16>
    %45 = vector.extract_strided_slice %18 {offsets = [0, 0, 16], sizes = [2, 8, 16], strides = [1, 1, 1]} : vector<2x8x128xbf16> to vector<2x8x16xbf16>
    "tpu.trace_start"() <{level = 10 : i32, message = "nqd,nkd->nqk"}> : () -> ()
    %cst_16 = arith.constant dense<0.000000e+00> : vector<2x8x8xf32>
    %46 = tpu.matmul %44, %45, %cst_16 {dimension_numbers = #tpu.dot_dimension_numbers<[2], [2], [1], [1], [0, 0, 0, 1, 1, 1], [0], [0]>} : vector<2x8x16xbf16>, vector<2x8x16xbf16>, vector<2x8x8xf32> -> vector<2x8x8xf32>
    "tpu.trace_stop"() : () -> ()
    %cst_17 = arith.constant 2.500000e-01 : f32
    %47 = vector.broadcast %cst_17 : f32 to vector<2x8x8xf32>
    %48 = arith.mulf %46, %47 : vector<2x8x8xf32>
    %49 = arith.addf %48, %24 : vector<2x8x8xf32>
    %cst_18 = arith.constant dense<0xFF800000> : vector<2x8xf32>
    %50 = vector.multi_reduction <maximumf>, %49, %cst_18 [2] : vector<2x8x8xf32> to vector<2x8xf32>
    %51 = vector.shape_cast %50 : vector<2x8xf32> to vector<2x8x1xf32>
    %52 = vector.broadcast %51 : vector<2x8x1xf32> to vector<2x8x8xf32>
    %53 = arith.subf %49, %52 : vector<2x8x8xf32>
    %54 = math.exp %53 : vector<2x8x8xf32>
    %cst_19 = arith.constant dense<0.000000e+00> : vector<2x8xf32>
    %55 = vector.multi_reduction <add>, %54, %cst_19 [2] : vector<2x8x8xf32> to vector<2x8xf32>
    %56 = vector.shape_cast %55 : vector<2x8xf32> to vector<2x8x1xf32>
    %57 = tpu.reciprocal %56 {approx = true} : vector<2x8x1xf32> -> vector<2x8x1xf32>
    %58 = vector.broadcast %57 : vector<2x8x1xf32> to vector<2x8x8xf32>
    %59 = arith.mulf %54, %58 : vector<2x8x8xf32>
    %60 = arith.truncf %59 : vector<2x8x8xf32> to vector<2x8x8xbf16>
    %61 = vector.extract_strided_slice %21 {offsets = [0, 0, 16], sizes = [2, 8, 16], strides = [1, 1, 1]} : vector<2x8x128xbf16> to vector<2x8x16xbf16>
    "tpu.trace_start"() <{level = 10 : i32, message = "nqk,nkd->nqd"}> : () -> ()
    %cst_20 = arith.constant dense<0.000000e+00> : vector<2x8x16xf32>
    %62 = tpu.matmul %60, %61, %cst_20 {dimension_numbers = #tpu.dot_dimension_numbers<[2], [1], [1], [2], [0, 0, 0, 1, 1, 2], [0], [0]>} : vector<2x8x8xbf16>, vector<2x8x16xbf16>, vector<2x8x16xf32> -> vector<2x8x16xf32>
    "tpu.trace_stop"() : () -> ()
    %63 = vector.extract_strided_slice %15 {offsets = [0, 0, 32], sizes = [2, 8, 16], strides = [1, 1, 1]} : vector<2x8x128xbf16> to vector<2x8x16xbf16>
    %64 = vector.extract_strided_slice %18 {offsets = [0, 0, 32], sizes = [2, 8, 16], strides = [1, 1, 1]} : vector<2x8x128xbf16> to vector<2x8x16xbf16>
    "tpu.trace_start"() <{level = 10 : i32, message = "nqd,nkd->nqk"}> : () -> ()
    %cst_21 = arith.constant dense<0.000000e+00> : vector<2x8x8xf32>
    %65 = tpu.matmul %63, %64, %cst_21 {dimension_numbers = #tpu.dot_dimension_numbers<[2], [2], [1], [1], [0, 0, 0, 1, 1, 1], [0], [0]>} : vector<2x8x16xbf16>, vector<2x8x16xbf16>, vector<2x8x8xf32> -> vector<2x8x8xf32>
    "tpu.trace_stop"() : () -> ()
    %cst_22 = arith.constant 2.500000e-01 : f32
    %66 = vector.broadcast %cst_22 : f32 to vector<2x8x8xf32>
    %67 = arith.mulf %65, %66 : vector<2x8x8xf32>
    %68 = arith.addf %67, %24 : vector<2x8x8xf32>
    %cst_23 = arith.constant dense<0xFF800000> : vector<2x8xf32>
    %69 = vector.multi_reduction <maximumf>, %68, %cst_23 [2] : vector<2x8x8xf32> to vector<2x8xf32>
    %70 = vector.shape_cast %69 : vector<2x8xf32> to vector<2x8x1xf32>
    %71 = vector.broadcast %70 : vector<2x8x1xf32> to vector<2x8x8xf32>
    %72 = arith.subf %68, %71 : vector<2x8x8xf32>
    %73 = math.exp %72 : vector<2x8x8xf32>
    %cst_24 = arith.constant dense<0.000000e+00> : vector<2x8xf32>
    %74 = vector.multi_reduction <add>, %73, %cst_24 [2] : vector<2x8x8xf32> to vector<2x8xf32>
    %75 = vector.shape_cast %74 : vector<2x8xf32> to vector<2x8x1xf32>
    %76 = tpu.reciprocal %75 {approx = true} : vector<2x8x1xf32> -> vector<2x8x1xf32>
    %77 = vector.broadcast %76 : vector<2x8x1xf32> to vector<2x8x8xf32>
    %78 = arith.mulf %73, %77 : vector<2x8x8xf32>
    %79 = arith.truncf %78 : vector<2x8x8xf32> to vector<2x8x8xbf16>
    %80 = vector.extract_strided_slice %21 {offsets = [0, 0, 32], sizes = [2, 8, 16], strides = [1, 1, 1]} : vector<2x8x128xbf16> to vector<2x8x16xbf16>
    "tpu.trace_start"() <{level = 10 : i32, message = "nqk,nkd->nqd"}> : () -> ()
    %cst_25 = arith.constant dense<0.000000e+00> : vector<2x8x16xf32>
    %81 = tpu.matmul %79, %80, %cst_25 {dimension_numbers = #tpu.dot_dimension_numbers<[2], [1], [1], [2], [0, 0, 0, 1, 1, 2], [0], [0]>} : vector<2x8x8xbf16>, vector<2x8x16xbf16>, vector<2x8x16xf32> -> vector<2x8x16xf32>
    "tpu.trace_stop"() : () -> ()
    %82 = vector.extract_strided_slice %15 {offsets = [0, 0, 48], sizes = [2, 8, 16], strides = [1, 1, 1]} : vector<2x8x128xbf16> to vector<2x8x16xbf16>
    %83 = vector.extract_strided_slice %18 {offsets = [0, 0, 48], sizes = [2, 8, 16], strides = [1, 1, 1]} : vector<2x8x128xbf16> to vector<2x8x16xbf16>
    "tpu.trace_start"() <{level = 10 : i32, message = "nqd,nkd->nqk"}> : () -> ()
    %cst_26 = arith.constant dense<0.000000e+00> : vector<2x8x8xf32>
    %84 = tpu.matmul %82, %83, %cst_26 {dimension_numbers = #tpu.dot_dimension_numbers<[2], [2], [1], [1], [0, 0, 0, 1, 1, 1], [0], [0]>} : vector<2x8x16xbf16>, vector<2x8x16xbf16>, vector<2x8x8xf32> -> vector<2x8x8xf32>
    "tpu.trace_stop"() : () -> ()
    %cst_27 = arith.constant 2.500000e-01 : f32
    %85 = vector.broadcast %cst_27 : f32 to vector<2x8x8xf32>
    %86 = arith.mulf %84, %85 : vector<2x8x8xf32>
    %87 = arith.addf %86, %24 : vector<2x8x8xf32>
    %cst_28 = arith.constant dense<0xFF800000> : vector<2x8xf32>
    %88 = vector.multi_reduction <maximumf>, %87, %cst_28 [2] : vector<2x8x8xf32> to vector<2x8xf32>
    %89 = vector.shape_cast %88 : vector<2x8xf32> to vector<2x8x1xf32>
    %90 = vector.broadcast %89 : vector<2x8x1xf32> to vector<2x8x8xf32>
    %91 = arith.subf %87, %90 : vector<2x8x8xf32>
    %92 = math.exp %91 : vector<2x8x8xf32>
    %cst_29 = arith.constant dense<0.000000e+00> : vector<2x8xf32>
    %93 = vector.multi_reduction <add>, %92, %cst_29 [2] : vector<2x8x8xf32> to vector<2x8xf32>
    %94 = vector.shape_cast %93 : vector<2x8xf32> to vector<2x8x1xf32>
    %95 = tpu.reciprocal %94 {approx = true} : vector<2x8x1xf32> -> vector<2x8x1xf32>
    %96 = vector.broadcast %95 : vector<2x8x1xf32> to vector<2x8x8xf32>
    %97 = arith.mulf %92, %96 : vector<2x8x8xf32>
    %98 = arith.truncf %97 : vector<2x8x8xf32> to vector<2x8x8xbf16>
    %99 = vector.extract_strided_slice %21 {offsets = [0, 0, 48], sizes = [2, 8, 16], strides = [1, 1, 1]} : vector<2x8x128xbf16> to vector<2x8x16xbf16>
    "tpu.trace_start"() <{level = 10 : i32, message = "nqk,nkd->nqd"}> : () -> ()
    %cst_30 = arith.constant dense<0.000000e+00> : vector<2x8x16xf32>
    %100 = tpu.matmul %98, %99, %cst_30 {dimension_numbers = #tpu.dot_dimension_numbers<[2], [1], [1], [2], [0, 0, 0, 1, 1, 2], [0], [0]>} : vector<2x8x8xbf16>, vector<2x8x16xbf16>, vector<2x8x16xf32> -> vector<2x8x16xf32>
    "tpu.trace_stop"() : () -> ()
    %101 = vector.extract_strided_slice %15 {offsets = [0, 0, 64], sizes = [2, 8, 16], strides = [1, 1, 1]} : vector<2x8x128xbf16> to vector<2x8x16xbf16>
    %102 = vector.extract_strided_slice %18 {offsets = [0, 0, 64], sizes = [2, 8, 16], strides = [1, 1, 1]} : vector<2x8x128xbf16> to vector<2x8x16xbf16>
    "tpu.trace_start"() <{level = 10 : i32, message = "nqd,nkd->nqk"}> : () -> ()
    %cst_31 = arith.constant dense<0.000000e+00> : vector<2x8x8xf32>
    %103 = tpu.matmul %101, %102, %cst_31 {dimension_numbers = #tpu.dot_dimension_numbers<[2], [2], [1], [1], [0, 0, 0, 1, 1, 1], [0], [0]>} : vector<2x8x16xbf16>, vector<2x8x16xbf16>, vector<2x8x8xf32> -> vector<2x8x8xf32>
    "tpu.trace_stop"() : () -> ()
    %cst_32 = arith.constant 2.500000e-01 : f32
    %104 = vector.broadcast %cst_32 : f32 to vector<2x8x8xf32>
    %105 = arith.mulf %103, %104 : vector<2x8x8xf32>
    %106 = arith.addf %105, %24 : vector<2x8x8xf32>
    %cst_33 = arith.constant dense<0xFF800000> : vector<2x8xf32>
    %107 = vector.multi_reduction <maximumf>, %106, %cst_33 [2] : vector<2x8x8xf32> to vector<2x8xf32>
    %108 = vector.shape_cast %107 : vector<2x8xf32> to vector<2x8x1xf32>
    %109 = vector.broadcast %108 : vector<2x8x1xf32> to vector<2x8x8xf32>
    %110 = arith.subf %106, %109 : vector<2x8x8xf32>
    %111 = math.exp %110 : vector<2x8x8xf32>
    %cst_34 = arith.constant dense<0.000000e+00> : vector<2x8xf32>
    %112 = vector.multi_reduction <add>, %111, %cst_34 [2] : vector<2x8x8xf32> to vector<2x8xf32>
    %113 = vector.shape_cast %112 : vector<2x8xf32> to vector<2x8x1xf32>
    %114 = tpu.reciprocal %113 {approx = true} : vector<2x8x1xf32> -> vector<2x8x1xf32>
    %115 = vector.broadcast %114 : vector<2x8x1xf32> to vector<2x8x8xf32>
    %116 = arith.mulf %111, %115 : vector<2x8x8xf32>
    %117 = arith.truncf %116 : vector<2x8x8xf32> to vector<2x8x8xbf16>
    %118 = vector.extract_strided_slice %21 {offsets = [0, 0, 64], sizes = [2, 8, 16], strides = [1, 1, 1]} : vector<2x8x128xbf16> to vector<2x8x16xbf16>
    "tpu.trace_start"() <{level = 10 : i32, message = "nqk,nkd->nqd"}> : () -> ()
    %cst_35 = arith.constant dense<0.000000e+00> : vector<2x8x16xf32>
    %119 = tpu.matmul %117, %118, %cst_35 {dimension_numbers = #tpu.dot_dimension_numbers<[2], [1], [1], [2], [0, 0, 0, 1, 1, 2], [0], [0]>} : vector<2x8x8xbf16>, vector<2x8x16xbf16>, vector<2x8x16xf32> -> vector<2x8x16xf32>
    "tpu.trace_stop"() : () -> ()
    %120 = vector.extract_strided_slice %15 {offsets = [0, 0, 80], sizes = [2, 8, 16], strides = [1, 1, 1]} : vector<2x8x128xbf16> to vector<2x8x16xbf16>
    %121 = vector.extract_strided_slice %18 {offsets = [0, 0, 80], sizes = [2, 8, 16], strides = [1, 1, 1]} : vector<2x8x128xbf16> to vector<2x8x16xbf16>
    "tpu.trace_start"() <{level = 10 : i32, message = "nqd,nkd->nqk"}> : () -> ()
    %cst_36 = arith.constant dense<0.000000e+00> : vector<2x8x8xf32>
    %122 = tpu.matmul %120, %121, %cst_36 {dimension_numbers = #tpu.dot_dimension_numbers<[2], [2], [1], [1], [0, 0, 0, 1, 1, 1], [0], [0]>} : vector<2x8x16xbf16>, vector<2x8x16xbf16>, vector<2x8x8xf32> -> vector<2x8x8xf32>
    "tpu.trace_stop"() : () -> ()
    %cst_37 = arith.constant 2.500000e-01 : f32
    %123 = vector.broadcast %cst_37 : f32 to vector<2x8x8xf32>
    %124 = arith.mulf %122, %123 : vector<2x8x8xf32>
    %125 = arith.addf %124, %24 : vector<2x8x8xf32>
    %cst_38 = arith.constant dense<0xFF800000> : vector<2x8xf32>
    %126 = vector.multi_reduction <maximumf>, %125, %cst_38 [2] : vector<2x8x8xf32> to vector<2x8xf32>
    %127 = vector.shape_cast %126 : vector<2x8xf32> to vector<2x8x1xf32>
    %128 = vector.broadcast %127 : vector<2x8x1xf32> to vector<2x8x8xf32>
    %129 = arith.subf %125, %128 : vector<2x8x8xf32>
    %130 = math.exp %129 : vector<2x8x8xf32>
    %cst_39 = arith.constant dense<0.000000e+00> : vector<2x8xf32>
    %131 = vector.multi_reduction <add>, %130, %cst_39 [2] : vector<2x8x8xf32> to vector<2x8xf32>
    %132 = vector.shape_cast %131 : vector<2x8xf32> to vector<2x8x1xf32>
    %133 = tpu.reciprocal %132 {approx = true} : vector<2x8x1xf32> -> vector<2x8x1xf32>
    %134 = vector.broadcast %133 : vector<2x8x1xf32> to vector<2x8x8xf32>
    %135 = arith.mulf %130, %134 : vector<2x8x8xf32>
    %136 = arith.truncf %135 : vector<2x8x8xf32> to vector<2x8x8xbf16>
    %137 = vector.extract_strided_slice %21 {offsets = [0, 0, 80], sizes = [2, 8, 16], strides = [1, 1, 1]} : vector<2x8x128xbf16> to vector<2x8x16xbf16>
    "tpu.trace_start"() <{level = 10 : i32, message = "nqk,nkd->nqd"}> : () -> ()
    %cst_40 = arith.constant dense<0.000000e+00> : vector<2x8x16xf32>
    %138 = tpu.matmul %136, %137, %cst_40 {dimension_numbers = #tpu.dot_dimension_numbers<[2], [1], [1], [2], [0, 0, 0, 1, 1, 2], [0], [0]>} : vector<2x8x8xbf16>, vector<2x8x16xbf16>, vector<2x8x16xf32> -> vector<2x8x16xf32>
    "tpu.trace_stop"() : () -> ()
    %139 = vector.extract_strided_slice %15 {offsets = [0, 0, 96], sizes = [2, 8, 16], strides = [1, 1, 1]} : vector<2x8x128xbf16> to vector<2x8x16xbf16>
    %140 = vector.extract_strided_slice %18 {offsets = [0, 0, 96], sizes = [2, 8, 16], strides = [1, 1, 1]} : vector<2x8x128xbf16> to vector<2x8x16xbf16>
    "tpu.trace_start"() <{level = 10 : i32, message = "nqd,nkd->nqk"}> : () -> ()
    %cst_41 = arith.constant dense<0.000000e+00> : vector<2x8x8xf32>
    %141 = tpu.matmul %139, %140, %cst_41 {dimension_numbers = #tpu.dot_dimension_numbers<[2], [2], [1], [1], [0, 0, 0, 1, 1, 1], [0], [0]>} : vector<2x8x16xbf16>, vector<2x8x16xbf16>, vector<2x8x8xf32> -> vector<2x8x8xf32>
    "tpu.trace_stop"() : () -> ()
    %cst_42 = arith.constant 2.500000e-01 : f32
    %142 = vector.broadcast %cst_42 : f32 to vector<2x8x8xf32>
    %143 = arith.mulf %141, %142 : vector<2x8x8xf32>
    %144 = arith.addf %143, %24 : vector<2x8x8xf32>
    %cst_43 = arith.constant dense<0xFF800000> : vector<2x8xf32>
    %145 = vector.multi_reduction <maximumf>, %144, %cst_43 [2] : vector<2x8x8xf32> to vector<2x8xf32>
    %146 = vector.shape_cast %145 : vector<2x8xf32> to vector<2x8x1xf32>
    %147 = vector.broadcast %146 : vector<2x8x1xf32> to vector<2x8x8xf32>
    %148 = arith.subf %144, %147 : vector<2x8x8xf32>
    %149 = math.exp %148 : vector<2x8x8xf32>
    %cst_44 = arith.constant dense<0.000000e+00> : vector<2x8xf32>
    %150 = vector.multi_reduction <add>, %149, %cst_44 [2] : vector<2x8x8xf32> to vector<2x8xf32>
    %151 = vector.shape_cast %150 : vector<2x8xf32> to vector<2x8x1xf32>
    %152 = tpu.reciprocal %151 {approx = true} : vector<2x8x1xf32> -> vector<2x8x1xf32>
    %153 = vector.broadcast %152 : vector<2x8x1xf32> to vector<2x8x8xf32>
    %154 = arith.mulf %149, %153 : vector<2x8x8xf32>
    %155 = arith.truncf %154 : vector<2x8x8xf32> to vector<2x8x8xbf16>
    %156 = vector.extract_strided_slice %21 {offsets = [0, 0, 96], sizes = [2, 8, 16], strides = [1, 1, 1]} : vector<2x8x128xbf16> to vector<2x8x16xbf16>
    "tpu.trace_start"() <{level = 10 : i32, message = "nqk,nkd->nqd"}> : () -> ()
    %cst_45 = arith.constant dense<0.000000e+00> : vector<2x8x16xf32>
    %157 = tpu.matmul %155, %156, %cst_45 {dimension_numbers = #tpu.dot_dimension_numbers<[2], [1], [1], [2], [0, 0, 0, 1, 1, 2], [0], [0]>} : vector<2x8x8xbf16>, vector<2x8x16xbf16>, vector<2x8x16xf32> -> vector<2x8x16xf32>
    "tpu.trace_stop"() : () -> ()
    %158 = vector.extract_strided_slice %15 {offsets = [0, 0, 112], sizes = [2, 8, 16], strides = [1, 1, 1]} : vector<2x8x128xbf16> to vector<2x8x16xbf16>
    %159 = vector.extract_strided_slice %18 {offsets = [0, 0, 112], sizes = [2, 8, 16], strides = [1, 1, 1]} : vector<2x8x128xbf16> to vector<2x8x16xbf16>
    "tpu.trace_start"() <{level = 10 : i32, message = "nqd,nkd->nqk"}> : () -> ()
    %cst_46 = arith.constant dense<0.000000e+00> : vector<2x8x8xf32>
    %160 = tpu.matmul %158, %159, %cst_46 {dimension_numbers = #tpu.dot_dimension_numbers<[2], [2], [1], [1], [0, 0, 0, 1, 1, 1], [0], [0]>} : vector<2x8x16xbf16>, vector<2x8x16xbf16>, vector<2x8x8xf32> -> vector<2x8x8xf32>
    "tpu.trace_stop"() : () -> ()
    %cst_47 = arith.constant 2.500000e-01 : f32
    %161 = vector.broadcast %cst_47 : f32 to vector<2x8x8xf32>
    %162 = arith.mulf %160, %161 : vector<2x8x8xf32>
    %163 = arith.addf %162, %24 : vector<2x8x8xf32>
    %cst_48 = arith.constant dense<0xFF800000> : vector<2x8xf32>
    %164 = vector.multi_reduction <maximumf>, %163, %cst_48 [2] : vector<2x8x8xf32> to vector<2x8xf32>
    %165 = vector.shape_cast %164 : vector<2x8xf32> to vector<2x8x1xf32>
    %166 = vector.broadcast %165 : vector<2x8x1xf32> to vector<2x8x8xf32>
    %167 = arith.subf %163, %166 : vector<2x8x8xf32>
    %168 = math.exp %167 : vector<2x8x8xf32>
    %cst_49 = arith.constant dense<0.000000e+00> : vector<2x8xf32>
    %169 = vector.multi_reduction <add>, %168, %cst_49 [2] : vector<2x8x8xf32> to vector<2x8xf32>
    %170 = vector.shape_cast %169 : vector<2x8xf32> to vector<2x8x1xf32>
    %171 = tpu.reciprocal %170 {approx = true} : vector<2x8x1xf32> -> vector<2x8x1xf32>
    %172 = vector.broadcast %171 : vector<2x8x1xf32> to vector<2x8x8xf32>
    %173 = arith.mulf %168, %172 : vector<2x8x8xf32>
    %174 = arith.truncf %173 : vector<2x8x8xf32> to vector<2x8x8xbf16>
    %175 = vector.extract_strided_slice %21 {offsets = [0, 0, 112], sizes = [2, 8, 16], strides = [1, 1, 1]} : vector<2x8x128xbf16> to vector<2x8x16xbf16>
    "tpu.trace_start"() <{level = 10 : i32, message = "nqk,nkd->nqd"}> : () -> ()
    %cst_50 = arith.constant dense<0.000000e+00> : vector<2x8x16xf32>
    %176 = tpu.matmul %174, %175, %cst_50 {dimension_numbers = #tpu.dot_dimension_numbers<[2], [1], [1], [2], [0, 0, 0, 1, 1, 2], [0], [0]>} : vector<2x8x8xbf16>, vector<2x8x16xbf16>, vector<2x8x16xf32> -> vector<2x8x16xf32>
    "tpu.trace_stop"() : () -> ()
    %177 = tpu.concatenate %43, %62, %81, %100, %119, %138, %157, %176 in 2 : vector<2x8x16xf32>, vector<2x8x16xf32>, vector<2x8x16xf32>, vector<2x8x16xf32>, vector<2x8x16xf32>, vector<2x8x16xf32>, vector<2x8x16xf32>, vector<2x8x16xf32> -> vector<2x8x128xf32>
    %178 = vector.shape_cast %177 : vector<2x8x128xf32> to vector<16x128xf32>
    %179 = arith.truncf %178 : vector<16x128xf32> to vector<16x128xbf16>
    %c0_51 = arith.constant 0 : index
    %c0_52 = arith.constant 0 : index
    %c0_53 = arith.constant 0 : index
    %180 = vector.load %arg9[%c0_51, %c0_52, %c0_53] : memref<1x128x128xbf16, #tpu.memory_space<vmem>>, vector<1x128x128xbf16>
    %181 = vector.shape_cast %180 : vector<1x128x128xbf16> to vector<128x128xbf16>
    %cst_54 = arith.constant dense<0.000000e+00> : vector<16x128xf32>
    %182 = tpu.matmul %179, %181, %cst_54 {dimension_numbers = #tpu.dot_dimension_numbers<[1], [0], [0], [1], [0, 0, 1, 1], [], []>} : vector<16x128xbf16>, vector<128x128xbf16>, vector<16x128xf32> -> vector<16x128xf32>
    %c0_55 = arith.constant 0 : index
    %c0_56 = arith.constant 0 : index
    %c0_57 = arith.constant 0 : index
    %183 = vector.load %arg10[%c0_55, %c0_56, %c0_57] : memref<1x1x128xf32, #tpu.memory_space<vmem>>, vector<1x1x128xf32>
    %184 = vector.shape_cast %183 : vector<1x1x128xf32> to vector<1x128xf32>
    %185 = vector.broadcast %184 : vector<1x128xf32> to vector<16x128xf32>
    %186 = arith.addf %182, %185 : vector<16x128xf32>
    %187 = arith.addf %4, %186 : vector<16x128xf32>
    %c0_58 = arith.constant 0 : index
    %c0_59 = arith.constant 0 : index
    %c0_60 = arith.constant 0 : index
    %188 = vector.load %arg11[%c0_58, %c0_59, %c0_60] : memref<1x1x128xf32, #tpu.memory_space<vmem>>, vector<1x1x128xf32>
    %189 = vector.shape_cast %188 : vector<1x1x128xf32> to vector<1x128xf32>
    %c0_61 = arith.constant 0 : index
    %c0_62 = arith.constant 0 : index
    %c0_63 = arith.constant 0 : index
    %190 = vector.load %arg12[%c0_61, %c0_62, %c0_63] : memref<1x1x128xf32, #tpu.memory_space<vmem>>, vector<1x1x128xf32>
    %191 = vector.shape_cast %190 : vector<1x1x128xf32> to vector<1x128xf32>
    %cst_64 = arith.constant dense<0.000000e+00> : vector<16xf32>
    %192 = vector.multi_reduction <add>, %187, %cst_64 [1] : vector<16x128xf32> to vector<16xf32>
    %193 = vector.shape_cast %192 : vector<16xf32> to vector<16x1xf32>
    %cst_65 = arith.constant 1.280000e+02 : f32
    %194 = vector.broadcast %cst_65 : f32 to vector<16x1xf32>
    %195 = arith.divf %193, %194 : vector<16x1xf32>
    %196 = vector.broadcast %195 : vector<16x1xf32> to vector<16x128xf32>
    %197 = arith.subf %187, %196 : vector<16x128xf32>
    %198 = arith.mulf %197, %197 : vector<16x128xf32>
    %cst_66 = arith.constant dense<0.000000e+00> : vector<16xf32>
    %199 = vector.multi_reduction <add>, %198, %cst_66 [1] : vector<16x128xf32> to vector<16xf32>
    %200 = vector.shape_cast %199 : vector<16xf32> to vector<16x1xf32>
    %cst_67 = arith.constant 1.280000e+02 : f32
    %201 = vector.broadcast %cst_67 : f32 to vector<16x1xf32>
    %202 = arith.divf %200, %201 : vector<16x1xf32>
    %cst_68 = arith.constant 9.99999974E-6 : f32
    %203 = vector.broadcast %cst_68 : f32 to vector<16x1xf32>
    %204 = arith.addf %202, %203 : vector<16x1xf32>
    %205 = math.rsqrt %204 : vector<16x1xf32>
    %206 = vector.broadcast %205 : vector<16x1xf32> to vector<16x128xf32>
    %207 = arith.mulf %197, %206 : vector<16x128xf32>
    %208 = vector.broadcast %189 : vector<1x128xf32> to vector<16x128xf32>
    %209 = arith.mulf %207, %208 : vector<16x128xf32>
    %210 = vector.broadcast %191 : vector<1x128xf32> to vector<16x128xf32>
    %211 = arith.addf %209, %210 : vector<16x128xf32>
    %212 = arith.truncf %211 : vector<16x128xf32> to vector<16x128xbf16>
    %c0_69 = arith.constant 0 : index
    %c0_70 = arith.constant 0 : index
    %c0_71 = arith.constant 0 : index
    %213 = vector.load %arg13[%c0_69, %c0_70, %c0_71] : memref<1x128x2048xbf16, #tpu.memory_space<vmem>>, vector<1x128x2048xbf16>
    %214 = vector.shape_cast %213 : vector<1x128x2048xbf16> to vector<128x2048xbf16>
    %cst_72 = arith.constant dense<0.000000e+00> : vector<16x2048xf32>
    %215 = tpu.matmul %212, %214, %cst_72 {dimension_numbers = #tpu.dot_dimension_numbers<[1], [0], [0], [1], [0, 0, 1, 1], [], []>} : vector<16x128xbf16>, vector<128x2048xbf16>, vector<16x2048xf32> -> vector<16x2048xf32>
    %c0_73 = arith.constant 0 : index
    %c0_74 = arith.constant 0 : index
    %c0_75 = arith.constant 0 : index
    %216 = vector.load %arg14[%c0_73, %c0_74, %c0_75] : memref<1x1x2048xf32, #tpu.memory_space<vmem>>, vector<1x1x2048xf32>
    %217 = vector.shape_cast %216 : vector<1x1x2048xf32> to vector<1x2048xf32>
    %218 = vector.broadcast %217 : vector<1x2048xf32> to vector<16x2048xf32>
    %219 = arith.addf %215, %218 : vector<16x2048xf32>
    %cst_76 = arith.constant 0.000000e+00 : f32
    %220 = vector.broadcast %cst_76 : f32 to vector<16x2048xf32>
    %221 = arith.maximumf %219, %220 : vector<16x2048xf32>
    %222 = arith.truncf %221 : vector<16x2048xf32> to vector<16x2048xbf16>
    %c0_77 = arith.constant 0 : index
    %c0_78 = arith.constant 0 : index
    %c0_79 = arith.constant 0 : index
    %223 = vector.load %arg15[%c0_77, %c0_78, %c0_79] : memref<1x2048x128xbf16, #tpu.memory_space<vmem>>, vector<1x2048x128xbf16>
    %224 = vector.shape_cast %223 : vector<1x2048x128xbf16> to vector<2048x128xbf16>
    %cst_80 = arith.constant dense<0.000000e+00> : vector<16x128xf32>
    %225 = tpu.matmul %222, %224, %cst_80 {dimension_numbers = #tpu.dot_dimension_numbers<[1], [0], [0], [1], [0, 0, 1, 1], [], []>} : vector<16x2048xbf16>, vector<2048x128xbf16>, vector<16x128xf32> -> vector<16x128xf32>
    %c0_81 = arith.constant 0 : index
    %c0_82 = arith.constant 0 : index
    %c0_83 = arith.constant 0 : index
    %226 = vector.load %arg16[%c0_81, %c0_82, %c0_83] : memref<1x1x128xf32, #tpu.memory_space<vmem>>, vector<1x1x128xf32>
    %227 = vector.shape_cast %226 : vector<1x1x128xf32> to vector<1x128xf32>
    %228 = vector.broadcast %227 : vector<1x128xf32> to vector<16x128xf32>
    %229 = arith.addf %225, %228 : vector<16x128xf32>
    %230 = arith.addf %211, %229 : vector<16x128xf32>
    %c0_84 = arith.constant 0 : index
    %c0_85 = arith.constant 0 : index
    %c0_86 = arith.constant 0 : index
    %231 = vector.load %arg17[%c0_84, %c0_85, %c0_86] : memref<1x1x128xf32, #tpu.memory_space<vmem>>, vector<1x1x128xf32>
    %232 = vector.shape_cast %231 : vector<1x1x128xf32> to vector<1x128xf32>
    %c0_87 = arith.constant 0 : index
    %c0_88 = arith.constant 0 : index
    %c0_89 = arith.constant 0 : index
    %233 = vector.load %arg18[%c0_87, %c0_88, %c0_89] : memref<1x1x128xf32, #tpu.memory_space<vmem>>, vector<1x1x128xf32>
    %234 = vector.shape_cast %233 : vector<1x1x128xf32> to vector<1x128xf32>
    %cst_90 = arith.constant dense<0.000000e+00> : vector<16xf32>
    %235 = vector.multi_reduction <add>, %230, %cst_90 [1] : vector<16x128xf32> to vector<16xf32>
    %236 = vector.shape_cast %235 : vector<16xf32> to vector<16x1xf32>
    %cst_91 = arith.constant 1.280000e+02 : f32
    %237 = vector.broadcast %cst_91 : f32 to vector<16x1xf32>
    %238 = arith.divf %236, %237 : vector<16x1xf32>
    %239 = vector.broadcast %238 : vector<16x1xf32> to vector<16x128xf32>
    %240 = arith.subf %230, %239 : vector<16x128xf32>
    %241 = arith.mulf %240, %240 : vector<16x128xf32>
    %cst_92 = arith.constant dense<0.000000e+00> : vector<16xf32>
    %242 = vector.multi_reduction <add>, %241, %cst_92 [1] : vector<16x128xf32> to vector<16xf32>
    %243 = vector.shape_cast %242 : vector<16xf32> to vector<16x1xf32>
    %cst_93 = arith.constant 1.280000e+02 : f32
    %244 = vector.broadcast %cst_93 : f32 to vector<16x1xf32>
    %245 = arith.divf %243, %244 : vector<16x1xf32>
    %cst_94 = arith.constant 9.99999974E-6 : f32
    %246 = vector.broadcast %cst_94 : f32 to vector<16x1xf32>
    %247 = arith.addf %245, %246 : vector<16x1xf32>
    %248 = math.rsqrt %247 : vector<16x1xf32>
    %249 = vector.broadcast %248 : vector<16x1xf32> to vector<16x128xf32>
    %250 = arith.mulf %240, %249 : vector<16x128xf32>
    %251 = vector.broadcast %232 : vector<1x128xf32> to vector<16x128xf32>
    %252 = arith.mulf %250, %251 : vector<16x128xf32>
    %253 = vector.broadcast %234 : vector<1x128xf32> to vector<16x128xf32>
    %254 = arith.addf %252, %253 : vector<16x128xf32>
    %255 = vector.shape_cast %254 : vector<16x128xf32> to vector<2x8x128xf32>
    %c0_95 = arith.constant 0 : index
    %c0_96 = arith.constant 0 : index
    %c0_97 = arith.constant 0 : index
    %256 = vector.load %arg19[%c0_95, %c0_96, %c0_97] : memref<2x8x128xf32, #tpu.memory_space<vmem>>, vector<2x8x128xf32>
    tpu.vector_store %arg19[%c0_95, %c0_96, %c0_97], %255 {strides = array<i32>} : memref<2x8x128xf32, #tpu.memory_space<vmem>>, vector<2x8x128xf32>,
    return
  }
  func.func @transform_0(%arg0: i32) -> (i32, i32, i32) {
    %c0_i32 = arith.constant 0 : i32
    %c0_i32_0 = arith.constant 0 : i32
    %c0_i32_1 = arith.constant 0 : i32
    %c0_i32_2 = arith.constant 0 : i32
    return %c0_i32, %c0_i32_0, %c0_i32_1 : i32, i32, i32
  }
  func.func @transform_1(%arg0: i32) -> (i32, i32) {
    %c0_i32 = arith.constant 0 : i32
    %c0_i32_0 = arith.constant 0 : i32
    %c0_i32_1 = arith.constant 0 : i32
    return %c0_i32, %c0_i32_0 : i32, i32
  }
  func.func @transform_2(%arg0: i32) -> (i32, i32, i32) {
    %c0_i32 = arith.constant 0 : i32
    %c0_i32_0 = arith.constant 0 : i32
    %c0_i32_1 = arith.constant 0 : i32
    %c0_i32_2 = arith.constant 0 : i32
    return %c0_i32, %c0_i32_0, %c0_i32_1 : i32, i32, i32
  }
  func.func @transform_3(%arg0: i32) -> (i32, i32, i32) {
    %c0_i32 = arith.constant 0 : i32
    %c0_i32_0 = arith.constant 0 : i32
    %c0_i32_1 = arith.constant 0 : i32
    %c0_i32_2 = arith.constant 0 : i32
    return %c0_i32, %c0_i32_0, %c0_i32_1 : i32, i32, i32
  }
  func.func @transform_4(%arg0: i32) -> (i32, i32, i32) {
    %c0_i32 = arith.constant 0 : i32
    %c0_i32_0 = arith.constant 0 : i32
    %c0_i32_1 = arith.constant 0 : i32
    %c0_i32_2 = arith.constant 0 : i32
    return %c0_i32, %c0_i32_0, %c0_i32_1 : i32, i32, i32
  }
  func.func @transform_5(%arg0: i32) -> (i32, i32) {
    %c0_i32 = arith.constant 0 : i32
    %c0_i32_0 = arith.constant 0 : i32
    %c0_i32_1 = arith.constant 0 : i32
    return %c0_i32, %c0_i32_0 : i32, i32
  }
  func.func @transform_6(%arg0: i32) -> (i32, i32, i32) {
    %c0_i32 = arith.constant 0 : i32
    %c0_i32_0 = arith.constant 0 : i32
    %c0_i32_1 = arith.constant 0 : i32
    return %arg0, %c0_i32, %c0_i32_0 : i32, i32, i32
  }
  func.func @transform_7(%arg0: i32) -> (i32, i32, i32) {
    %c0_i32 = arith.constant 0 : i32
    %c0_i32_0 = arith.constant 0 : i32
    %c0_i32_1 = arith.constant 0 : i32
    return %arg0, %c0_i32, %c0_i32_0 : i32, i32, i32
  }
  func.func @transform_8(%arg0: i32) -> (i32, i32, i32) {
    %c0_i32 = arith.constant 0 : i32
    %c0_i32_0 = arith.constant 0 : i32
    %c0_i32_1 = arith.constant 0 : i32
    return %arg0, %c0_i32, %c0_i32_0 : i32, i32, i32
  }
  func.func @transform_9(%arg0: i32) -> (i32, i32, i32) {
    %c0_i32 = arith.constant 0 : i32
    %c0_i32_0 = arith.constant 0 : i32
    %c0_i32_1 = arith.constant 0 : i32
    return %arg0, %c0_i32, %c0_i32_0 : i32, i32, i32
  }
  func.func @transform_10(%arg0: i32) -> (i32, i32, i32) {
    %c0_i32 = arith.constant 0 : i32
    %c0_i32_0 = arith.constant 0 : i32
    %c0_i32_1 = arith.constant 0 : i32
    return %arg0, %c0_i32, %c0_i32_0 : i32, i32, i32
  }
  func.func @transform_11(%arg0: i32) -> (i32, i32, i32) {
    %c0_i32 = arith.constant 0 : i32
    %c0_i32_0 = arith.constant 0 : i32
    %c0_i32_1 = arith.constant 0 : i32
    return %arg0, %c0_i32, %c0_i32_0 : i32, i32, i32
  }
  func.func @transform_12(%arg0: i32) -> (i32, i32, i32) {
    %c0_i32 = arith.constant 0 : i32
    %c0_i32_0 = arith.constant 0 : i32
    %c0_i32_1 = arith.constant 0 : i32
    return %arg0, %c0_i32, %c0_i32_0 : i32, i32, i32
  }
  func.func @transform_13(%arg0: i32) -> (i32, i32, i32) {
    %c0_i32 = arith.constant 0 : i32
    %c0_i32_0 = arith.constant 0 : i32
    %c0_i32_1 = arith.constant 0 : i32
    return %arg0, %c0_i32, %c0_i32_0 : i32, i32, i32
  }
  func.func @transform_14(%arg0: i32) -> (i32, i32, i32) {
    %c0_i32 = arith.constant 0 : i32
    %c0_i32_0 = arith.constant 0 : i32
    %c0_i32_1 = arith.constant 0 : i32
    return %arg0, %c0_i32, %c0_i32_0 : i32, i32, i32
  }
  func.func @transform_15(%arg0: i32) -> (i32, i32, i32) {
    %c0_i32 = arith.constant 0 : i32
    %c0_i32_0 = arith.constant 0 : i32
    %c0_i32_1 = arith.constant 0 : i32
    return %arg0, %c0_i32, %c0_i32_0 : i32, i32, i32
  }
  func.func @transform_16(%arg0: i32) -> (i32, i32, i32) {
    %c0_i32 = arith.constant 0 : i32
    %c0_i32_0 = arith.constant 0 : i32
    %c0_i32_1 = arith.constant 0 : i32
    return %arg0, %c0_i32, %c0_i32_0 : i32, i32, i32
  }
  func.func @transform_17(%arg0: i32) -> (i32, i32, i32) {
    %c0_i32 = arith.constant 0 : i32
    %c0_i32_0 = arith.constant 0 : i32
    %c0_i32_1 = arith.constant 0 : i32
    return %arg0, %c0_i32, %c0_i32_0 : i32, i32, i32
  }
  func.func @transform_18(%arg0: i32) -> (i32, i32, i32) {
    %c0_i32 = arith.constant 0 : i32
    %c0_i32_0 = arith.constant 0 : i32
    %c0_i32_1 = arith.constant 0 : i32
    %c0_i32_2 = arith.constant 0 : i32
    return %c0_i32, %c0_i32_0, %c0_i32_1 : i32, i32, i32
  }
}

</mosaic_0001>

<bundles_post_ra>
// kernel: text_encoder_forward.1
= control target key start
LH: loop header
LB: loop body
LE: loop exit
PB: predicated region body
PF: predicated region fallthrough
CT: control target
= control target key end

     0   :  { %s13232_s0 = inlined_call_operand.vmem [shape: f32[2,8,128], index: 0, kind: input, shape index: {}]   ;;  %s13233_s1 = inlined_call_operand.vmem [shape: f32[8,128], index: 1, kind: input, shape index: {}]   ;;  %s13234_s2 = inlined_call_operand.vmem [shape: bf16[3,640,128], index: 2, kind: input, shape index: {}]   ;;  %s13235_s3 = inlined_call_operand.vmem [shape: f32[3,1,128], index: 3, kind: input, shape index: {}]   ;;  %s13236_s4 = inlined_call_operand.vmem [shape: f32[3,1,128], index: 4, kind: input, shape index: {}]   ;;  %s13237_s5 = inlined_call_operand.vmem [shape: f32[2,8], index: 5, kind: input, shape index: {}]   ;;  %s13238_s6 = inlined_call_operand.vmem [shape: bf16[6,128,384], index: 6, kind: input, shape index: {}]   ;;  %s13239_s7 = inlined_call_operand.vmem [shape: f32[6,1,384], index: 7, kind: input, shape index: {}]   ;;  %s13240_s8 = inlined_call_operand.vmem [shape: bf16[6,128,128], index: 8, kind: input, shape index: {}]   ;;  %s13241_s9 = inlined_call_operand.vmem [shape: f32[6,1,128], index: 9, kind: input, shape index: {}]   ;;  %s13242_s10 = inlined_call_operand.vmem [shape: f32[6,1,128], index: 10, kind: input, shape index: {}]   ;;  %s13243_s11 = inlined_call_operand.vmem [shape: f32[6,1,128], index: 11, kind: input, shape index: {}]   ;;  %s13244_s12 = inlined_call_operand.vmem [shape: bf16[6,128,2048], index: 12, kind: input, shape index: {}]   ;;  %s13245_s13 = inlined_call_operand.vmem [shape: f32[6,1,2048], index: 13, kind: input, shape index: {}]   ;;  %s13246_s14 = inlined_call_operand.vmem [shape: bf16[6,2048,128], index: 14, kind: input, shape index: {}]   ;;  %s13247_s15 = inlined_call_operand.vmem [shape: f32[6,1,128], index: 15, kind: input, shape index: {}]   ;;  %s13248_s16 = inlined_call_operand.vmem [shape: f32[6,1,128], index: 16, kind: input, shape index: {}]   ;;  %s13249_s17 = inlined_call_operand.vmem [shape: f32[6,1,128], index: 17, kind: input, shape index: {}]   ;;  %s13250_s18 = inlined_call_operand.hbm [shape: f32[2,8,128], index: 18, kind: output, shape index: {}]  }
   0x1   :  { %13257 = sst [smem:[#allocation6_spill]] %s13232_s0 }
   0x2   :  { %13258 = sst [smem:[#allocation7_spill]] %s13233_s1 }
   0x3   :  { %13259 = sst [smem:[#allocation8_spill]] %s13234_s2 }
   0x4   :  { %13260 = sst [smem:[#allocation9_spill]] %s13235_s3 }
   0x5   :  { %13261 = sst [smem:[#allocation10_spill]] %s13236_s4 }
   0x6   :  { %13262 = sst [smem:[#allocation11_spill]] %s13237_s5 }
   0x7   :  { %13263 = sst [smem:[#allocation12_spill]] %s13238_s6 }
   0x8   :  { %13264 = sst [smem:[#allocation13_spill]] %s13239_s7 }
   0x9   :  { %13265 = sst [smem:[#allocation14_spill]] %s13240_s8 }
   0xa   :  { %13266 = sst [smem:[#allocation15_spill]] %s13244_s12 }
   0xb   :  { %13267 = sst [smem:[#allocation16_spill]] %s13250_s18 }
   0xc   :  { %23 = vsyncpa [#allocation3], 0  ;;  %s11395_s27 = smov 0  }
   0xd LB: > { %13268 = sst [smem:[#allocation5_spill]] %s11282_s27  ;;  %s11401_s28 = sadd.s32 4294967295, %s11282_s27   ;;  %s11282_s27 = sphi %s11395_s27, %s29_s27  }
   0xe   : > { %p8814_p0 = scmp.ge.s32.totalorder %s11282_s27, 1  ;;  %p604_p1 = scmp.lt.s32.totalorder %s11282_s27, 7 }
  0x10   : > { %p605_p2 = pnand %p8814_p0, %p604_p1 }
  0x11   : > { %p694_p3 = scmp.lt.s32.totalorder (!%p605_p2), %s11401_s28, 5  ;;  %s13269_s8 = sld [smem:[#allocation14_spill]] (!%p605_p2) }
  0x12   : > { %608 = sbr.rel (%p605_p2) target bundleno = 7779 (0x1e63), region = 92  ;;  %s13270_s6 = sld [smem:[#allocation12_spill]] (!%p605_p2) }
  0x13   : > { %s13271_s7 = sld [smem:[#allocation13_spill]] (!%p605_p2)  ;;  %s13272_s12 = sld [smem:[#allocation15_spill]] (!%p605_p2) }
  0x14   : > { %p8823_p4 = scmp.ne.s32.totalorder (!%p605_p2), %s11401_s28, 0 }
  0x19   : > { %s11407_s29 = scalar_select %p694_p3, %s11401_s28, 5 }
  0x1a   : > { %744 = sbr.rel (%p8823_p4) target bundleno = 1402 (0x57a), region = 96  ;;  %s13273_s25 = sld [smem:[#allocation8_spill]] (!%p8823_p4)  ;;  %vm749_vm0 = vcmask (!%p8823_p4), 1041408   ;;  %vm754_vm1 = vcmask (!%p8823_p4), 1046528   ;;  %v11284_v34 = vmov (!%p8823_p4), 0.0   ;;  %vm764_vm2 = vcmask (!%p8823_p4), 1044480  }
  0x1b   : > { %s10697_s30 = smul.u32 192, %s11407_s29  ;;  %s9766_s0 = sshll.u32 %s11407_s29, 6  ;;  %vm759_vm3 = vcmask (!%p8823_p4), 1045504   ;;  %vm8864_vm4 = vmneg (!%p8823_p4), %vm749_vm0  ;;  %vm11285_vm6 = vmmov (!%p8823_p4), 0   ;;  %vm769_vm7 = vcmask (!%p8823_p4), 1043456  }
  0x1c   : > { %s10698_s19 = smul.u32 3, %s11407_s29  ;;  %s11415_s21 = scalar_lea.vmem %s13269_s8, %s9766_s0  ;;  %vm11574_vm5 = vmpackc.low (!%p8823_p4), %vm8864_vm4, %vm8864_vm4 }
  0x1d   : > { %s11420_s23 = scalar_lea.vmem %s13270_s6, %s10697_s30  ;;  %s9767_s22 = sshll.u32 %s11407_s29, 10 }
  0x1e   : > { %s11429_s5 = scalar_lea.vmem %s13271_s7, %s10698_s19  ;;  %s11443_s6 = scalar_lea.vmem %s13272_s12, %s9767_s22 }
  0x1f   : > { %s8820_s24 = sshll.u32 %s11407_s29, 4  ;;  %s11454_s3 = scalar_lea.vmem %s13246_s14, %s9767_s22 }
  0x20   : > { %s11449_s18 = scalar_lea.vmem %s13245_s13, %s8820_s24  ;;  %s733_s20 = scalar_lea.vmem %s13247_s15, %s11407_s29  ;;  %v10729_v0 = vld [vmem:[%s13273_s25 + $0x40] sm:$0xff] (!%p8823_p4)   ;;  %v10733_v4 = vld [vmem:[%s13273_s25 + $0x48] sm:$0xff] (!%p8823_p4)   ;;  %v10737_v8 = vld [vmem:[%s13273_s25 + $0x50] sm:$0xff] (!%p8823_p4)  }
  0x21   : > { %v10730_v1 = vld [vmem:[%s13273_s25 + $0xc0] sm:$0xff]   ;;  %9769 = vmatprep.subr.bf16.mxu0 %v10729_v0  ;;  %v10734_v5 = vld [vmem:[%s13273_s25 + $0xc8] sm:$0xff]   ;;  %v10738_v9 = vld [vmem:[%s13273_s25 + $0xd0] sm:$0xff]   ;;  %s13274_s26 = sld [smem:[#allocation6_spill]]  ;;  %s13277_s4 = sld [smem:[#allocation9_spill]] }
  0x22   : > { %v10731_v2 = vld [vmem:[%s13273_s25] sm:$0xff]   ;;  %9791 = vmatprep.subr.bf16.mxu1 %v10730_v1  ;;  %v10735_v6 = vld [vmem:[%s13273_s25 + $0x8] sm:$0xff]   ;;  %v10739_v10 = vld [vmem:[%s13273_s25 + $0x10] sm:$0xff]   ;;  %s13278_s30 = sld [smem:[#allocation10_spill]]  ;;  %s13279_s0 = sld [smem:[#allocation7_spill]] }
  0x23   : > { %v10732_v3 = vld [vmem:[%s13273_s25 + $0x80] sm:$0xff]   ;;  %9770 = vmatpush3.bf16.msra.mxu0 %v10731_v2  ;;  %v10736_v7 = vld [vmem:[%s13273_s25 + $0x88] sm:$0xff]   ;;  %v10740_v11 = vld [vmem:[%s13273_s25 + $0x90] sm:$0xff]  }
  0x24   : > { %9792 = vmatpush3.bf16.msra.mxu1 %v10732_v3  ;;  %9771 = vmatprep.subr.bf16.mxu0 %v10733_v4  ;;  %v10741_v12 = vld [vmem:[%s13273_s25 + $0x58] sm:$0xff]   ;;  %v10745_v16 = vld [vmem:[%s13273_s25 + $0x60] sm:$0xff]   ;;  %v10749_v20 = vld [vmem:[%s13273_s25 + $0x68] sm:$0xff]  }
  0x25   : > { %9793 = vmatprep.subr.bf16.mxu1 %v10734_v5  ;;  %v10742_v13 = vld [vmem:[%s13273_s25 + $0xd8] sm:$0xff]   ;;  %v10746_v17 = vld [vmem:[%s13273_s25 + $0xe0] sm:$0xff]   ;;  %v10750_v21 = vld [vmem:[%s13273_s25 + $0xe8] sm:$0xff]  }
  0x26   : > { %v10743_v14 = vld [vmem:[%s13273_s25 + $0x18] sm:$0xff]   ;;  %v10747_v18 = vld [vmem:[%s13273_s25 + $0x20] sm:$0xff]   ;;  %v10751_v22 = vld [vmem:[%s13273_s25 + $0x28] sm:$0xff]  }
  0x27   : > { %9772 = vmatpush3.bf16.msra.mxu0 %v10735_v6  ;;  %v10744_v15 = vld [vmem:[%s13273_s25 + $0x98] sm:$0xff]   ;;  %v10748_v19 = vld [vmem:[%s13273_s25 + $0xa0] sm:$0xff]   ;;  %v10752_v23 = vld [vmem:[%s13273_s25 + $0xa8] sm:$0xff]  }
  0x28   : > { %9794 = vmatpush3.bf16.msra.mxu1 %v10736_v7  ;;  %9773 = vmatprep.subr.bf16.mxu0 %v10737_v8  ;;  %v10753_v24 = vld [vmem:[%s13273_s25 + $0x70] sm:$0xff]   ;;  %v10757_v28 = vld [vmem:[%s13273_s25 + $0x78] sm:$0xff]   ;;  %v745_v32 = vld [vmem:[%s13274_s26] sm:$0xff] }
  0x29   : > { %9795 = vmatprep.subr.bf16.mxu1 %v10738_v9  ;;  %v10754_v25 = vld [vmem:[%s13273_s25 + $0xf0] sm:$0xff]   ;;  %v10758_v29 = vld [vmem:[%s13273_s25 + $0xf8] sm:$0xff]   ;;  %v747_v33 = vrot.slane %v745_v32, 6  ;;  %v10761_v50 = vld [vmem:[%s13273_s25 + $0x100] sm:$0xff]  }
  0x2a   : > { %v10755_v26 = vld [vmem:[%s13273_s25 + $0x30] sm:$0xff]   ;;  %v10759_v30 = vld [vmem:[%s13273_s25 + $0x38] sm:$0xff]   ;;  %v10762_v52 = vld [vmem:[%s13273_s25 + $0x108] sm:$0xff]  }
  0x2b   : > { %9774 = vmatpush3.bf16.msra.mxu0 %v10739_v10  ;;  %v10756_v27 = vld [vmem:[%s13273_s25 + $0xb0] sm:$0xff]   ;;  %v10760_v31 = vld [vmem:[%s13273_s25 + $0xb8] sm:$0xff]   ;;  %v750_v35 = vsel %vm749_vm0, 0.0, %v747_v33  ;;  %v751_v36 = vsel %vm749_vm0, %v747_v33, 0.0  ;;  %v8867_v46 = vpack.c.bf16 %v747_v33, %v747_v33  ;;  %v10765_v57 = vld [vmem:[%s13273_s25 + $0x120] sm:$0xff]  }
  0x2c   : > { %9796 = vmatpush3.bf16.msra.mxu1 %v10740_v11  ;;  %9775 = vmatprep.subr.bf16.mxu0 %v10741_v12  ;;  %v755_v37 = vrot.slane %v750_v35, 1  ;;  %v756_v38 = vrot.slane %v751_v36, 1  ;;  %v765_v39 = vrot.slane %v750_v35, 3  ;;  %v766_v40 = vrot.slane %v751_v36, 3  ;;  %v10763_v55 = vld [vmem:[%s13273_s25 + $0x110] sm:$0xff]   ;;  %v10764_v56 = vld [vmem:[%s13273_s25 + $0x118] sm:$0xff]  }
  0x2d   : > { %9797 = vmatprep.subr.bf16.mxu1 %v10742_v13  ;;  %v760_v41 = vrot.slane %v750_v35, 2  ;;  %v761_v42 = vrot.slane %v751_v36, 2  ;;  %v770_v53 = vrot.slane %v750_v35, 4  ;;  %v771_v54 = vrot.slane %v751_v36, 4  ;;  %v10766_v58 = vld [vmem:[%s13273_s25 + $0x128] sm:$0xff]   ;;  %v10767_v59 = vld [vmem:[%s13273_s25 + $0x130] sm:$0xff]  }
  0x2e   : > { %v757_v43 = vsel %vm754_vm1, %v755_v37, %v756_v38  ;;  %v767_v44 = vsel %vm764_vm2, %v765_v39, %v766_v40  ;;  %v10768_v60 = vld [vmem:[%s13273_s25 + $0x138] sm:$0xff]   ;;  %v10769_v63 = vld [vmem:[%s13273_s25 + $0x180] sm:$0xff]   ;;  %v10773_v3 = vld [vmem:[%s13273_s25 + $0x188] sm:$0xff]  }
  0x2f   : > { %9776 = vmatpush3.bf16.msra.mxu0 %v10743_v14  ;;  %v775_v47 = vpack.c.bf16 %v757_v43, %v757_v43  ;;  %v777_v48 = vpack.c.bf16 %v767_v44, %v767_v44  ;;  %v762_v49 = vsel %vm759_vm3, %v760_v41, %v761_v42  ;;  %v772_v61 = vsel %vm769_vm7, %v770_v53, %v771_v54  ;;  %v10770_v0 = vld [vmem:[%s13273_s25 + $0x140] sm:$0xff]   ;;  %v10775_v4 = vld [vmem:[%s13273_s25 + $0x208] sm:$0xff]   ;;  %v10777_v7 = vld [vmem:[%s13273_s25 + $0x190] sm:$0xff]  }
  0x30   : > { %9798 = vmatpush3.bf16.msra.mxu1 %v10744_v15  ;;  %9777 = vmatprep.subr.bf16.mxu0 %v10745_v16  ;;  %v776_v51 = vpack.c.bf16 %v762_v49, %v762_v49  ;;  %v778_v62 = vpack.c.bf16 %v772_v61, %v772_v61  ;;  %v10771_v1 = vld [vmem:[%s13273_s25 + $0x200] sm:$0xff]   ;;  %v10774_v5 = vld [vmem:[%s13273_s25 + $0x148] sm:$0xff]   ;;  %v10779_v8 = vld [vmem:[%s13273_s25 + $0x210] sm:$0xff]  }
  0x31   : > { %9799 = vmatprep.subr.bf16.mxu1 %v10746_v17  ;;  %1131 = vmatprep.mubr.bf16.mxu0 %v775_v47  ;;  %v10772_v2 = vld [vmem:[%s13273_s25 + $0x1c0] sm:$0xff]   ;;  %v10776_v6 = vld [vmem:[%s13273_s25 + $0x1c8] sm:$0xff]   ;;  %v10778_v9 = vld [vmem:[%s13273_s25 + $0x150] sm:$0xff]  }
  0x32   : > { %1171 = vmatprep.mubr.bf16.mxu1 %v777_v48  ;;  %v10780_v10 = vld [vmem:[%s13273_s25 + $0x1d0] sm:$0xff]   ;;  %v10781_v11 = vld [vmem:[%s13273_s25 + $0x198] sm:$0xff]   ;;  %v10785_v15 = vld [vmem:[%s13273_s25 + $0x1a0] sm:$0xff]  }
  0x33   : > { %9778 = vmatpush3.bf16.msra.mxu0 %v10747_v18  ;;  %v10783_v12 = vld [vmem:[%s13273_s25 + $0x218] sm:$0xff]   ;;  %v10786_v16 = vld [vmem:[%s13273_s25 + $0x160] sm:$0xff]  }
  0x34   : > { %9800 = vmatpush3.bf16.msra.mxu1 %v10748_v19  ;;  %9779 = vmatprep.subr.bf16.mxu0 %v10749_v20  ;;  %v10782_v13 = vld [vmem:[%s13273_s25 + $0x158] sm:$0xff]   ;;  %v10787_v17 = vld [vmem:[%s13273_s25 + $0x220] sm:$0xff]   ;;  %v10789_v19 = vld [vmem:[%s13273_s25 + $0x1a8] sm:$0xff]  }
  0x35   : > { %9801 = vmatprep.subr.bf16.mxu1 %v10750_v21  ;;  %v10784_v14 = vld [vmem:[%s13273_s25 + $0x1d8] sm:$0xff]   ;;  %v10788_v18 = vld [vmem:[%s13273_s25 + $0x1e0] sm:$0xff]   ;;  %v10790_v20 = vld [vmem:[%s13273_s25 + $0x168] sm:$0xff]  }
  0x36   : > { %v10791_v21 = vld [vmem:[%s13273_s25 + $0x228] sm:$0xff]   ;;  %v8869_v44 = vld [vmem:[%s13277_s4] ss:$0 sm:$0xff]  ;;  %v10964_v45 = vld [vmem:[%s13273_s25 + $0x398] sm:$0xff]  }
  0x37   : > { %9780 = vmatpush3.bf16.msra.mxu0 %v10751_v22  ;;  %v10792_v22 = vld [vmem:[%s13273_s25 + $0x1e8] sm:$0xff]   ;;  %v8870_v48 = vld [vmem:[%s13278_s30] ss:$0 sm:$0xff] }
  0x38   : > { %9802 = vmatpush3.bf16.msra.mxu1 %v10752_v23  ;;  %9781 = vmatprep.subr.bf16.mxu0 %v10753_v24  ;;  %v10793_v23 = vld [vmem:[%s13273_s25 + $0x1b0] sm:$0xff]  }
  0x39   : > { %9803 = vmatprep.subr.bf16.mxu1 %v10754_v25  ;;  %v10794_v24 = vld [vmem:[%s13273_s25 + $0x170] sm:$0xff]  }
  0x3a   : > { %v10795_v25 = vld [vmem:[%s13273_s25 + $0x230] sm:$0xff]  }
  0x3b   : > { %9782 = vmatpush3.bf16.msra.mxu0 %v10755_v26  ;;  %v10796_v26 = vld [vmem:[%s13273_s25 + $0x1f0] sm:$0xff]  }
  0x3c   : > { %9804 = vmatpush3.bf16.msra.mxu1 %v10756_v27  ;;  %9783 = vmatprep.subr.bf16.mxu0 %v10757_v28  ;;  %v10797_v27 = vld [vmem:[%s13273_s25 + $0x1b8] sm:$0xff]  }
  0x3d   : > { %9805 = vmatprep.subr.bf16.mxu1 %v10758_v29  ;;  %v10798_v28 = vld [vmem:[%s13273_s25 + $0x178] sm:$0xff]  }
  0x3e   : > { %v10799_v29 = vld [vmem:[%s13273_s25 + $0x238] sm:$0xff]  }
  0x3f   : > { %9784 = vmatpush3.bf16.msra.mxu0 %v10759_v30  ;;  %v10800_v30 = vld [vmem:[%s13273_s25 + $0x1f8] sm:$0xff]  }
  0x40   : > { %9806 = vmatpush3.bf16.msra.mxu1 %v10760_v31  ;;  %10345 = vmatprep.subr.bf16.mxu0 %v11284_v34 }
  0x41   : > { %9822 = vmatprep.subr.bf16.mxu1 %v10769_v63 }
  0x42   : > { %8868 = vmatmul.mubr.msk.bf16.vlgmr.msra.gmra.mrb[0].mxu0 %vm11574_vm5, %v8867_v46 }
  0x43   : > { %1172 = vmatmul.mubr.bf16.vlgmr.msra.gmra.mrb[0].mxu1 %v776_v51  ;;  %10346 = vmatpush3.bf16.msra.mxu0 %v10761_v50 }
  0x44   : > { %10361 = vmatprep.mubr.msk.bf16.mxu0 %vm11285_vm6, %v11284_v34  ;;  %10347 = vmatprep.subr.bf16.mxu0 %v11284_v34 }
  0x45   : > { %9823 = vmatpush3.bf16.msra.mxu1 %v10770_v0 }
  0x46   : > { %9824 = vmatprep.subr.bf16.mxu1 %v10773_v3 }
  0x47   : > { %10348 = vmatpush3.bf16.msra.mxu0 %v10762_v52 }
  0x48   : > { %10349 = vmatprep.subr.bf16.mxu0 %v11284_v34 }
  0x49   : > { %9825 = vmatpush3.bf16.msra.mxu1 %v10774_v5 }
  0x4a   : > { %9826 = vmatprep.subr.bf16.mxu1 %v10777_v7  ;;  %v10802_v7 = vld [vmem:[%s13273_s25 + $0x248] sm:$0xff]  }
  0x4b   : > { %10350 = vmatpush3.bf16.msra.mxu0 %v10763_v55 }
  0x4c   : > { %10351 = vmatprep.subr.bf16.mxu0 %v11284_v34 }
  0x4d   : > { %9827 = vmatpush3.bf16.msra.mxu1 %v10778_v9  ;;  %v10804_v9 = vld [vmem:[%s13273_s25 + $0x258] sm:$0xff]  }
  0x4e   : > { %9828 = vmatprep.subr.bf16.mxu1 %v10781_v11  ;;  %v10806_v11 = vld [vmem:[%s13273_s25 + $0x268] sm:$0xff]  }
  0x4f   : > { %10352 = vmatpush3.bf16.msra.mxu0 %v10764_v56 }
  0x50   : > { %10353 = vmatprep.subr.bf16.mxu0 %v11284_v34 }
  0x51   : > { %9829 = vmatpush3.bf16.msra.mxu1 %v10782_v13 }
  0x52   : > { %9830 = vmatprep.subr.bf16.mxu1 %v10785_v15  ;;  %v10808_v15 = vld [vmem:[%s13273_s25 + $0x278] sm:$0xff]  }
  0x53   : > { %10354 = vmatpush3.bf16.msra.mxu0 %v10765_v57 }
  0x54   : > { %10355 = vmatprep.subr.bf16.mxu0 %v11284_v34 }
  0x55   : > { %9831 = vmatpush3.bf16.msra.mxu1 %v10786_v16 }
  0x56   : > { %9832 = vmatprep.subr.bf16.mxu1 %v10789_v19  ;;  %v10810_v19 = vld [vmem:[%s13273_s25 + $0x280] sm:$0xff]  }
  0x57   : > { %10356 = vmatpush3.bf16.msra.mxu0 %v10766_v58 }
  0x58   : > { %10357 = vmatprep.subr.bf16.mxu0 %v11284_v34 }
  0x59   : > { %9833 = vmatpush3.bf16.msra.mxu1 %v10790_v20  ;;  %v10811_v20 = vld [vmem:[%s13273_s25 + $0x340] sm:$0xff]  }
  0x5a   : > { %9834 = vmatprep.subr.bf16.mxu1 %v10793_v23  ;;  %v10815_v23 = vld [vmem:[%s13273_s25 + $0x348] sm:$0xff]  }
  0x5b   : > { %10358 = vmatpush3.bf16.msra.mxu0 %v10767_v59 }
  0x5c   : > { %10359 = vmatprep.subr.bf16.mxu0 %v11284_v34 }
  0x5d   : > { %9835 = vmatpush3.bf16.msra.mxu1 %v10794_v24  ;;  %v10814_v24 = vld [vmem:[%s13273_s25 + $0x288] sm:$0xff]  }
  0x5e   : > { %9836 = vmatprep.subr.bf16.mxu1 %v10797_v27  ;;  %v10819_v27 = vld [vmem:[%s13273_s25 + $0x350] sm:$0xff]  }
  0x5f   : > { %10360 = vmatpush3.bf16.msra.mxu0 %v10768_v60 }
  0x60   : > { %9844 = vmatprep.subr.bf16.mxu0 %v10771_v1 }
  0x61   : > { %9837 = vmatpush3.bf16.msra.mxu1 %v10798_v28  ;;  %v10818_v28 = vld [vmem:[%s13273_s25 + $0x290] sm:$0xff]  }
  0x62   : > { %10362 = vmatmul.mubr.bf16.vlgmr.msra.gmra.mrb[4].mxu0 %v778_v62  ;;  %10365 = vmatprep.subr.bf16.mxu1 %v11284_v34 }
  0x63   : > { %9845 = vmatpush3.bf16.msra.mxu0 %v10772_v2 }
  0x64   : > { %9846 = vmatprep.subr.bf16.mxu0 %v10775_v4  ;;  %v10801_v4 = vld [vmem:[%s13273_s25 + $0x240] sm:$0xff]  }
  0x67   : > { %9847 = vmatpush3.bf16.msra.mxu0 %v10776_v6 }
  0x68   : > { %9848 = vmatprep.subr.bf16.mxu0 %v10779_v8  ;;  %v10803_v8 = vld [vmem:[%s13273_s25 + $0x250] sm:$0xff]  }
  0x6b   : > { %9849 = vmatpush3.bf16.msra.mxu0 %v10780_v10  ;;  %v10805_v10 = vld [vmem:[%s13273_s25 + $0x260] sm:$0xff]  }
  0x6c   : > { %9850 = vmatprep.subr.bf16.mxu0 %v10783_v12  ;;  %v10807_v12 = vld [vmem:[%s13273_s25 + $0x270] sm:$0xff]  }
  0x6f   : > { %9851 = vmatpush3.bf16.msra.mxu0 %v10784_v14 }
  0x70   : > { %9852 = vmatprep.subr.bf16.mxu0 %v10787_v17 }
  0x73   : > { %9853 = vmatpush3.bf16.msra.mxu0 %v10788_v18  ;;  %v10809_v18 = vld [vmem:[%s13273_s25 + $0x2c0] sm:$0xff]  }
  0x74   : > { %9854 = vmatprep.subr.bf16.mxu0 %v10791_v21  ;;  %v10812_v21 = vld [vmem:[%s13273_s25 + $0x300] sm:$0xff]  }
  0x77   : > { %9855 = vmatpush3.bf16.msra.mxu0 %v10792_v22  ;;  %v10813_v22 = vld [vmem:[%s13273_s25 + $0x2c8] sm:$0xff]  }
  0x78   : > { %9856 = vmatprep.subr.bf16.mxu0 %v10795_v25  ;;  %v10816_v25 = vld [vmem:[%s13273_s25 + $0x308] sm:$0xff]  }
  0x7b   : > { %9857 = vmatpush3.bf16.msra.mxu0 %v10796_v26  ;;  %v10817_v26 = vld [vmem:[%s13273_s25 + $0x2d0] sm:$0xff]  }
  0x7c   : > { %9858 = vmatprep.subr.bf16.mxu0 %v10799_v29  ;;  %v10820_v29 = vld [vmem:[%s13273_s25 + $0x310] sm:$0xff]  }
  0x7f   : > { %9859 = vmatpush3.bf16.msra.mxu0 %v10800_v30  ;;  %v10821_v30 = vld [vmem:[%s13273_s25 + $0x2d8] sm:$0xff]  }
  0x80   : > { %9875 = vmatprep.subr.bf16.mxu0 %v10809_v18 }
 0x115   : > { %v9785_v31 = vpop.f32.mrb[0].mxu0 }
 0x116   : > { %v9807_v32 = vpop.f32.mrb[0].mxu1  ;;  %v9786_v33 = vpop.f32.mrb[1].mxu0 }
 0x117   : > { %v9808_v35 = vpop.f32.mrb[1].mxu1  ;;  %v9787_v36 = vadd.f32 %v9786_v33, %v9785_v31  ;;  %v9788_v38 = vpop.f32.mrb[2].mxu0  ;;  %v10823_v31 = vld [vmem:[%s13273_s25 + $0x358] sm:$0xff]  }
 0x118   : > { %v9809_v37 = vadd.f32 %v9808_v35, %v9807_v32  ;;  %v9810_v39 = vpop.f32.mrb[2].mxu1  ;;  %v9789_v40 = vpop.f32.mrb[3].mxu0  ;;  %v10822_v32 = vld [vmem:[%s13273_s25 + $0x298] sm:$0xff]   ;;  %v10825_v35 = vld [vmem:[%s13273_s25 + $0x2e0] sm:$0xff]  }
 0x119   : > { %v9811_v41 = vpop.f32.mrb[3].mxu1  ;;  %v10824_v33 = vld [vmem:[%s13273_s25 + $0x318] sm:$0xff]   ;;  %v10828_v38 = vld [vmem:[%s13273_s25 + $0x320] sm:$0xff]   ;;  %v10829_v39 = vld [vmem:[%s13273_s25 + $0x2e8] sm:$0xff]  }
 0x11a   : > { %v1174_v42 = vadd.f32 %v9809_v37, %v9787_v36  ;;  %v10826_v36 = vld [vmem:[%s13273_s25 + $0x2a0] sm:$0xff]   ;;  %v10830_v40 = vld [vmem:[%s13273_s25 + $0x2a8] sm:$0xff]  }
 0x11b   : > { %v10827_v37 = vld [vmem:[%s13273_s25 + $0x360] sm:$0xff]   ;;  %v10831_v41 = vld [vmem:[%s13273_s25 + $0x368] sm:$0xff]  }
 0x135   : > { %v1213_v43 = vpop.f32.mrb[4].mxu0 }
 0x136   : > { %v1214_v46 = vadd.f32 %v1213_v43, %v1174_v42  ;;  %v10363_v47 = vpop.f32.mrb[5].mxu0  ;;  %v10832_v42 = vld [vmem:[%s13273_s25 + $0x328] sm:$0xff]   ;;  %v10833_v43 = vld [vmem:[%s13273_s25 + $0x2f0] sm:$0xff]  }
 0x137   : > { %v1216_v49 = vpop.f32.mrb[6].mxu0  ;;  %v10836_v47 = vld [vmem:[%s13273_s25 + $0x330] sm:$0xff]  }
 0x138   : > { %v1226_v50 = vmul.f32 %v8869_v44, %v1214_v46  ;;  %v10364_v51 = vpop.f32.mrb[7].mxu0  ;;  %v10834_v44 = vld [vmem:[%s13273_s25 + $0x2b0] sm:$0xff]   ;;  %v10838_v49 = vld [vmem:[%s13273_s25 + $0x2b8] sm:$0xff]  }
 0x139   : > { %v10835_v46 = vld [vmem:[%s13273_s25 + $0x370] sm:$0xff]   ;;  %v10840_v51 = vld [vmem:[%s13273_s25 + $0x338] sm:$0xff]  }
 0x13a   : > { %v1234_v52 = vadd.f32 %v8870_v48, %v1226_v50  ;;  %v10837_v48 = vld [vmem:[%s13273_s25 + $0x2f8] sm:$0xff]  }
 0x13b   : > { %v10839_v50 = vld [vmem:[%s13273_s25 + $0x378] sm:$0xff]  }
 0x13c   : > { %v1235_v53 = vmax.f32 %v1234_v52, 0.0  ;;  %v10842_v52 = vld [vmem:[%s13273_s25 + $0x40] sm:$0xff]  }
 0x13e   : > { %v1237_v54 = vrot.slane %v1235_v53, 6 }
 0x140   : > { %v1239_v55 = vsel %vm749_vm0, 0.0, %v1237_v54  ;;  %v1240_v56 = vsel %vm749_vm0, %v1237_v54, 0.0  ;;  %v8994_v5 = vpack.c.bf16 %v1237_v54, %v1237_v54 }
 0x141   : > { %v1243_v57 = vrot.slane %v1239_v55, 1  ;;  %v1244_v58 = vrot.slane %v1240_v56, 1  ;;  %v1251_v59 = vrot.slane %v1239_v55, 3  ;;  %v1252_v60 = vrot.slane %v1240_v56, 3 }
 0x142   : > { %v1247_v61 = vrot.slane %v1239_v55, 2  ;;  %v1248_v62 = vrot.slane %v1240_v56, 2  ;;  %v1255_v13 = vrot.slane %v1239_v55, 4  ;;  %v1256_v14 = vrot.slane %v1240_v56, 4 }
 0x143   : > { %v1245_v63 = vsel %vm754_vm1, %v1243_v57, %v1244_v58  ;;  %v1253_v0 = vsel %vm764_vm2, %v1251_v59, %v1252_v60 }
 0x144   : > { %v1260_v1 = vpack.c.bf16 %v1245_v63, %v1245_v63  ;;  %v1262_v2 = vpack.c.bf16 %v1253_v0, %v1253_v0  ;;  %v1249_v3 = vsel %vm759_vm3, %v1247_v61, %v1248_v62  ;;  %v1257_v16 = vsel %vm769_vm7, %v1255_v13, %v1256_v14 }
 0x145   : > { %v1261_v6 = vpack.c.bf16 %v1249_v3, %v1249_v3  ;;  %v1263_v17 = vpack.c.bf16 %v1257_v16, %v1257_v16 }
 0x146   : > { %1617 = vmatprep.mubr.bf16.mxu1 %v1260_v1  ;;  %1657 = vmatprep.mubr.bf16.mxu0 %v1262_v2  ;;  %v8997_v1 = vld [vmem:[%s13277_s4 + $0x1] ss:$0 sm:$0xff]  ;;  %v9129_v2 = vld [vmem:[%s13274_s26 + $0x8] sm:$0xff] }
 0x147   : > { %8995 = vmatmul.mubr.msk.bf16.vlgmr.msra.gmra.mrb[4].mxu1 %vm11574_vm5, %v8994_v5  ;;  %1658 = vmatmul.mubr.bf16.vlgmr.msra.gmra.mrb[8].mxu0 %v1261_v6  ;;  %v8999_v5 = vld [vmem:[%s13278_s30 + $0x1] ss:$0 sm:$0xff] }
 0x148   : > { %10366 = vmatpush3.bf16.msra.mxu1 %v10801_v4  ;;  %10381 = vmatprep.mubr.msk.bf16.mxu1 %vm11285_vm6, %v11284_v34 }
 0x149   : > { %10367 = vmatprep.subr.bf16.mxu1 %v11284_v34  ;;  %9876 = vmatpush3.bf16.msra.mxu0 %v10810_v19 }
 0x14a   : > { %9877 = vmatprep.subr.bf16.mxu0 %v10813_v22 }
 0x14c   : > { %10368 = vmatpush3.bf16.msra.mxu1 %v10802_v7 }
 0x14d   : > { %10369 = vmatprep.subr.bf16.mxu1 %v11284_v34  ;;  %9878 = vmatpush3.bf16.msra.mxu0 %v10814_v24 }
 0x14e   : > { %9879 = vmatprep.subr.bf16.mxu0 %v10817_v26 }
 0x150   : > { %10370 = vmatpush3.bf16.msra.mxu1 %v10803_v8 }
 0x151   : > { %10371 = vmatprep.subr.bf16.mxu1 %v11284_v34  ;;  %9880 = vmatpush3.bf16.msra.mxu0 %v10818_v28 }
 0x152   : > { %9881 = vmatprep.subr.bf16.mxu0 %v10821_v30 }
 0x154   : > { %10372 = vmatpush3.bf16.msra.mxu1 %v10804_v9  ;;  %v11868_v9 = vrot.slane %v9129_v2, 6 }
 0x155   : > { %10373 = vmatprep.subr.bf16.mxu1 %v11284_v34  ;;  %9882 = vmatpush3.bf16.msra.mxu0 %v10822_v32  ;;  %v10843_v32 = vld [vmem:[%s13273_s25] sm:$0xff]  }
 0x156   : > { %9883 = vmatprep.subr.bf16.mxu0 %v10825_v35  ;;  %v11876_v13 = vsel %vm749_vm0, %v11868_v9, 0.0 }
 0x157   : > { %v2225_v16 = vrot.slane %v11876_v13, 1 }
 0x158   : > { %10374 = vmatpush3.bf16.msra.mxu1 %v10805_v10 }
 0x159   : > { %10375 = vmatprep.subr.bf16.mxu1 %v11284_v34  ;;  %9884 = vmatpush3.bf16.msra.mxu0 %v10826_v36  ;;  %v10845_v36 = vld [vmem:[%s13273_s25 + $0x48] sm:$0xff]  }
 0x15a   : > { %9885 = vmatprep.subr.bf16.mxu0 %v10829_v39  ;;  %v10846_v39 = vld [vmem:[%s13273_s25 + $0x8] sm:$0xff]  }
 0x15c   : > { %10376 = vmatpush3.bf16.msra.mxu1 %v10806_v11 }
 0x15d   : > { %10377 = vmatprep.subr.bf16.mxu1 %v11284_v34  ;;  %9886 = vmatpush3.bf16.msra.mxu0 %v10830_v40  ;;  %v10848_v40 = vld [vmem:[%s13273_s25 + $0x50] sm:$0xff]  }
 0x15e   : > { %9887 = vmatprep.subr.bf16.mxu0 %v10833_v43  ;;  %v10851_v43 = vld [vmem:[%s13273_s25 + $0x58] sm:$0xff]  }
 0x160   : > { %10378 = vmatpush3.bf16.msra.mxu1 %v10807_v12  ;;  %v11872_v12 = vsel %vm749_vm0, 0.0, %v11868_v9 }
 0x161   : > { %10379 = vmatprep.subr.bf16.mxu1 %v11284_v34  ;;  %9888 = vmatpush3.bf16.msra.mxu0 %v10834_v44  ;;  %v10850_v44 = vld [vmem:[%s13273_s25 + $0x398] sm:$0xff]  }
 0x162   : > { %9889 = vmatprep.subr.bf16.mxu0 %v10837_v48  ;;  %v10853_v48 = vld [vmem:[%s13273_s25 + $0x3a0] sm:$0xff]  }
 0x164   : > { %10380 = vmatpush3.bf16.msra.mxu1 %v10808_v15  ;;  %v2224_v15 = vrot.slane %v11872_v12, 1 }
 0x165   : > { %9897 = vmatprep.subr.bf16.mxu1 %v10811_v20  ;;  %9890 = vmatpush3.bf16.msra.mxu0 %v10838_v49  ;;  %v10855_v49 = vld [vmem:[%s13273_s25 + $0x20] sm:$0xff]  }
 0x166   : > { %10385 = vmatprep.subr.bf16.mxu0 %v11284_v34 }
 0x167   : > { %10382 = vmatmul.mubr.bf16.vlgmr.msra.gmra.mrb[8].mxu1 %v1263_v17 }
 0x168   : > { %9898 = vmatpush3.bf16.msra.mxu1 %v10812_v21 }
 0x169   : > { %9899 = vmatprep.subr.bf16.mxu1 %v10815_v23 }
 0x16c   : > { %9900 = vmatpush3.bf16.msra.mxu1 %v10816_v25 }
 0x16d   : > { %9901 = vmatprep.subr.bf16.mxu1 %v10819_v27  ;;  %v2226_v27 = vsel %vm754_vm1, %v2224_v15, %v2225_v16  ;;  %v10874_v15 = vld [vmem:[%s13273_s25 + $0xd8] sm:$0xff]  }
 0x16e   : > { %v10875_v16 = vld [vmem:[%s13273_s25 + $0x98] sm:$0xff]  }
 0x170   : > { %9902 = vmatpush3.bf16.msra.mxu1 %v10820_v29 }
 0x171   : > { %9903 = vmatprep.subr.bf16.mxu1 %v10823_v31  ;;  %v10841_v31 = vld [vmem:[%s13273_s25 + $0x380] sm:$0xff]  }
 0x174   : > { %9904 = vmatpush3.bf16.msra.mxu1 %v10824_v33 }
 0x175   : > { %9905 = vmatprep.subr.bf16.mxu1 %v10827_v37  ;;  %v2241_v37 = vpack.c.bf16 %v2226_v27, %v2226_v27  ;;  %v2228_v27 = vrot.slane %v11872_v12, 2 }
 0x178   : > { %9906 = vmatpush3.bf16.msra.mxu1 %v10828_v38  ;;  %v10844_v38 = vld [vmem:[%s13273_s25 + $0x388] sm:$0xff]  }
 0x179   : > { %9907 = vmatprep.subr.bf16.mxu1 %v10831_v41  ;;  %v10847_v41 = vld [vmem:[%s13273_s25 + $0x390] sm:$0xff]  }
 0x17c   : > { %9908 = vmatpush3.bf16.msra.mxu1 %v10832_v42  ;;  %v10849_v42 = vld [vmem:[%s13273_s25 + $0x10] sm:$0xff]  }
 0x17d   : > { %9909 = vmatprep.subr.bf16.mxu1 %v10835_v46  ;;  %v10852_v46 = vld [vmem:[%s13273_s25 + $0x18] sm:$0xff]  }
 0x180   : > { %9910 = vmatpush3.bf16.msra.mxu1 %v10836_v47  ;;  %v10854_v47 = vld [vmem:[%s13273_s25 + $0x60] sm:$0xff]  }
 0x181   : > { %9911 = vmatprep.subr.bf16.mxu1 %v10839_v50  ;;  %v10857_v50 = vld [vmem:[%s13273_s25 + $0x68] sm:$0xff]  }
 0x184   : > { %9912 = vmatpush3.bf16.msra.mxu1 %v10840_v51  ;;  %v10856_v51 = vld [vmem:[%s13273_s25 + $0x3a8] sm:$0xff]  }
 0x185   : > { %9928 = vmatprep.subr.bf16.mxu1 %v10842_v52  ;;  %v10858_v52 = vld [vmem:[%s13273_s25 + $0x28] sm:$0xff]  }
 0x21a   : > { %v9838_v53 = vpop.f32.mrb[4].mxu1  ;;  %v9860_v54 = vpop.f32.mrb[8].mxu0 }
 0x21b   : > { %v9839_v55 = vpop.f32.mrb[5].mxu1  ;;  %v9861_v56 = vpop.f32.mrb[9].mxu0 }
 0x21c   : > { %v9840_v57 = vadd.f32 %v9839_v55, %v9838_v53  ;;  %v9862_v58 = vadd.f32 %v9861_v56, %v9860_v54  ;;  %v9841_v59 = vpop.f32.mrb[6].mxu1  ;;  %v9863_v60 = vpop.f32.mrb[10].mxu0  ;;  %v10860_v53 = vld [vmem:[%s13273_s25 + $0x70] sm:$0xff]   ;;  %v10863_v56 = vld [vmem:[%s13273_s25 + $0x78] sm:$0xff]  }
 0x21d   : > { %v9842_v61 = vpop.f32.mrb[7].mxu1  ;;  %v9864_v62 = vpop.f32.mrb[11].mxu0  ;;  %v10859_v54 = vld [vmem:[%s13273_s25 + $0x3b0] sm:$0xff]   ;;  %v2232_v59 = vrot.slane %v11872_v12, 3  ;;  %v2233_v60 = vrot.slane %v11876_v13, 3 }
 0x21e   : > { %v1660_v63 = vadd.f32 %v9862_v58, %v9840_v57  ;;  %v10861_v55 = vld [vmem:[%s13273_s25 + $0x30] sm:$0xff]   ;;  %v10862_v61 = vld [vmem:[%s13273_s25 + $0x3b8] sm:$0xff]  }
 0x21f   : > { %v10864_v62 = vld [vmem:[%s13273_s25 + $0x38] sm:$0xff]   ;;  %v2234_v2 = vsel %vm764_vm2, %v2232_v59, %v2233_v60  ;;  %v10910_v59 = vld [vmem:[%s13273_s25 + $0x168] sm:$0xff]  }
 0x220   : > { %v10911_v60 = vld [vmem:[%s13273_s25 + $0x228] sm:$0xff]  }
 0x23a   : > { %v1699_v0 = vpop.f32.mrb[8].mxu1 }
 0x23b   : > { %v1700_v3 = vadd.f32 %v1699_v0, %v1660_v63  ;;  %v10383_v4 = vpop.f32.mrb[9].mxu1  ;;  %v10865_v63 = vld [vmem:[%s13273_s25 + $0xc0] sm:$0xff]  }
 0x23c   : > { %v1702_v6 = vpop.f32.mrb[10].mxu1  ;;  %v10867_v4 = vld [vmem:[%s13273_s25 + $0x100] sm:$0xff]  }
 0x23d   : > { %v1713_v7 = vmul.f32 %v8997_v1, %v1700_v3  ;;  %v10384_v8 = vpop.f32.mrb[11].mxu1  ;;  %v9173_v1 = vpack.c.bf16 %v11868_v9, %v11868_v9  ;;  %v10866_v3 = vld [vmem:[%s13273_s25 + $0x80] sm:$0xff]   ;;  %v10868_v6 = vld [vmem:[%s13273_s25 + $0xc8] sm:$0xff]  }
 0x23e   : > { %v10869_v8 = vld [vmem:[%s13273_s25 + $0x88] sm:$0xff]  }
 0x23f   : > { %v1722_v10 = vadd.f32 %v8999_v5, %v1713_v7  ;;  %v2243_v7 = vpack.c.bf16 %v2234_v2, %v2234_v2  ;;  %v10870_v9 = vld [vmem:[%s13273_s25 + $0x108] sm:$0xff]   ;;  %v10917_v2 = vld [vmem:[%s13273_s25 + $0x1b8] sm:$0xff]  }
 0x241   : > { %v1723_v11 = vmax.f32 %v1722_v10, 0.0  ;;  %v10871_v10 = vld [vmem:[%s13273_s25 + $0xd0] sm:$0xff]  }
 0x243   : > { %v1725_v14 = vrot.slane %v1723_v11, 6  ;;  %v10872_v11 = vld [vmem:[%s13273_s25 + $0x90] sm:$0xff]  }
 0x245   : > { %v11881_v17 = vsel %vm749_vm0, 0.0, %v1725_v14  ;;  %v11884_v18 = vsel %vm749_vm0, %v1725_v14, 0.0  ;;  %v9123_v33 = vpack.c.bf16 %v1725_v14, %v1725_v14  ;;  %v10873_v14 = vld [vmem:[%s13273_s25 + $0x110] sm:$0xff]  }
 0x246   : > { %v1731_v19 = vrot.slane %v11881_v17, 1  ;;  %v1732_v20 = vrot.slane %v11884_v18, 1  ;;  %v1739_v21 = vrot.slane %v11881_v17, 3  ;;  %v1740_v22 = vrot.slane %v11884_v18, 3 }
 0x247   : > { %v1735_v23 = vrot.slane %v11881_v17, 2  ;;  %v1736_v24 = vrot.slane %v11884_v18, 2  ;;  %v1743_v57 = vrot.slane %v11881_v17, 4  ;;  %v1744_v58 = vrot.slane %v11884_v18, 4  ;;  %v10876_v17 = vld [vmem:[%s13273_s25 + $0x118] sm:$0xff]   ;;  %v10877_v18 = vld [vmem:[%s13273_s25 + $0xe0] sm:$0xff]  }
 0x248   : > { %v1733_v25 = vsel %vm754_vm1, %v1731_v19, %v1732_v20  ;;  %v1741_v26 = vsel %vm764_vm2, %v1739_v21, %v1740_v22  ;;  %v10878_v19 = vld [vmem:[%s13273_s25 + $0xa0] sm:$0xff]   ;;  %v10880_v21 = vld [vmem:[%s13273_s25 + $0xe8] sm:$0xff]  }
 0x249   : > { %v1748_v28 = vpack.c.bf16 %v1733_v25, %v1733_v25  ;;  %v1750_v29 = vpack.c.bf16 %v1741_v26, %v1741_v26  ;;  %v1737_v30 = vsel %vm759_vm3, %v1735_v23, %v1736_v24  ;;  %v1745_v0 = vsel %vm769_vm7, %v1743_v57, %v1744_v58  ;;  %v10879_v20 = vld [vmem:[%s13273_s25 + $0x120] sm:$0xff]   ;;  %v10881_v22 = vld [vmem:[%s13273_s25 + $0xa8] sm:$0xff]   ;;  %v10883_v24 = vld [vmem:[%s13273_s25 + $0xf0] sm:$0xff]  }
 0x24a   : > { %v1749_v35 = vpack.c.bf16 %v1737_v30, %v1737_v30  ;;  %v1751_v5 = vpack.c.bf16 %v1745_v0, %v1745_v0  ;;  %v10882_v23 = vld [vmem:[%s13273_s25 + $0x128] sm:$0xff]   ;;  %v10884_v25 = vld [vmem:[%s13273_s25 + $0xb0] sm:$0xff]   ;;  %v2237_v30 = vrot.slane %v11876_v13, 4  ;;  %v10908_v57 = vld [vmem:[%s13273_s25 + $0x1e0] sm:$0xff]  }
 0x24b   : > { %2105 = vmatprep.mubr.bf16.mxu0 %v1748_v28  ;;  %2145 = vmatprep.mubr.bf16.mxu1 %v1750_v29  ;;  %v10885_v26 = vld [vmem:[%s13273_s25 + $0x130] sm:$0xff]   ;;  %v2229_v28 = vrot.slane %v11876_v13, 2  ;;  %v2236_v29 = vrot.slane %v11872_v12, 4  ;;  %v10909_v58 = vld [vmem:[%s13273_s25 + $0x1a8] sm:$0xff]  }
 0x24c   : > { %9124 = vmatmul.mubr.msk.bf16.vlgmr.msra.gmra.mrb[12].mxu0 %vm11574_vm5, %v9123_v33  ;;  %2146 = vmatmul.mubr.bf16.vlgmr.msra.gmra.mrb[12].mxu1 %v1749_v35  ;;  %v10888_v33 = vld [vmem:[%s13273_s25 + $0x138] sm:$0xff]   ;;  %v10915_v0 = vld [vmem:[%s13273_s25 + $0x230] sm:$0xff]  }
 0x24d   : > { %10386 = vmatpush3.bf16.msra.mxu0 %v10841_v31  ;;  %9929 = vmatpush3.bf16.msra.mxu1 %v10843_v32  ;;  %v10886_v31 = vld [vmem:[%s13273_s25 + $0xf8] sm:$0xff]   ;;  %v2230_v12 = vsel %vm759_vm3, %v2228_v27, %v2229_v28  ;;  %v2238_v13 = vsel %vm769_vm7, %v2236_v29, %v2237_v30 }
 0x24e   : > { %10387 = vmatprep.subr.bf16.mxu0 %v11284_v34  ;;  %9930 = vmatprep.subr.bf16.mxu1 %v10845_v36  ;;  %v10887_v32 = vld [vmem:[%s13273_s25 + $0xb8] sm:$0xff]   ;;  %v2242_v35 = vpack.c.bf16 %v2230_v12, %v2230_v12  ;;  %v2244_v36 = vpack.c.bf16 %v2238_v13, %v2238_v13 }
 0x24f   : > { %10401 = vmatprep.mubr.msk.bf16.mxu0 %vm11285_vm6, %v11284_v34  ;;  %2597 = vmatprep.mubr.bf16.mxu1 %v2241_v37  ;;  %v10889_v37 = vld [vmem:[%s13273_s25 + $0x180] sm:$0xff]  }
 0x251   : > { %10388 = vmatpush3.bf16.msra.mxu0 %v10844_v38  ;;  %9931 = vmatpush3.bf16.msra.mxu1 %v10846_v39  ;;  %v10890_v38 = vld [vmem:[%s13273_s25 + $0x140] sm:$0xff]  }
 0x252   : > { %10389 = vmatprep.subr.bf16.mxu0 %v11284_v34  ;;  %9932 = vmatprep.subr.bf16.mxu1 %v10848_v40  ;;  %v10891_v39 = vld [vmem:[%s13273_s25 + $0x200] sm:$0xff]  }
 0x253   : > { %v10892_v40 = vld [vmem:[%s13273_s25 + $0x1c0] sm:$0xff]  }
 0x255   : > { %10390 = vmatpush3.bf16.msra.mxu0 %v10847_v41  ;;  %9933 = vmatpush3.bf16.msra.mxu1 %v10849_v42  ;;  %v10893_v41 = vld [vmem:[%s13273_s25 + $0x188] sm:$0xff]  }
 0x256   : > { %10391 = vmatprep.subr.bf16.mxu0 %v11284_v34  ;;  %9934 = vmatprep.subr.bf16.mxu1 %v10851_v43  ;;  %v10895_v42 = vld [vmem:[%s13273_s25 + $0x208] sm:$0xff]  }
 0x257   : > { %v10894_v43 = vld [vmem:[%s13273_s25 + $0x148] sm:$0xff]  }
 0x259   : > { %10392 = vmatpush3.bf16.msra.mxu0 %v10850_v44  ;;  %9935 = vmatpush3.bf16.msra.mxu1 %v10852_v46  ;;  %v10896_v44 = vld [vmem:[%s13273_s25 + $0x1c8] sm:$0xff]   ;;  %v10897_v46 = vld [vmem:[%s13273_s25 + $0x190] sm:$0xff]  }
 0x25a   : > { %10393 = vmatprep.subr.bf16.mxu0 %v11284_v34  ;;  %9936 = vmatprep.subr.bf16.mxu1 %v10854_v47  ;;  %v10899_v47 = vld [vmem:[%s13273_s25 + $0x210] sm:$0xff]  }
 0x25d   : > { %10394 = vmatpush3.bf16.msra.mxu0 %v10853_v48  ;;  %9937 = vmatpush3.bf16.msra.mxu1 %v10855_v49  ;;  %v10898_v48 = vld [vmem:[%s13273_s25 + $0x150] sm:$0xff]  }
 0x25e   : > { %10395 = vmatprep.subr.bf16.mxu0 %v11284_v34  ;;  %9938 = vmatprep.subr.bf16.mxu1 %v10857_v50  ;;  %v10900_v49 = vld [vmem:[%s13273_s25 + $0x1d0] sm:$0xff]   ;;  %v10901_v50 = vld [vmem:[%s13273_s25 + $0x198] sm:$0xff]  }
 0x261   : > { %10396 = vmatpush3.bf16.msra.mxu0 %v10856_v51  ;;  %9939 = vmatpush3.bf16.msra.mxu1 %v10858_v52  ;;  %v10902_v51 = vld [vmem:[%s13273_s25 + $0x158] sm:$0xff]  }
 0x262   : > { %10397 = vmatprep.subr.bf16.mxu0 %v11284_v34  ;;  %9940 = vmatprep.subr.bf16.mxu1 %v10860_v53  ;;  %v10903_v52 = vld [vmem:[%s13273_s25 + $0x218] sm:$0xff]  }
 0x263   : > { %v10904_v53 = vld [vmem:[%s13273_s25 + $0x1d8] sm:$0xff]  }
 0x265   : > { %10398 = vmatpush3.bf16.msra.mxu0 %v10859_v54  ;;  %9941 = vmatpush3.bf16.msra.mxu1 %v10861_v55  ;;  %v10905_v54 = vld [vmem:[%s13273_s25 + $0x1a0] sm:$0xff]  }
 0x266   : > { %10399 = vmatprep.subr.bf16.mxu0 %v11284_v34  ;;  %9942 = vmatprep.subr.bf16.mxu1 %v10863_v56  ;;  %v10906_v55 = vld [vmem:[%s13273_s25 + $0x160] sm:$0xff]  }
 0x267   : > { %v10907_v56 = vld [vmem:[%s13273_s25 + $0x220] sm:$0xff]  }
 0x269   : > { %10400 = vmatpush3.bf16.msra.mxu0 %v10862_v61  ;;  %9943 = vmatpush3.bf16.msra.mxu1 %v10864_v62  ;;  %v10912_v61 = vld [vmem:[%s13273_s25 + $0x1e8] sm:$0xff]   ;;  %v10913_v62 = vld [vmem:[%s13273_s25 + $0x1b0] sm:$0xff]  }
 0x26a   : > { %9950 = vmatprep.subr.bf16.mxu0 %v10865_v63  ;;  %10405 = vmatprep.subr.bf16.mxu1 %v11284_v34  ;;  %v10914_v63 = vld [vmem:[%s13273_s25 + $0x170] sm:$0xff]  }
 0x26c   : > { %10402 = vmatmul.mubr.bf16.vlgmr.msra.gmra.mrb[16].mxu0 %v1751_v5  ;;  %9174 = vmatmul.mubr.msk.bf16.vlgmr.msra.gmra.mrb[16].mxu1 %vm11574_vm5, %v9173_v1  ;;  %v10916_v1 = vld [vmem:[%s13273_s25 + $0x1f0] sm:$0xff]   ;;  %v10920_v5 = vld [vmem:[%s13273_s25 + $0x1f8] sm:$0xff]  }
 0x26d   : > { %9951 = vmatpush3.bf16.msra.mxu0 %v10866_v3  ;;  %10406 = vmatpush3.bf16.msra.mxu1 %v10867_v4  ;;  %v10918_v3 = vld [vmem:[%s13273_s25 + $0x178] sm:$0xff]  }
 0x26e   : > { %9952 = vmatprep.subr.bf16.mxu0 %v10868_v6  ;;  %10407 = vmatprep.subr.bf16.mxu1 %v11284_v34  ;;  %v10919_v4 = vld [vmem:[%s13273_s25 + $0x238] sm:$0xff]  }
 0x26f   : > { %2637 = vmatprep.mubr.bf16.mxu0 %v2243_v7  ;;  %10421 = vmatprep.mubr.msk.bf16.mxu1 %vm11285_vm6, %v11284_v34 }
 0x271   : > { %9953 = vmatpush3.bf16.msra.mxu0 %v10869_v8  ;;  %10408 = vmatpush3.bf16.msra.mxu1 %v10870_v9 }
 0x272   : > { %9954 = vmatprep.subr.bf16.mxu0 %v10871_v10  ;;  %10409 = vmatprep.subr.bf16.mxu1 %v11284_v34 }
 0x275   : > { %9955 = vmatpush3.bf16.msra.mxu0 %v10872_v11  ;;  %10410 = vmatpush3.bf16.msra.mxu1 %v10873_v14 }
 0x276   : > { %9956 = vmatprep.subr.bf16.mxu0 %v10874_v15  ;;  %10411 = vmatprep.subr.bf16.mxu1 %v11284_v34 }
 0x279   : > { %9957 = vmatpush3.bf16.msra.mxu0 %v10875_v16  ;;  %10412 = vmatpush3.bf16.msra.mxu1 %v10876_v17 }
 0x27a   : > { %9958 = vmatprep.subr.bf16.mxu0 %v10877_v18  ;;  %10413 = vmatprep.subr.bf16.mxu1 %v11284_v34 }
 0x27d   : > { %9959 = vmatpush3.bf16.msra.mxu0 %v10878_v19  ;;  %10414 = vmatpush3.bf16.msra.mxu1 %v10879_v20  ;;  %v12174_v20 = vld [vmem:[%s13277_s4 + $0x2] ss:$0 sm:$0xff] }
 0x27e   : > { %9960 = vmatprep.subr.bf16.mxu0 %v10880_v21  ;;  %10415 = vmatprep.subr.bf16.mxu1 %v11284_v34 }
 0x281   : > { %9961 = vmatpush3.bf16.msra.mxu0 %v10881_v22  ;;  %10416 = vmatpush3.bf16.msra.mxu1 %v10882_v23 }
 0x282   : > { %9962 = vmatprep.subr.bf16.mxu0 %v10883_v24  ;;  %10417 = vmatprep.subr.bf16.mxu1 %v11284_v34 }
 0x285   : > { %9963 = vmatpush3.bf16.msra.mxu0 %v10884_v25  ;;  %10418 = vmatpush3.bf16.msra.mxu1 %v10885_v26  ;;  %v12179_v25 = vld [vmem:[%s13278_s30 + $0x2] ss:$0 sm:$0xff] }
 0x286   : > { %9964 = vmatprep.subr.bf16.mxu0 %v10886_v31  ;;  %10419 = vmatprep.subr.bf16.mxu1 %v11284_v34 }
 0x289   : > { %9965 = vmatpush3.bf16.msra.mxu0 %v10887_v32  ;;  %10420 = vmatpush3.bf16.msra.mxu1 %v10888_v33  ;;  %v12186_v33 = vld [vmem:[%s13279_s0] sm:$0xff] }
 0x28a   : > { %9981 = vmatprep.subr.bf16.mxu0 %v10889_v37  ;;  %10003 = vmatprep.subr.bf16.mxu1 %v10891_v39 }
 0x28c   : > { %2638 = vmatmul.mubr.bf16.vlgmr.msra.gmra.mrb[20].mxu0 %v2242_v35  ;;  %10422 = vmatmul.mubr.bf16.vlgmr.msra.gmra.mrb[20].mxu1 %v2244_v36 }
 0x28d   : > { %9982 = vmatpush3.bf16.msra.mxu0 %v10890_v38  ;;  %10004 = vmatpush3.bf16.msra.mxu1 %v10892_v40 }
 0x28e   : > { %9983 = vmatprep.subr.bf16.mxu0 %v10893_v41  ;;  %10005 = vmatprep.subr.bf16.mxu1 %v10895_v42 }
 0x291   : > { %9984 = vmatpush3.bf16.msra.mxu0 %v10894_v43  ;;  %10006 = vmatpush3.bf16.msra.mxu1 %v10896_v44 }
 0x292   : > { %9985 = vmatprep.subr.bf16.mxu0 %v10897_v46  ;;  %10007 = vmatprep.subr.bf16.mxu1 %v10899_v47  ;;  %v9175_v46 = vld [vmem:[%s13277_s4] ss:$0 sm:$0xff] }
 0x295   : > { %9986 = vmatpush3.bf16.msra.mxu0 %v10898_v48  ;;  %10008 = vmatpush3.bf16.msra.mxu1 %v10900_v49  ;;  %v9176_v48 = vld [vmem:[%s13278_s30] ss:$0 sm:$0xff] }
 0x296   : > { %9987 = vmatprep.subr.bf16.mxu0 %v10901_v50  ;;  %10009 = vmatprep.subr.bf16.mxu1 %v10903_v52 }
 0x299   : > { %9988 = vmatpush3.bf16.msra.mxu0 %v10902_v51  ;;  %10010 = vmatpush3.bf16.msra.mxu1 %v10904_v53 }
 0x29a   : > { %9989 = vmatprep.subr.bf16.mxu0 %v10905_v54  ;;  %10011 = vmatprep.subr.bf16.mxu1 %v10907_v56 }
 0x29d   : > { %9990 = vmatpush3.bf16.msra.mxu0 %v10906_v55  ;;  %10012 = vmatpush3.bf16.msra.mxu1 %v10908_v57 }
 0x29e   : > { %9991 = vmatprep.subr.bf16.mxu0 %v10909_v58  ;;  %10013 = vmatprep.subr.bf16.mxu1 %v10911_v60 }
 0x2a1   : > { %9992 = vmatpush3.bf16.msra.mxu0 %v10910_v59  ;;  %10014 = vmatpush3.bf16.msra.mxu1 %v10912_v61 }
 0x2a2   : > { %9993 = vmatprep.subr.bf16.mxu0 %v10913_v62  ;;  %10015 = vmatprep.subr.bf16.mxu1 %v10915_v0 }
 0x2a5   : > { %9994 = vmatpush3.bf16.msra.mxu0 %v10914_v63  ;;  %10016 = vmatpush3.bf16.msra.mxu1 %v10916_v1 }
 0x2a6   : > { %9995 = vmatprep.subr.bf16.mxu0 %v10917_v2  ;;  %10017 = vmatprep.subr.bf16.mxu1 %v10919_v4  ;;  %v10921_v2 = vld [vmem:[%s13273_s25 + $0x240] sm:$0xff]  }
 0x2a9   : > { %9996 = vmatpush3.bf16.msra.mxu0 %v10918_v3  ;;  %10018 = vmatpush3.bf16.msra.mxu1 %v10920_v5  ;;  %v10922_v5 = vld [vmem:[%s13273_s25 + $0x248] sm:$0xff]  }
 0x2aa   : > { %10425 = vmatprep.subr.bf16.mxu0 %v11284_v34 }
 0x31f   : > { %v9891_v6 = vpop.f32.mrb[12].mxu0  ;;  %v9913_v7 = vpop.f32.mrb[12].mxu1 }
 0x320   : > { %v9892_v8 = vpop.f32.mrb[13].mxu0  ;;  %v9914_v9 = vpop.f32.mrb[13].mxu1 }
 0x321   : > { %v9893_v10 = vadd.f32 %v9892_v8, %v9891_v6  ;;  %v9915_v11 = vadd.f32 %v9914_v9, %v9913_v7  ;;  %v9894_v14 = vpop.f32.mrb[14].mxu0  ;;  %v9916_v15 = vpop.f32.mrb[14].mxu1  ;;  %v10923_v6 = vld [vmem:[%s13273_s25 + $0x250] sm:$0xff]   ;;  %v10924_v7 = vld [vmem:[%s13273_s25 + $0x258] sm:$0xff]   ;;  %v10925_v8 = vld [vmem:[%s13273_s25 + $0x260] sm:$0xff]  }
 0x322   : > { %v9895_v16 = vpop.f32.mrb[15].mxu0  ;;  %v9917_v17 = vpop.f32.mrb[15].mxu1  ;;  %v10926_v9 = vld [vmem:[%s13273_s25 + $0x268] sm:$0xff]   ;;  %v10928_v15 = vld [vmem:[%s13273_s25 + $0x278] sm:$0xff]  }
 0x323   : > { %v2148_v18 = vadd.f32 %v9915_v11, %v9893_v10  ;;  %v10927_v10 = vld [vmem:[%s13273_s25 + $0x270] sm:$0xff]  }
 0x33f   : > { %v2187_v19 = vpop.f32.mrb[16].mxu0  ;;  %v9944_v21 = vpop.f32.mrb[16].mxu1 }
 0x340   : > { %v2188_v22 = vadd.f32 %v2187_v19, %v2148_v18  ;;  %v10403_v23 = vpop.f32.mrb[17].mxu0  ;;  %v9945_v24 = vpop.f32.mrb[17].mxu1  ;;  %v10929_v18 = vld [vmem:[%s13273_s25 + $0x2c0] sm:$0xff]  }
 0x341   : > { %v2190_v26 = vpop.f32.mrb[18].mxu0  ;;  %v9946_v27 = vadd.f32 %v9945_v24, %v9944_v21  ;;  %v9947_v28 = vpop.f32.mrb[18].mxu1  ;;  %v10930_v19 = vld [vmem:[%s13273_s25 + $0x280] sm:$0xff]   ;;  %v10933_v23 = vld [vmem:[%s13273_s25 + $0x2c8] sm:$0xff]   ;;  %10034 = vmatprep.subr.bf16.mxu1 %v10929_v18 }
 0x342   : > { %v2201_v29 = vmul.f32 %v12174_v20, %v2188_v22  ;;  %v10404_v30 = vpop.f32.mrb[19].mxu0  ;;  %v9948_v31 = vpop.f32.mrb[19].mxu1  ;;  %v10931_v21 = vld [vmem:[%s13273_s25 + $0x340] sm:$0xff]   ;;  %v10935_v24 = vld [vmem:[%s13273_s25 + $0x348] sm:$0xff]   ;;  %v10937_v28 = vld [vmem:[%s13273_s25 + $0x2d0] sm:$0xff]  }
 0x343   : > { %v10932_v22 = vld [vmem:[%s13273_s25 + $0x300] sm:$0xff]   ;;  %v10934_v26 = vld [vmem:[%s13273_s25 + $0x288] sm:$0xff]   ;;  %v10938_v30 = vld [vmem:[%s13273_s25 + $0x290] sm:$0xff]  }
 0x344   : > { %v2210_v32 = vadd.f32 %v12179_v25, %v2201_v29  ;;  %v10939_v29 = vld [vmem:[%s13273_s25 + $0x350] sm:$0xff]  }
 0x345   : > { %v10940_v31 = vld [vmem:[%s13273_s25 + $0x310] sm:$0xff]  }
 0x346   : > { %v2211_v12 = vmax.f32 %v2210_v32, 0.0  ;;  %v10941_v32 = vld [vmem:[%s13273_s25 + $0x2d8] sm:$0xff]  }
 0x348   : > { %v2213_v13 = vadd.f32 %v12186_v33, %v2211_v12  ;;  %v10943_v12 = vld [vmem:[%s13273_s25 + $0x358] sm:$0xff]  }
 0x34a   : > { %2214 = vst [vmem:[#allocation2] sm:$0xff] %v2213_v13  ;;  %v10942_v13 = vld [vmem:[%s13273_s25 + $0x298] sm:$0xff]  }
 0x35f   : > { %v9966_v35 = vpop.f32.mrb[20].mxu0  ;;  %v2679_v36 = vpop.f32.mrb[20].mxu1 }
 0x360   : > { %v9967_v37 = vpop.f32.mrb[21].mxu0  ;;  %v10423_v38 = vpop.f32.mrb[21].mxu1 }
 0x361   : > { %v9968_v39 = vadd.f32 %v9967_v37, %v9966_v35  ;;  %v9969_v40 = vpop.f32.mrb[22].mxu0  ;;  %v2682_v41 = vpop.f32.mrb[22].mxu1  ;;  %v10944_v35 = vld [vmem:[%s13273_s25 + $0x318] sm:$0xff]   ;;  %v10946_v37 = vld [vmem:[%s13273_s25 + $0x2a0] sm:$0xff]  }
 0x362   : > { %v9970_v42 = vpop.f32.mrb[23].mxu0  ;;  %v10424_v43 = vpop.f32.mrb[23].mxu1  ;;  %v10947_v38 = vld [vmem:[%s13273_s25 + $0x360] sm:$0xff]   ;;  %v10949_v40 = vld [vmem:[%s13273_s25 + $0x2e8] sm:$0xff]  }
 0x363   : > { %v2640_v44 = vadd.f32 %v9968_v39, %v9946_v27  ;;  %v10936_v27 = vld [vmem:[%s13273_s25 + $0x308] sm:$0xff]   ;;  %v10948_v39 = vld [vmem:[%s13273_s25 + $0x320] sm:$0xff]  }
 0x364   : > { %v10950_v41 = vld [vmem:[%s13273_s25 + $0x2a8] sm:$0xff]  }
 0x365   : > { %v2680_v47 = vadd.f32 %v2679_v36, %v2640_v44  ;;  %v10945_v36 = vld [vmem:[%s13273_s25 + $0x2e0] sm:$0xff]   ;;  %v10951_v42 = vld [vmem:[%s13273_s25 + $0x368] sm:$0xff]   ;;  %v10953_v44 = vld [vmem:[%s13273_s25 + $0x2f0] sm:$0xff]  }
 0x366   : > { %v10952_v43 = vld [vmem:[%s13273_s25 + $0x328] sm:$0xff]  }
 0x367   : > { %v2692_v49 = vmul.f32 %v9175_v46, %v2680_v47  ;;  %v10954_v46 = vld [vmem:[%s13273_s25 + $0x2b0] sm:$0xff]  }
 0x368   : > { %v10955_v47 = vld [vmem:[%s13273_s25 + $0x370] sm:$0xff]  }
 0x369   : > { %v2700_v50 = vadd.f32 %v9176_v48, %v2692_v49  ;;  %v10956_v48 = vld [vmem:[%s13273_s25 + $0x330] sm:$0xff]   ;;  %v10957_v49 = vld [vmem:[%s13273_s25 + $0x2f8] sm:$0xff]  }
 0x36b   : > { %v2701_v51 = vmax.f32 %v2700_v50, 0.0  ;;  %v10958_v50 = vld [vmem:[%s13273_s25 + $0x2b8] sm:$0xff]  }
 0x36d   : > { %v2703_v52 = vrot.slane %v2701_v51, 6  ;;  %v10959_v51 = vld [vmem:[%s13273_s25 + $0x378] sm:$0xff]  }
 0x36f   : > { %v2705_v53 = vsel %vm749_vm0, 0.0, %v2703_v52  ;;  %v2706_v54 = vsel %vm749_vm0, %v2703_v52, 0.0  ;;  %v9300_v3 = vpack.c.bf16 %v2703_v52, %v2703_v52  ;;  %v10960_v52 = vld [vmem:[%s13273_s25 + $0x338] sm:$0xff]  }
 0x370   : > { %v2709_v55 = vrot.slane %v2705_v53, 1  ;;  %v2710_v56 = vrot.slane %v2706_v54, 1  ;;  %v2717_v57 = vrot.slane %v2705_v53, 3  ;;  %v2718_v58 = vrot.slane %v2706_v54, 3 }
 0x371   : > { %v2713_v59 = vrot.slane %v2705_v53, 2  ;;  %v2714_v60 = vrot.slane %v2706_v54, 2  ;;  %v2721_v11 = vrot.slane %v2705_v53, 4  ;;  %v2722_v14 = vrot.slane %v2706_v54, 4 }
 0x372   : > { %v2711_v61 = vsel %vm754_vm1, %v2709_v55, %v2710_v56  ;;  %v2719_v62 = vsel %vm764_vm2, %v2717_v57, %v2718_v58 }
 0x373   : > { %v2726_v63 = vpack.c.bf16 %v2711_v61, %v2711_v61  ;;  %v2728_v0 = vpack.c.bf16 %v2719_v62, %v2719_v62  ;;  %v2715_v1 = vsel %vm759_vm3, %v2713_v59, %v2714_v60  ;;  %v2723_v16 = vsel %vm769_vm7, %v2721_v11, %v2722_v14 }
 0x374   : > { %v2727_v4 = vpack.c.bf16 %v2715_v1, %v2715_v1  ;;  %v2729_v17 = vpack.c.bf16 %v2723_v16, %v2723_v16  ;;  %v9303_v1 = vld [vmem:[%s13277_s4 + $0x1] ss:$0 sm:$0xff] }
 0x375   : > { %3082 = vmatprep.mubr.bf16.mxu0 %v2726_v63  ;;  %3122 = vmatprep.mubr.bf16.mxu1 %v2728_v0 }
 0x376   : > { %9301 = vmatmul.mubr.msk.bf16.vlgmr.msra.gmra.mrb[24].mxu0 %vm11574_vm5, %v9300_v3  ;;  %3123 = vmatmul.mubr.bf16.vlgmr.msra.gmra.mrb[24].mxu1 %v2727_v4  ;;  %v9305_v4 = vld [vmem:[%s13278_s30 + $0x1] ss:$0 sm:$0xff] }
 0x377   : > { %10426 = vmatpush3.bf16.msra.mxu0 %v10921_v2  ;;  %10441 = vmatprep.mubr.msk.bf16.mxu0 %vm11285_vm6, %v11284_v34 }
 0x378   : > { %10427 = vmatprep.subr.bf16.mxu0 %v11284_v34  ;;  %10035 = vmatpush3.bf16.msra.mxu1 %v10930_v19 }
 0x379   : > { %10036 = vmatprep.subr.bf16.mxu1 %v10933_v23 }
 0x37b   : > { %10428 = vmatpush3.bf16.msra.mxu0 %v10922_v5 }
 0x37c   : > { %10429 = vmatprep.subr.bf16.mxu0 %v11284_v34  ;;  %10037 = vmatpush3.bf16.msra.mxu1 %v10934_v26 }
 0x37d   : > { %10038 = vmatprep.subr.bf16.mxu1 %v10937_v28  ;;  %v10961_v28 = vld [vmem:[%s13273_s25 + $0x380] sm:$0xff]  }
 0x37f   : > { %10430 = vmatpush3.bf16.msra.mxu0 %v10923_v6 }
 0x380   : > { %10431 = vmatprep.subr.bf16.mxu0 %v11284_v34  ;;  %10039 = vmatpush3.bf16.msra.mxu1 %v10938_v30 }
 0x381   : > { %10040 = vmatprep.subr.bf16.mxu1 %v10941_v32  ;;  %v10963_v32 = vld [vmem:[%s13273_s25 + $0x390] sm:$0xff]  }
 0x383   : > { %10432 = vmatpush3.bf16.msra.mxu0 %v10924_v7 }
 0x384   : > { %10433 = vmatprep.subr.bf16.mxu0 %v11284_v34  ;;  %10041 = vmatpush3.bf16.msra.mxu1 %v10942_v13  ;;  %v10966_v13 = vld [vmem:[%s13273_s25 + $0x3a8] sm:$0xff]  }
 0x385   : > { %10042 = vmatprep.subr.bf16.mxu1 %v10945_v36 }
 0x387   : > { %10434 = vmatpush3.bf16.msra.mxu0 %v10925_v8 }
 0x388   : > { %10435 = vmatprep.subr.bf16.mxu0 %v11284_v34  ;;  %10043 = vmatpush3.bf16.msra.mxu1 %v10946_v37 }
 0x389   : > { %10044 = vmatprep.subr.bf16.mxu1 %v10949_v40 }
 0x38b   : > { %10436 = vmatpush3.bf16.msra.mxu0 %v10926_v9 }
 0x38c   : > { %10437 = vmatprep.subr.bf16.mxu0 %v11284_v34  ;;  %10045 = vmatpush3.bf16.msra.mxu1 %v10950_v41 }
 0x38d   : > { %10046 = vmatprep.subr.bf16.mxu1 %v10953_v44 }
 0x38f   : > { %10438 = vmatpush3.bf16.msra.mxu0 %v10927_v10 }
 0x390   : > { %10439 = vmatprep.subr.bf16.mxu0 %v11284_v34  ;;  %10047 = vmatpush3.bf16.msra.mxu1 %v10954_v46 }
 0x391   : > { %10048 = vmatprep.subr.bf16.mxu1 %v10957_v49 }
 0x393   : > { %10440 = vmatpush3.bf16.msra.mxu0 %v10928_v15 }
 0x394   : > { %10056 = vmatprep.subr.bf16.mxu0 %v10931_v21  ;;  %10049 = vmatpush3.bf16.msra.mxu1 %v10958_v50 }
 0x395   : > { %10445 = vmatprep.subr.bf16.mxu1 %v11284_v34 }
 0x396   : > { %10442 = vmatmul.mubr.bf16.vlgmr.msra.gmra.mrb[28].mxu0 %v2729_v17 }
 0x397   : > { %10057 = vmatpush3.bf16.msra.mxu0 %v10932_v22 }
 0x398   : > { %10058 = vmatprep.subr.bf16.mxu0 %v10935_v24 }
 0x39b   : > { %10059 = vmatpush3.bf16.msra.mxu0 %v10936_v27 }
 0x39c   : > { %10060 = vmatprep.subr.bf16.mxu0 %v10939_v29 }
 0x39f   : > { %10061 = vmatpush3.bf16.msra.mxu0 %v10940_v31  ;;  %v10962_v31 = vld [vmem:[%s13273_s25 + $0x388] sm:$0xff]  }
 0x3a0   : > { %10062 = vmatprep.subr.bf16.mxu0 %v10943_v12  ;;  %v10965_v12 = vld [vmem:[%s13273_s25 + $0x3a0] sm:$0xff]  }
 0x3a3   : > { %10063 = vmatpush3.bf16.msra.mxu0 %v10944_v35  ;;  %v10967_v35 = vld [vmem:[%s13273_s25 + $0x3b0] sm:$0xff]  }
 0x3a4   : > { %10064 = vmatprep.subr.bf16.mxu0 %v10947_v38  ;;  %v10968_v38 = vld [vmem:[%s13273_s25 + $0x3b8] sm:$0xff]  }
 0x3a7   : > { %10065 = vmatpush3.bf16.msra.mxu0 %v10948_v39 }
 0x3a8   : > { %10066 = vmatprep.subr.bf16.mxu0 %v10951_v42 }
 0x3ab   : > { %10067 = vmatpush3.bf16.msra.mxu0 %v10952_v43 }
 0x3ac   : > { %10068 = vmatprep.subr.bf16.mxu0 %v10955_v47 }
 0x3af   : > { %10069 = vmatpush3.bf16.msra.mxu0 %v10956_v48 }
 0x3b0   : > { %10070 = vmatprep.subr.bf16.mxu0 %v10959_v51 }
 0x3b3   : > { %10071 = vmatpush3.bf16.msra.mxu0 %v10960_v52 }
 0x449   : > { %v9997_v53 = vpop.f32.mrb[24].mxu0  ;;  %v10019_v54 = vpop.f32.mrb[24].mxu1 }
 0x44a   : > { %v9998_v55 = vpop.f32.mrb[25].mxu0  ;;  %v10020_v56 = vpop.f32.mrb[25].mxu1 }
 0x44b   : > { %v9999_v57 = vadd.f32 %v9998_v55, %v9997_v53  ;;  %v10021_v58 = vadd.f32 %v10020_v56, %v10019_v54  ;;  %v10000_v59 = vpop.f32.mrb[26].mxu0  ;;  %v10022_v60 = vpop.f32.mrb[26].mxu1 }
 0x44c   : > { %v10001_v61 = vpop.f32.mrb[27].mxu0  ;;  %v10023_v62 = vpop.f32.mrb[27].mxu1 }
 0x44d   : > { %v3125_v63 = vadd.f32 %v10021_v58, %v9999_v57 }
 0x469   : > { %v3164_v0 = vpop.f32.mrb[28].mxu0 }
 0x46a   : > { %v3165_v2 = vadd.f32 %v3164_v0, %v3125_v63  ;;  %v10443_v3 = vpop.f32.mrb[29].mxu0 }
 0x46b   : > { %v3167_v5 = vpop.f32.mrb[30].mxu0 }
 0x46c   : > { %v3177_v6 = vmul.f32 %v9303_v1, %v3165_v2  ;;  %v10444_v7 = vpop.f32.mrb[31].mxu0 }
 0x46e   : > { %v3185_v8 = vadd.f32 %v9305_v4, %v3177_v6 }
 0x470   : > { %v3186_v9 = vmax.f32 %v3185_v8, 0.0 }
 0x472   : > { %v3188_v10 = vrot.slane %v3186_v9, 6 }
 0x474   : > { %v3190_v11 = vsel %vm749_vm0, 0.0, %v3188_v10  ;;  %v3191_v14 = vsel %vm749_vm0, %v3188_v10, 0.0  ;;  %v9429_v29 = vpack.c.bf16 %v3188_v10, %v3188_v10 }
 0x475   : > { %v3194_v15 = vrot.slane %v3190_v11, 1  ;;  %v3195_v16 = vrot.slane %v3191_v14, 1  ;;  %v3202_v17 = vrot.slane %v3190_v11, 3  ;;  %v3203_v18 = vrot.slane %v3191_v14, 3 }
 0x476   : > { %v3198_v19 = vrot.slane %v3190_v11, 2  ;;  %v3199_v21 = vrot.slane %v3191_v14, 2  ;;  %v3206_v36 = vrot.slane %v3190_v11, 4  ;;  %v3207_v37 = vrot.slane %v3191_v14, 4 }
 0x477   : > { %v3196_v22 = vsel %vm754_vm1, %v3194_v15, %v3195_v16  ;;  %v3204_v23 = vsel %vm764_vm2, %v3202_v17, %v3203_v18 }
 0x478   : > { %v3211_v24 = vpack.c.bf16 %v3196_v22, %v3196_v22  ;;  %v3213_v26 = vpack.c.bf16 %v3204_v23, %v3204_v23  ;;  %v3200_v27 = vsel %vm759_vm3, %v3198_v19, %v3199_v21  ;;  %v3208_v39 = vsel %vm769_vm7, %v3206_v36, %v3207_v37 }
 0x479   : > { %v3212_v30 = vpack.c.bf16 %v3200_v27, %v3200_v27  ;;  %v3214_v40 = vpack.c.bf16 %v3208_v39, %v3208_v39 }
 0x47a   : > { %3567 = vmatprep.mubr.bf16.mxu1 %v3211_v24  ;;  %3607 = vmatprep.mubr.bf16.mxu0 %v3213_v26 }
 0x47b   : > { %9430 = vmatmul.mubr.msk.bf16.vlgmr.msra.gmra.mrb[28].mxu1 %vm11574_vm5, %v9429_v29  ;;  %3608 = vmatmul.mubr.bf16.vlgmr.msra.gmra.mrb[32].mxu0 %v3212_v30 }
 0x47c   : > { %10446 = vmatpush3.bf16.msra.mxu1 %v10961_v28  ;;  %10461 = vmatprep.mubr.msk.bf16.mxu1 %vm11285_vm6, %v11284_v34 }
 0x47d   : > { %10447 = vmatprep.subr.bf16.mxu1 %v11284_v34 }
 0x480   : > { %10448 = vmatpush3.bf16.msra.mxu1 %v10962_v31 }
 0x481   : > { %10449 = vmatprep.subr.bf16.mxu1 %v11284_v34 }
 0x484   : > { %10450 = vmatpush3.bf16.msra.mxu1 %v10963_v32 }
 0x485   : > { %10451 = vmatprep.subr.bf16.mxu1 %v11284_v34 }
 0x488   : > { %10452 = vmatpush3.bf16.msra.mxu1 %v10964_v45 }
 0x489   : > { %10453 = vmatprep.subr.bf16.mxu1 %v11284_v34 }
 0x48c   : > { %10454 = vmatpush3.bf16.msra.mxu1 %v10965_v12 }
 0x48d   : > { %10455 = vmatprep.subr.bf16.mxu1 %v11284_v34 }
 0x490   : > { %10456 = vmatpush3.bf16.msra.mxu1 %v10966_v13 }
 0x491   : > { %10457 = vmatprep.subr.bf16.mxu1 %v11284_v34 }
 0x494   : > { %10458 = vmatpush3.bf16.msra.mxu1 %v10967_v35 }
 0x495   : > { %10459 = vmatprep.subr.bf16.mxu1 %v11284_v34 }
 0x498   : > { %10460 = vmatpush3.bf16.msra.mxu1 %v10968_v38 }
 0x49b   : > { %10462 = vmatmul.mubr.bf16.vlgmr.msra.gmra.mrb[32].mxu1 %v3214_v40 }
 0x54e   : > { %v10050_v41 = vpop.f32.mrb[28].mxu1  ;;  %v10072_v42 = vpop.f32.mrb[32].mxu0 }
 0x54f   : > { %v10051_v43 = vpop.f32.mrb[29].mxu1  ;;  %v10073_v44 = vpop.f32.mrb[33].mxu0 }
 0x550   : > { %v10052_v46 = vadd.f32 %v10051_v43, %v10050_v41  ;;  %v10074_v47 = vadd.f32 %v10073_v44, %v10072_v42  ;;  %v10053_v48 = vpop.f32.mrb[30].mxu1  ;;  %v10075_v49 = vpop.f32.mrb[34].mxu0 }
 0x551   : > { %v10054_v50 = vpop.f32.mrb[31].mxu1  ;;  %v10076_v51 = vpop.f32.mrb[35].mxu0 }
 0x552   : > { %v3610_v52 = vadd.f32 %v10074_v47, %v10052_v46 }
 0x56e   : > { %v3649_v53 = vpop.f32.mrb[32].mxu1 }
 0x56f   : > { %v3650_v54 = vadd.f32 %v3649_v53, %v3610_v52  ;;  %v10463_v55 = vpop.f32.mrb[33].mxu1 }
 0x570   : > { %v3652_v34 = vpop.f32.mrb[34].mxu1 }
 0x571   : > { %v3662_v56 = vmul.f32 %v12174_v20, %v3650_v54  ;;  %v10464_v57 = vpop.f32.mrb[35].mxu1 }
 0x573   : > { %v3670_v58 = vadd.f32 %v12179_v25, %v3662_v56 }
 0x575   : > { %v3671_v59 = vmax.f32 %v3670_v58, 0.0 }
 0x577   : > { %v3673_v60 = vadd.f32 %v3671_v59, %v12186_v33 }
 0x579   : > { %3675 = vst [vmem:[#allocation2 + $0x8] sm:$0xff] %v3673_v60 }
 0x57a PF: > { %v11004_v61 = vld [vmem:[%s11420_s23 + $0x4] ss:$12 sps:$4 sm:$0xff]   ;;  %v11006_v62 = vld [vmem:[%s11420_s23] ss:$12 sps:$4 sm:$0xff]   ;;  %v11286_v63 = vmov 0   ;;  %v11287_v20 = vmov 0.0   ;;  %v3713_v27 = vlaneseq  ;;  %s13281_s27 = scalar_lea.vmem %s13241_s9, %s11407_s29 }
 0x57b   : > { %3888 = vmatprep.mubr.bf16.mxu0 %v11286_v63  ;;  %10465 = vmatprep.subr.bf16.mxu1 %v11287_v20  ;;  %v11007_v25 = vld [vmem:[%s11420_s23 + $0x1c] ss:$12 sps:$4 sm:$0xff]   ;;  %v11009_v33 = vld [vmem:[%s11420_s23 + $0x18] ss:$12 sps:$4 sm:$0xff]   ;;  %v11010_v0 = vld [vmem:[%s11420_s23 + $0x34] ss:$12 sps:$4 sm:$0xff]  }
 0x57c   : > { %3856 = vmatprep.subr.bf16.mxu0 %v11004_v61  ;;  %v11012_v1 = vld [vmem:[%s11420_s23 + $0x30] ss:$12 sps:$4 sm:$0xff]   ;;  %v11013_v2 = vld [vmem:[%s11420_s23 + $0x4c] ss:$12 sps:$4 sm:$0xff]   ;;  %v11015_v3 = vld [vmem:[%s11420_s23 + $0x48] ss:$12 sps:$4 sm:$0xff]  }
 0x57d   : > { %3857 = vmatpush1.bf16.msra.mxu0 %v11006_v62  ;;  %v11016_v4 = vld [vmem:[%s11420_s23 + $0x64] ss:$12 sps:$4 sm:$0xff]   ;;  %v11028_v5 = vld [vmem:[%s11420_s23 + $0x8] ss:$12 sps:$4 sm:$0xff]   ;;  %v11029_v6 = vld [vmem:[%s11420_s23 + $0x20] ss:$12 sps:$4 sm:$0xff]  }
 0x57e   : > { %3858 = vmatprep.subr.bf16.mxu0 %v11007_v25  ;;  %10466 = vmatpush3.bf16.msra.mxu1 %v11028_v5  ;;  %v11018_v7 = vld [vmem:[%s11420_s23 + $0x60] ss:$12 sps:$4 sm:$0xff]   ;;  %v11019_v8 = vld [vmem:[%s11420_s23 + $0x7c] ss:$12 sps:$4 sm:$0xff]   ;;  %v11030_v9 = vld [vmem:[%s11420_s23 + $0x38] ss:$12 sps:$4 sm:$0xff]  }
 0x57f   : > { %10467 = vmatprep.subr.bf16.mxu1 %v11287_v20  ;;  %v11021_v10 = vld [vmem:[%s11420_s23 + $0x78] ss:$12 sps:$4 sm:$0xff]   ;;  %v11022_v11 = vld [vmem:[%s11420_s23 + $0x94] ss:$12 sps:$4 sm:$0xff]   ;;  %v11031_v14 = vld [vmem:[%s11420_s23 + $0x50] ss:$12 sps:$4 sm:$0xff]  }
 0x580   : > { %v11024_v15 = vld [vmem:[%s11420_s23 + $0x90] ss:$12 sps:$4 sm:$0xff]   ;;  %v11025_v16 = vld [vmem:[%s11420_s23 + $0xac] ss:$12 sps:$4 sm:$0xff]   ;;  %v11032_v17 = vld [vmem:[%s11420_s23 + $0x68] ss:$12 sps:$4 sm:$0xff]  }
 0x581   : > { %3859 = vmatpush1.bf16.msra.mxu0 %v11009_v33  ;;  %v11027_v18 = vld [vmem:[%s11420_s23 + $0xa8] ss:$12 sps:$4 sm:$0xff]   ;;  %v3676_v19 = vld [vmem:[#allocation2] sm:$0xff]  ;;  %v11035_v26 = vld [vmem:[%s11420_s23 + $0xb0] ss:$12 sps:$4 sm:$0xff]   ;;  %vm11288_vm8 = vmmov 0  }
 0x582   : > { %3860 = vmatprep.subr.bf16.mxu0 %v11010_v0  ;;  %10468 = vmatpush3.bf16.msra.mxu1 %v11029_v6  ;;  %v3677_v21 = vld [vmem:[#allocation2 + $0x8] sm:$0xff]  ;;  %v11034_v24 = vld [vmem:[%s11420_s23 + $0x98] ss:$12 sps:$4 sm:$0xff]   ;;  %v12424_v28 = vshrl.u32 %v3713_v27, 7  ;;  %v3711_v30 = vld [vmem:[%s11429_s5] sm:$0x7] }
 0x583   : > { %10469 = vmatprep.subr.bf16.mxu1 %v11287_v20  ;;  %v11033_v22 = vld [vmem:[%s11420_s23 + $0x80] ss:$12 sps:$4 sm:$0xff]   ;;  %v3678_v23 = vpack.c.bf16 %v3677_v21, %v3676_v19  ;;  %10481 = vmatprep.mubr.msk.bf16.mxu1 %vm11288_vm8, %v11287_v20  ;;  %vm3980_vm9 = vcmask 130048   ;;  %vm4105_vm10 = vcmask 1043456   ;;  %v11289_v57 = vmov 1966171168  }
 0x584   : > { %v12427_v29 = vsub.s32 1, %v12424_v28  ;;  %v12432_v32 = vsub.s32 0, %v12424_v28  ;;  %v12458_v48 = vsub.s32 2, %v12424_v28  ;;  %v3957_v58 = vunpack.c.l.s4 %v11289_v57  ;;  %s13280_s19 = sld [smem:[#allocation11_spill]]  ;;  %s11290_s8 = smov 112  }
 0x585   : > { %3861 = vmatpush1.bf16.msra.mxu0 %v11012_v1  ;;  %vm4077_vm11 = vcmask 64512   ;;  %s11291_s12 = smov 96   ;;  %s11292_s7 = smov 80   ;;  %vm5827_vm12 = vcmask 261120   ;;  %vm5830_vm13 = vcmask 392192   ;;  %vm5833_vm14 = vcmask 523264  }
 0x586   : > { %3862 = vmatprep.subr.bf16.mxu0 %v11013_v2  ;;  %10470 = vmatpush3.bf16.msra.mxu1 %v11030_v9  ;;  %v3720_v31 = vrot.slane %v3711_v30, %v12427_v29  ;;  %v3716_v37 = vrot.slane %v3711_v30, %v12432_v32  ;;  %v3724_v49 = vrot.slane %v3711_v30, %v12458_v48  ;;  %v3958_v59 = vunpack.c.0.s8 %v3957_v58  ;;  %s11293_s1 = smov 64   ;;  %s11294_s0 = smov 48  }
 0x587   : > { %10471 = vmatprep.subr.bf16.mxu1 %v11287_v20  ;;  %s11295_s2 = smov 32   ;;  %s11296_s24 = smov 16   ;;  %vm5836_vm15 = vcmask 654336   ;;  %vm5839_vm0 = vcmask 785408   ;;  %vm5842_vm1 = vcmask 916480  }
 0x588   : > { %v3961_v60 = vsub.s32 %v3958_v59, %v12424_v28  ;;  %p10703_p5 = scmp.eq.s32.totalorder %s11401_s28, 5 }
 0x589   : > { %3863 = vmatpush1.bf16.msra.mxu0 %v11015_v3 }
 0x58a   : > { %3864 = vmatprep.subr.bf16.mxu0 %v11016_v4  ;;  %10472 = vmatpush3.bf16.msra.mxu1 %v11031_v14  ;;  %v9459_v61 = vld.sshfl [vmem:[%s13280_s19] sm:$0x11 pattern:$0x75316420]  ;;  %s13282_s19 = scalar_lea.vmem %s13242_s10, %s11407_s29 }
 0x58b   : > { %10473 = vmatprep.subr.bf16.mxu1 %v11287_v20  ;;  %v3962_v62 = vrot.slane %v9459_v61, %v3961_v60  ;;  %v3955_v25 = vcombine.high %v9459_v61, %v9459_v61 }
 0x58d   : > { %3865 = vmatpush1.bf16.msra.mxu0 %v11018_v7  ;;  %v12471_v33 = vrot.slane %v3962_v62, %v12432_v32  ;;  %v3969_v4 = vrot.slane %v3955_v25, %v3961_v60 }
 0x58e   : > { %3866 = vmatprep.subr.bf16.mxu0 %v11019_v8  ;;  %10474 = vmatpush3.bf16.msra.mxu1 %v11032_v17 }
 0x58f   : > { %10475 = vmatprep.subr.bf16.mxu1 %v11287_v20  ;;  %v12476_v8 = vrot.slane %v3969_v4, %v12432_v32 }
 0x591   : > { %3867 = vmatpush1.bf16.msra.mxu0 %v11021_v10 }
 0x592   : > { %3868 = vmatprep.subr.bf16.mxu0 %v11022_v11  ;;  %10476 = vmatpush3.bf16.msra.mxu1 %v11033_v22 }
 0x593   : > { %10477 = vmatprep.subr.bf16.mxu1 %v11287_v20 }
 0x595   : > { %3869 = vmatpush1.bf16.msra.mxu0 %v11024_v15 }
 0x596   : > { %3870 = vmatprep.subr.bf16.mxu0 %v11025_v16  ;;  %10478 = vmatpush3.bf16.msra.mxu1 %v11034_v24 }
 0x597   : > { %10479 = vmatprep.subr.bf16.mxu1 %v11287_v20 }
 0x599   : > { %3871 = vmatpush1.bf16.msra.mxu0 %v11027_v18 }
 0x59a   : > { %10509 = vmatprep.subr.bf16.mxu0 %v11287_v20  ;;  %10480 = vmatpush3.bf16.msra.mxu1 %v11035_v26 }
 0x59b   : > { %10485 = vmatprep.subr.bf16.mxu1 %v11287_v20 }
 0x59c   : > { %3889 = vmatmul.mubr.bf16.vlgmr.msra.gmra.mrb[0].mxu0 %v3678_v23 }
 0x59d   : > { %10511 = vmatprep.mubr.msk.bf16.mxu0 %vm11288_vm8, %v11287_v20  ;;  %10482 = vmatmul.mubr.bf16.vlgmr.msra.gmra.mrb[0].mxu1 %v3678_v23 }
 0x59e   : > { %10487 = vmatprep.mubr.msk.bf16.mxu1 %vm11288_vm8, %v11287_v20 }
 0x66f   : > { %v3890_v45 = vpop.f32.mrb[0].mxu0 }
 0x670   : > { %v3892_v12 = vpop.f32.mrb[1].mxu0  ;;  %v3891_v41 = vadd.f32 %v3890_v45, %v3716_v37  ;;  %v3933_v50 = vpop.f32.mrb[0].mxu1 }
 0x671   : > { %v3893_v13 = vadd.f32 %v3892_v12, %v3720_v31  ;;  %v3894_v35 = vpop.f32.mrb[2].mxu0  ;;  %v3934_v51 = vadd.f32 %v3933_v50, %v3724_v49  ;;  %v10483_v52 = vpop.f32.mrb[1].mxu1 }
 0x672   : > { %v3896_v36 = vpop.f32.mrb[3].mxu0  ;;  %v12442_v43 = vpack.c.bf16 %v3891_v41, %v3891_v41  ;;  %v3895_v46 = vadd.f32 %v3894_v35, %v3716_v37  ;;  %v3936_v53 = vpop.f32.mrb[2].mxu1 }
 0x673   : > { %v12435_v38 = vpack.c.bf16 %v3893_v13, %v3893_v13  ;;  %v3897_v39 = vadd.f32 %v3896_v36, %v3720_v31  ;;  %v12461_v54 = vpack.c.bf16 %v3934_v51, %v3934_v51  ;;  %v3937_v55 = vadd.f32 %v3936_v53, %v3724_v49  ;;  %v10484_v34 = vpop.f32.mrb[3].mxu1 }
 0x674   : > { %v12451_v47 = vpack.c.bf16 %v3895_v46, %v3895_v46 }
 0x675   : > { %v3985_v40 = vsel %vm3980_vm9, %v12435_v38, 0  ;;  %v12440_v42 = vpack.c.bf16 %v3897_v39, %v3897_v39  ;;  %v4107_v56 = vsel %vm4105_vm10, %v12461_v54, 0  ;;  %v12492_v36 = vpack.c.bf16 %v3937_v55, %v3937_v55 }
 0x676   : > { %10486 = vmatpush3.bf16.xpose.msra.mxu1 %v3985_v40 }
 0x677   : > { %10491 = vmatprep.subr.bf16.mxu1 %v11287_v20  ;;  %v4031_v44 = vsel %vm3980_vm9, %v12440_v42, 0  ;;  %v4153_v40 = vsel %vm4105_vm10, %v12492_v36, 0 }
 0x67d   : > { %10488 = vmatmul.mubr.msk.bf16.vlgmr.msra.gmra.mrb[4].mxu1 %vm3980_vm9, %v12442_v43 }
 0x67e   : > { %10492 = vmatpush3.bf16.xpose.msra.mxu1 %v4031_v44  ;;  %10493 = vmatprep.mubr.msk.bf16.mxu1 %vm11288_vm8, %v11287_v20 }
 0x67f   : > { %10497 = vmatprep.subr.bf16.mxu1 %v11287_v20 }
 0x685   : > { %10494 = vmatmul.mubr.msk.bf16.vlgmr.msra.gmra.mrb[8].mxu1 %vm3980_vm9, %v12451_v47 }
 0x686   : > { %10499 = vmatprep.mubr.msk.bf16.mxu1 %vm11288_vm8, %v11287_v20  ;;  %10498 = vmatpush3.bf16.msra.mxu1 %v4107_v56 }
 0x687   : > { %10503 = vmatprep.subr.bf16.mxu1 %v11287_v20 }
 0x750   : > { %v4021_v0 = vpop.f32.mrb[4].mxu1 }
 0x751   : > { %v4073_v1 = vmul.f32 0.25, %v4021_v0  ;;  %v10489_v2 = vpop.f32.mrb[5].mxu1 }
 0x752   : > { %v4024_v3 = vpop.f32.mrb[6].mxu1 }
 0x753   : > { %v10490_v5 = vpop.f32.mrb[7].mxu1  ;;  %v4075_v6 = vadd.f32 %v4073_v1, %v12471_v33 }
 0x755   : > { %v4078_v7 = vsel %vm4077_vm11, %v4075_v6, -inf }
 0x756   : > { %4079 = vmax.xlane.f32.xlu0 %v4078_v7 }
 0x758   : > { %v4067_v9 = vpop.f32.mrb[8].mxu1 }
 0x759   : > { %v4074_v10 = vmul.f32 0.25, %v4067_v9  ;;  %v10495_v11 = vpop.f32.mrb[9].mxu1 }
 0x75a   : > { %v4070_v14 = vpop.f32.mrb[10].mxu1 }
 0x75b   : > { %v10496_v15 = vpop.f32.mrb[11].mxu1  ;;  %v4076_v16 = vadd.f32 %v4074_v10, %v12476_v8 }
 0x75d   : > { %v4081_v17 = vsel %vm4077_vm11, %v4076_v16, -inf }
 0x75e   : > { %4082 = vmax.xlane.f32.xlu0 %v4081_v17 }
 0x774   : > { %4199 = vrot.lane.b32.xlu0 %v12435_v38, %s11290_s8 }
 0x7e3   : > { %v4080_v18 = vpop.xlane.xlu0 %4079 }
 0x7e4   : > { %v4084_v19 = vsub.f32 %v4075_v6, %v4080_v18 }
 0x7e6   : > { %v4086_v21 = vmul.f32 1.442695, %v4084_v19 }
 0x7e8   : > { %11172 = vpow2.f32 %v4086_v21 }
 0x7eb   : > { %v4083_v22 = vpop.xlane.xlu0 %4082 }
 0x7ec   : > { %v4085_v30 = vsub.f32 %v4076_v16, %v4083_v22 }
 0x7ee   : > { %v4088_v31 = vmul.f32 1.442695, %v4085_v30 }
 0x7ef   : > { %v4200_v23 = vpop.permute.xlu0 %4199 }
 0x7f0   : > { %v4205_v24 = vsel %vm3980_vm9, %v4200_v23, 0  ;;  %11174 = vpow2.f32 %v4088_v31 }
 0x7f1   : > { %10510 = vmatpush3.bf16.xpose.msra.mxu0 %v4205_v24 }
 0x7f2   : > { %v11173_v26 = vpop.eup %11172  ;;  %10521 = vmatprep.subr.bf16.mxu0 %v11287_v20 }
 0x7f3   : > { %v4090_v27 = vsel %vm4077_vm11, %v11173_v26, 0.0 }
 0x7f4   : > { %4091 = vadd.xlane.f32.xlu1 %v4090_v27 }
 0x7fa   : > { %v11175_v45 = vpop.eup %11174 }
 0x7fb   : > { %v4093_v12 = vsel %vm4077_vm11, %v11175_v45, 0.0 }
 0x805   : > { %4251 = vrot.lane.b32.xlu1 %v12440_v42, %s11290_s8 }
 0x829   : > { %4094 = vadd.xlane.f32.xlu1 %v4093_v12 }
 0x83a   : > { %4196 = vrot.lane.b32.xlu1 %v12442_v43, %s11290_s8 }
 0x83e   : > { %4248 = vrot.lane.b32.xlu1 %v12451_v47, %s11290_s8 }
 0x881   : > { %v4092_v13 = vpop.xlane.xlu1 %4091 }
 0x882   : > { %11176 = vrcp.f32 %v4092_v13 }
 0x885   : > { %v4252_v41 = vpop.permute.xlu1 %4251 }
 0x886   : > { %v4257_v52 = vsel %vm3980_vm9, %v4252_v41, 0 }
 0x88c   : > { %v11177_v35 = vpop.eup %11176 }
 0x88d   : > { %v4098_v37 = vmul.f32 %v11177_v35, %v11173_v26 }
 0x88f   : > { %v4100_v39 = vpack.c.bf16 %v4098_v37, %v4098_v37 }
 0x891   : > { %10500 = vmatmul.mubr.msk.bf16.vlgmr.msra.gmra.mrb[12].mxu1 %vm4077_vm11, %v4100_v39 }
 0x892   : > { %10504 = vmatpush3.bf16.msra.mxu1 %v4153_v40  ;;  %10505 = vmatprep.mubr.msk.bf16.mxu1 %vm11288_vm8, %v11287_v20 }
 0x893   : > { %10515 = vmatprep.subr.bf16.mxu1 %v11287_v20 }
 0x8b6   : > { %v4095_v44 = vpop.xlane.xlu1 %4094 }
 0x8b7   : > { %11178 = vrcp.f32 %v4095_v44 }
 0x8ba   : > { %v4197_v46 = vpop.permute.xlu1 %4196 }
 0x8bb   : > { %10512 = vmatmul.mubr.msk.bf16.vlgmr.msra.gmra.mrb[4].mxu0 %vm3980_vm9, %v4197_v46 }
 0x8bc   : > { %10523 = vmatprep.mubr.msk.bf16.mxu0 %vm11288_vm8, %v11287_v20 }
 0x8be   : > { %v4249_v53 = vpop.permute.xlu1 %4248 }
 0x8c1   : > { %v11179_v49 = vpop.eup %11178 }
 0x8c2   : > { %v4099_v50 = vmul.f32 %v11179_v49, %v11175_v45 }
 0x8c4   : > { %v4101_v51 = vpack.c.bf16 %v4099_v50, %v4099_v50 }
 0x8c6   : > { %10506 = vmatmul.mubr.msk.bf16.vlgmr.msra.gmra.mrb[16].mxu1 %vm4077_vm11, %v4101_v51 }
 0x8c7   : > { %10516 = vmatpush3.bf16.xpose.msra.mxu1 %v4257_v52  ;;  %10517 = vmatprep.mubr.msk.bf16.mxu1 %vm11288_vm8, %v11287_v20 }
 0x8c8   : > { %10527 = vmatprep.subr.bf16.mxu1 %v11287_v20 }
 0x8ce   : > { %10518 = vmatmul.mubr.msk.bf16.vlgmr.msra.gmra.mrb[20].mxu1 %vm3980_vm9, %v4249_v53 }
 0x8cf   : > { %10529 = vmatprep.mubr.msk.bf16.mxu1 %vm11288_vm8, %v11287_v20 }
 0x964   : > { %v12511_v55 = vpop.f32.mrb[12].mxu1 }
 0x965   : > { %v10501_v34 = vpop.f32.mrb[13].mxu1 }
 0x966   : > { %v4146_v56 = vpop.f32.mrb[14].mxu1 }
 0x967   : > { %v10502_v57 = vpop.f32.mrb[15].mxu1 }
 0x98e   : > { %v4241_v58 = vpop.f32.mrb[4].mxu0 }
 0x98f   : > { %v4299_v59 = vmul.f32 0.25, %v4241_v58  ;;  %v10513_v60 = vpop.f32.mrb[5].mxu0 }
 0x990   : > { %v4244_v61 = vpop.f32.mrb[6].mxu0 }
 0x991   : > { %v10514_v62 = vpop.f32.mrb[7].mxu0  ;;  %v4301_v25 = vadd.f32 %v4299_v59, %v12471_v33 }
 0x993   : > { %v4303_v0 = vsel %vm4077_vm11, %v4301_v25, -inf }
 0x994   : > { %4304 = vmax.xlane.f32.xlu0 %v4303_v0 }
 0x999   : > { %v12515_v1 = vpop.f32.mrb[16].mxu1 }
 0x99a   : > { %v10507_v2 = vpop.f32.mrb[17].mxu1 }
 0x99b   : > { %v4192_v3 = vpop.f32.mrb[18].mxu1 }
 0x99c   : > { %v10508_v4 = vpop.f32.mrb[19].mxu1 }
 0x9a1   : > { %v4293_v5 = vpop.f32.mrb[20].mxu1 }
 0x9a2   : > { %v4300_v6 = vmul.f32 0.25, %v4293_v5  ;;  %v10519_v7 = vpop.f32.mrb[21].mxu1 }
 0x9a3   : > { %v4296_v9 = vpop.f32.mrb[22].mxu1 }
 0x9a4   : > { %v10520_v10 = vpop.f32.mrb[23].mxu1  ;;  %v4302_v11 = vadd.f32 %v4300_v6, %v12476_v8 }
 0x9a6   : > { %v4306_v14 = vsel %vm4077_vm11, %v4302_v11, -inf }
 0x9a7   : > { %4307 = vmax.xlane.f32.xlu1 %v4306_v14 }
 0x9b8   : > { %4377 = vrot.lane.b32.xlu1 %v12492_v36, %s11290_s8 }
 0x9bc   : > { %4427 = vrot.lane.b32.xlu1 %v12435_v38, %s11291_s12 }
 0x9c0   : > { %4477 = vrot.lane.b32.xlu1 %v12440_v42, %s11291_s12 }
 0x9c4   : > { %4475 = vrot.lane.b32.xlu1 %v12451_v47, %s11291_s12 }
 0xa21   : > { %v4305_v15 = vpop.xlane.xlu0 %4304 }
 0xa22   : > { %v4309_v16 = vsub.f32 %v4301_v25, %v4305_v15 }
 0xa24   : > { %v4311_v17 = vmul.f32 1.442695, %v4309_v16 }
 0xa26   : > { %11180 = vpow2.f32 %v4311_v17 }
 0xa30   : > { %v11181_v18 = vpop.eup %11180 }
 0xa31   : > { %v4315_v19 = vsel %vm4077_vm11, %v11181_v18, 0.0 }
 0xa32   : > { %4316 = vadd.xlane.f32.xlu0 %v4315_v19 }
 0xa34   : > { %v4308_v21 = vpop.xlane.xlu1 %4307 }
 0xa35   : > { %v4310_v22 = vsub.f32 %v4302_v11, %v4308_v21 }
 0xa37   : > { %v4313_v23 = vmul.f32 1.442695, %v4310_v22 }
 0xa38   : > { %v4378_v24 = vpop.permute.xlu1 %4377 }
 0xa39   : > { %11182 = vpow2.f32 %v4313_v23  ;;  %v4383_v26 = vsel %vm4105_vm10, %v4378_v24, 0 }
 0xa3a   : > { %10528 = vmatpush3.bf16.msra.mxu1 %v4383_v26 }
 0xa3b   : > { %10539 = vmatprep.subr.bf16.mxu1 %v11287_v20 }
 0xa3c   : > { %v4428_v39 = vpop.permute.xlu1 %4427 }
 0xa3d   : > { %v4433_v49 = vsel %vm3980_vm9, %v4428_v39, 0 }
 0xa40   : > { %v4478_v46 = vpop.permute.xlu1 %4477 }
 0xa41   : > { %v4483_v51 = vsel %vm3980_vm9, %v4478_v46, 0 }
 0xa43   : > { %v11183_v27 = vpop.eup %11182 }
 0xa44   : > { %v4318_v30 = vsel %vm4077_vm11, %v11183_v27, 0.0  ;;  %v4476_v53 = vpop.permute.xlu1 %4475 }
 0xa45   : > { %4319 = vadd.xlane.f32.xlu0 %v4318_v30 }
 0xa5b   : > { %4328 = vrot.lane.b32.xlu0 %v12461_v54, %s11290_s8 }
 0xa5f   : > { %4425 = vrot.lane.b32.xlu0 %v12442_v43, %s11291_s12 }
 0xabf   : > { %v4317_v31 = vpop.xlane.xlu0 %4316 }
 0xac0   : > { %11184 = vrcp.f32 %v4317_v31 }
 0xaca   : > { %v11185_v45 = vpop.eup %11184 }
 0xacb   : > { %v4323_v13 = vmul.f32 %v11185_v45, %v11181_v18 }
 0xacd   : > { %v4325_v40 = vpack.c.bf16 %v4323_v13, %v4323_v13 }
 0xad2   : > { %v4320_v12 = vpop.xlane.xlu0 %4319 }
 0xad3   : > { %11186 = vrcp.f32 %v4320_v12 }
 0xad6   : > { %v4329_v35 = vpop.permute.xlu0 %4328 }
 0xad7   : > { %v4334_v37 = vsel %vm4105_vm10, %v4329_v35, 0 }
 0xad8   : > { %10522 = vmatpush3.bf16.msra.mxu0 %v4334_v37 }
 0xad9   : > { %10533 = vmatprep.subr.bf16.mxu0 %v11287_v20 }
 0xada   : > { %v4426_v52 = vpop.permute.xlu0 %4425 }
 0xadb   : > { %10524 = vmatmul.mubr.msk.bf16.vlgmr.msra.gmra.mrb[8].mxu0 %vm4077_vm11, %v4325_v40 }
 0xadc   : > { %10535 = vmatprep.mubr.msk.bf16.mxu0 %vm11288_vm8, %v11287_v20 }
 0xadd   : > { %v11187_v41 = vpop.eup %11186 }
 0xade   : > { %v4324_v44 = vmul.f32 %v11187_v41, %v11183_v27 }
 0xae0   : > { %v4326_v50 = vpack.c.bf16 %v4324_v44, %v4324_v44 }
 0xae1   : > { %10534 = vmatpush3.bf16.xpose.msra.mxu0 %v4433_v49 }
 0xae2   : > { %10530 = vmatmul.mubr.msk.bf16.vlgmr.msra.gmra.mrb[24].mxu1 %vm4077_vm11, %v4326_v50  ;;  %10545 = vmatprep.subr.bf16.mxu0 %v11287_v20 }
 0xae3   : > { %10540 = vmatpush3.bf16.xpose.msra.mxu1 %v4483_v51  ;;  %10541 = vmatprep.mubr.msk.bf16.mxu1 %vm11288_vm8, %v11287_v20 }
 0xae4   : > { %10551 = vmatprep.subr.bf16.mxu1 %v11287_v20 }
 0xae8   : > { %10536 = vmatmul.mubr.msk.bf16.vlgmr.msra.gmra.mrb[12].mxu0 %vm3980_vm9, %v4426_v52 }
 0xae9   : > { %10547 = vmatprep.mubr.msk.bf16.mxu0 %vm11288_vm8, %v11287_v20 }
 0xaea   : > { %10542 = vmatmul.mubr.msk.bf16.vlgmr.msra.gmra.mrb[28].mxu1 %vm3980_vm9, %v4476_v53 }
 0xaeb   : > { %10553 = vmatprep.mubr.msk.bf16.mxu1 %vm11288_vm8, %v11287_v20 }
 0xbae   : > { %v12553_v34 = vpop.f32.mrb[8].mxu0 }
 0xbaf   : > { %v10525_v56 = vpop.f32.mrb[9].mxu0 }
 0xbb0   : > { %v4373_v57 = vpop.f32.mrb[10].mxu0 }
 0xbb1   : > { %v10526_v58 = vpop.f32.mrb[11].mxu0 }
 0xbb5   : > { %v12555_v59 = vpop.f32.mrb[24].mxu1 }
 0xbb6   : > { %v10969_v60 = vpack.i.bf16 %v12555_v59, %v12553_v34  ;;  %v10531_v61 = vpop.f32.mrb[25].mxu1 }
 0xbb7   : > { %v4422_v62 = vpop.f32.mrb[26].mxu1 }
 0xbb8   : > { %v10532_v25 = vpop.f32.mrb[27].mxu1 }
 0xbbb   : > { %v4469_v0 = vpop.f32.mrb[12].mxu0 }
 0xbbc   : > { %v4525_v2 = vmul.f32 0.25, %v4469_v0  ;;  %v10537_v3 = vpop.f32.mrb[13].mxu0 }
 0xbbd   : > { %v4472_v4 = vpop.f32.mrb[14].mxu0  ;;  %v4519_v5 = vpop.f32.mrb[28].mxu1 }
 0xbbe   : > { %v4526_v6 = vmul.f32 0.25, %v4519_v5  ;;  %v10538_v7 = vpop.f32.mrb[15].mxu0  ;;  %v10543_v9 = vpop.f32.mrb[29].mxu1  ;;  %v4527_v10 = vadd.f32 %v4525_v2, %v12471_v33 }
 0xbbf   : > { %v4522_v11 = vpop.f32.mrb[30].mxu1 }
 0xbc0   : > { %v10544_v14 = vpop.f32.mrb[31].mxu1  ;;  %v4529_v15 = vsel %vm4077_vm11, %v4527_v10, -inf  ;;  %v4528_v16 = vadd.f32 %v4526_v6, %v12476_v8 }
 0xbc1   : > { %4530 = vmax.xlane.f32.xlu0 %v4529_v15 }
 0xbc2   : > { %v4532_v17 = vsel %vm4077_vm11, %v4528_v16, -inf }
 0xbc3   : > { %4533 = vmax.xlane.f32.xlu1 %v4532_v17 }
 0xbd4   : > { %4601 = vrot.lane.b32.xlu1 %v12492_v36, %s11291_s12 }
 0xbd8   : > { %4651 = vrot.lane.b32.xlu1 %v12435_v38, %s11292_s7 }
 0xbdc   : > { %4701 = vrot.lane.b32.xlu1 %v12440_v42, %s11292_s7 }
 0xbe0   : > { %4699 = vrot.lane.b32.xlu1 %v12451_v47, %s11292_s7 }
 0xc4e   : > { %v4531_v18 = vpop.xlane.xlu0 %4530 }
 0xc4f   : > { %v4535_v19 = vsub.f32 %v4527_v10, %v4531_v18 }
 0xc50   : > { %v4534_v21 = vpop.xlane.xlu1 %4533 }
 0xc51   : > { %v4537_v22 = vmul.f32 1.442695, %v4535_v19  ;;  %v4536_v23 = vsub.f32 %v4528_v16, %v4534_v21 }
 0xc53   : > { %11188 = vpow2.f32 %v4537_v22  ;;  %v4539_v24 = vmul.f32 1.442695, %v4536_v23 }
 0xc54   : > { %v4602_v26 = vpop.permute.xlu1 %4601 }
 0xc55   : > { %11190 = vpow2.f32 %v4539_v24  ;;  %v4607_v27 = vsel %vm4105_vm10, %v4602_v26, 0 }
 0xc56   : > { %10552 = vmatpush3.bf16.msra.mxu1 %v4607_v27 }
 0xc57   : > { %10563 = vmatprep.subr.bf16.mxu1 %v11287_v20 }
 0xc58   : > { %v4652_v41 = vpop.permute.xlu1 %4651 }
 0xc59   : > { %v4657_v52 = vsel %vm3980_vm9, %v4652_v41, 0 }
 0xc5c   : > { %v4702_v51 = vpop.permute.xlu1 %4701 }
 0xc5d   : > { %v11189_v30 = vpop.eup %11188  ;;  %v4707_v56 = vsel %vm3980_vm9, %v4702_v51, 0 }
 0xc5e   : > { %v4541_v31 = vsel %vm4077_vm11, %v11189_v30, 0.0 }
 0xc5f   : > { %v11191_v45 = vpop.eup %11190  ;;  %4542 = vadd.xlane.f32.xlu0 %v4541_v31 }
 0xc60   : > { %v4544_v12 = vsel %vm4077_vm11, %v11191_v45, 0.0  ;;  %v4700_v58 = vpop.permute.xlu1 %4699 }
 0xc63   : > { %4545 = vadd.xlane.f32.xlu0 %v4544_v12 }
 0xc79   : > { %4553 = vrot.lane.b32.xlu0 %v12461_v54, %s11291_s12 }
 0xc7d   : > { %4649 = vrot.lane.b32.xlu0 %v12442_v43, %s11292_s7 }
 0xcec   : > { %v4543_v13 = vpop.xlane.xlu0 %4542 }
 0xced   : > { %11192 = vrcp.f32 %v4543_v13 }
 0xcf0   : > { %v4546_v35 = vpop.xlane.xlu0 %4545 }
 0xcf1   : > { %11194 = vrcp.f32 %v4546_v35 }
 0xcf4   : > { %v4554_v37 = vpop.permute.xlu0 %4553 }
 0xcf5   : > { %v4559_v39 = vsel %vm4105_vm10, %v4554_v37, 0 }
 0xcf6   : > { %10546 = vmatpush3.bf16.msra.mxu0 %v4559_v39 }
 0xcf7   : > { %v11193_v40 = vpop.eup %11192  ;;  %10557 = vmatprep.subr.bf16.mxu0 %v11287_v20 }
 0xcf8   : > { %v4549_v44 = vmul.f32 %v11193_v40, %v11189_v30  ;;  %v4650_v57 = vpop.permute.xlu0 %4649 }
 0xcfa   : > { %v4551_v46 = vpack.c.bf16 %v4549_v44, %v4549_v44 }
 0xcfb   : > { %v11195_v49 = vpop.eup %11194 }
 0xcfc   : > { %v4550_v50 = vmul.f32 %v11195_v49, %v11191_v45  ;;  %10548 = vmatmul.mubr.msk.bf16.vlgmr.msra.gmra.mrb[16].mxu0 %vm4077_vm11, %v4551_v46 }
 0xcfd   : > { %10559 = vmatprep.mubr.msk.bf16.mxu0 %vm11288_vm8, %v11287_v20 }
 0xcfe   : > { %v4552_v53 = vpack.c.bf16 %v4550_v50, %v4550_v50 }
 0xcff   : > { %10558 = vmatpush3.bf16.xpose.msra.mxu0 %v4657_v52 }
 0xd00   : > { %10554 = vmatmul.mubr.msk.bf16.vlgmr.msra.gmra.mrb[32].mxu1 %vm4077_vm11, %v4552_v53  ;;  %10569 = vmatprep.subr.bf16.mxu0 %v11287_v20 }
 0xd01   : > { %10564 = vmatpush3.bf16.xpose.msra.mxu1 %v4707_v56  ;;  %10565 = vmatprep.mubr.msk.bf16.mxu1 %vm11288_vm8, %v11287_v20 }
 0xd02   : > { %10575 = vmatprep.subr.bf16.mxu1 %v11287_v20 }
 0xd06   : > { %10560 = vmatmul.mubr.msk.bf16.vlgmr.msra.gmra.mrb[20].mxu0 %vm3980_vm9, %v4650_v57 }
 0xd07   : > { %10571 = vmatprep.mubr.msk.bf16.mxu0 %vm11288_vm8, %v11287_v20 }
 0xd08   : > { %10566 = vmatmul.mubr.msk.bf16.vlgmr.msra.gmra.mrb[36].mxu1 %vm3980_vm9, %v4700_v58 }
 0xd09   : > { %10577 = vmatprep.mubr.msk.bf16.mxu1 %vm11288_vm8, %v11287_v20 }
 0xdcf   : > { %v12597_v61 = vpop.f32.mrb[16].mxu0 }
 0xdd0   : > { %v10549_v62 = vpop.f32.mrb[17].mxu0 }
 0xdd1   : > { %v4598_v25 = vpop.f32.mrb[18].mxu0 }
 0xdd2   : > { %v10550_v0 = vpop.f32.mrb[19].mxu0 }
 0xdd3   : > { %v12599_v2 = vpop.f32.mrb[32].mxu1 }
 0xdd4   : > { %v10974_v3 = vpack.i.bf16 %v12599_v2, %v12597_v61  ;;  %v10555_v4 = vpop.f32.mrb[33].mxu1 }
 0xdd5   : > { %v4646_v5 = vpop.f32.mrb[34].mxu1 }
 0xdd6   : > { %v10556_v6 = vpop.f32.mrb[35].mxu1 }
 0xdd9   : > { %v4693_v7 = vpop.f32.mrb[20].mxu0 }
 0xdda   : > { %v4749_v9 = vmul.f32 0.25, %v4693_v7  ;;  %v10561_v10 = vpop.f32.mrb[21].mxu0 }
 0xddb   : > { %v4696_v11 = vpop.f32.mrb[22].mxu0  ;;  %v4743_v14 = vpop.f32.mrb[36].mxu1 }
 0xddc   : > { %v4750_v15 = vmul.f32 0.25, %v4743_v14  ;;  %v10562_v16 = vpop.f32.mrb[23].mxu0  ;;  %v10567_v17 = vpop.f32.mrb[37].mxu1  ;;  %v4751_v18 = vadd.f32 %v4749_v9, %v12471_v33 }
 0xddd   : > { %v4746_v19 = vpop.f32.mrb[38].mxu1 }
 0xdde   : > { %v10568_v21 = vpop.f32.mrb[39].mxu1  ;;  %v4753_v22 = vsel %vm4077_vm11, %v4751_v18, -inf  ;;  %v4752_v23 = vadd.f32 %v4750_v15, %v12476_v8 }
 0xddf   : > { %4754 = vmax.xlane.f32.xlu0 %v4753_v22 }
 0xde0   : > { %v4756_v24 = vsel %vm4077_vm11, %v4752_v23, -inf }
 0xde1   : > { %4757 = vmax.xlane.f32.xlu1 %v4756_v24 }
 0xdf2   : > { %4825 = vrot.lane.b32.xlu1 %v12492_v36, %s11292_s7 }
 0xdf6   : > { %4875 = vrot.lane.b32.xlu1 %v12435_v38, %s11293_s1 }
 0xdfa   : > { %4925 = vrot.lane.b32.xlu1 %v12440_v42, %s11293_s1 }
 0xdfe   : > { %4923 = vrot.lane.b32.xlu1 %v12451_v47, %s11293_s1 }
 0xe6c   : > { %v4755_v26 = vpop.xlane.xlu0 %4754 }
 0xe6d   : > { %v4759_v27 = vsub.f32 %v4751_v18, %v4755_v26 }
 0xe6e   : > { %v4758_v30 = vpop.xlane.xlu1 %4757 }
 0xe6f   : > { %v4761_v31 = vmul.f32 1.442695, %v4759_v27  ;;  %v4760_v45 = vsub.f32 %v4752_v23, %v4758_v30 }
 0xe71   : > { %11196 = vpow2.f32 %v4761_v31  ;;  %v4763_v12 = vmul.f32 1.442695, %v4760_v45 }
 0xe72   : > { %v4826_v13 = vpop.permute.xlu1 %4825 }
 0xe73   : > { %11198 = vpow2.f32 %v4763_v12  ;;  %v4831_v35 = vsel %vm4105_vm10, %v4826_v13, 0 }
 0xe74   : > { %10576 = vmatpush3.bf16.msra.mxu1 %v4831_v35 }
 0xe75   : > { %10587 = vmatprep.subr.bf16.mxu1 %v11287_v20 }
 0xe76   : > { %v4876_v52 = vpop.permute.xlu1 %4875 }
 0xe77   : > { %v4881_v25 = vsel %vm3980_vm9, %v4876_v52, 0 }
 0xe7a   : > { %v4926_v62 = vpop.permute.xlu1 %4925 }
 0xe7b   : > { %v11197_v37 = vpop.eup %11196  ;;  %v4931_v4 = vsel %vm3980_vm9, %v4926_v62, 0 }
 0xe7c   : > { %v4765_v39 = vsel %vm4077_vm11, %v11197_v37, 0.0 }
 0xe7d   : > { %v11199_v40 = vpop.eup %11198  ;;  %4766 = vadd.xlane.f32.xlu0 %v4765_v39 }
 0xe7e   : > { %v4768_v41 = vsel %vm4077_vm11, %v11199_v40, 0.0  ;;  %v4924_v6 = vpop.permute.xlu1 %4923 }
 0xe81   : > { %4769 = vadd.xlane.f32.xlu0 %v4768_v41 }
 0xe97   : > { %4777 = vrot.lane.b32.xlu0 %v12461_v54, %s11292_s7 }
 0xe9b   : > { %4873 = vrot.lane.b32.xlu0 %v12442_v43, %s11293_s1 }
 0xf0a   : > { %v4767_v44 = vpop.xlane.xlu0 %4766 }
 0xf0b   : > { %11200 = vrcp.f32 %v4767_v44 }
 0xf0e   : > { %v4770_v46 = vpop.xlane.xlu0 %4769 }
 0xf0f   : > { %11202 = vrcp.f32 %v4770_v46 }
 0xf12   : > { %v4778_v49 = vpop.permute.xlu0 %4777 }
 0xf13   : > { %v4783_v50 = vsel %vm4105_vm10, %v4778_v49, 0 }
 0xf14   : > { %10570 = vmatpush3.bf16.msra.mxu0 %v4783_v50 }
 0xf15   : > { %v11201_v51 = vpop.eup %11200  ;;  %10581 = vmatprep.subr.bf16.mxu0 %v11287_v20 }
 0xf16   : > { %v4773_v53 = vmul.f32 %v11201_v51, %v11197_v37  ;;  %v4874_v5 = vpop.permute.xlu0 %4873 }
 0xf18   : > { %v4775_v56 = vpack.c.bf16 %v4773_v53, %v4773_v53 }
 0xf19   : > { %v11203_v57 = vpop.eup %11202 }
 0xf1a   : > { %v4774_v58 = vmul.f32 %v11203_v57, %v11199_v40  ;;  %10572 = vmatmul.mubr.msk.bf16.vlgmr.msra.gmra.mrb[24].mxu0 %vm4077_vm11, %v4775_v56 }
 0xf1b   : > { %10583 = vmatprep.mubr.msk.bf16.mxu0 %vm11288_vm8, %v11287_v20 }
 0xf1c   : > { %v4776_v0 = vpack.c.bf16 %v4774_v58, %v4774_v58 }
 0xf1d   : > { %10582 = vmatpush3.bf16.xpose.msra.mxu0 %v4881_v25 }
 0xf1e   : > { %10578 = vmatmul.mubr.msk.bf16.vlgmr.msra.gmra.mrb[40].mxu1 %vm4077_vm11, %v4776_v0  ;;  %10593 = vmatprep.subr.bf16.mxu0 %v11287_v20 }
 0xf1f   : > { %10588 = vmatpush3.bf16.xpose.msra.mxu1 %v4931_v4  ;;  %10589 = vmatprep.mubr.msk.bf16.mxu1 %vm11288_vm8, %v11287_v20 }
 0xf20   : > { %10599 = vmatprep.subr.bf16.mxu1 %v11287_v20 }
 0xf24   : > { %10584 = vmatmul.mubr.msk.bf16.vlgmr.msra.gmra.mrb[28].mxu0 %vm3980_vm9, %v4874_v5 }
 0xf25   : > { %10595 = vmatprep.mubr.msk.bf16.mxu0 %vm11288_vm8, %v11287_v20 }
 0xf26   : > { %10590 = vmatmul.mubr.msk.bf16.vlgmr.msra.gmra.mrb[44].mxu1 %vm3980_vm9, %v4924_v6 }
 0xf27   : > { %10601 = vmatprep.mubr.msk.bf16.mxu1 %vm11288_vm8, %v11287_v20 }
 0xfed   : > { %v12641_v7 = vpop.f32.mrb[24].mxu0 }
 0xfee   : > { %v10573_v9 = vpop.f32.mrb[25].mxu0 }
 0xfef   : > { %v4822_v10 = vpop.f32.mrb[26].mxu0 }
 0xff0   : > { %v10574_v11 = vpop.f32.mrb[27].mxu0 }
 0xff1   : > { %v12643_v14 = vpop.f32.mrb[40].mxu1 }
 0xff2   : > { %v10979_v15 = vpack.i.bf16 %v12643_v14, %v12641_v7  ;;  %v10579_v16 = vpop.f32.mrb[41].mxu1 }
 0xff3   : > { %v4870_v17 = vpop.f32.mrb[42].mxu1 }
 0xff4   : > { %v10580_v18 = vpop.f32.mrb[43].mxu1 }
 0xff7   : > { %v4917_v19 = vpop.f32.mrb[28].mxu0 }
 0xff8   : > { %v4973_v21 = vmul.f32 0.25, %v4917_v19  ;;  %v10585_v22 = vpop.f32.mrb[29].mxu0 }
 0xff9   : > { %v4920_v23 = vpop.f32.mrb[30].mxu0  ;;  %v4967_v24 = vpop.f32.mrb[44].mxu1 }
 0xffa   : > { %v4974_v26 = vmul.f32 0.25, %v4967_v24  ;;  %v10586_v27 = vpop.f32.mrb[31].mxu0  ;;  %v10591_v30 = vpop.f32.mrb[45].mxu1  ;;  %v4975_v31 = vadd.f32 %v4973_v21, %v12471_v33 }
 0xffb   : > { %v4970_v45 = vpop.f32.mrb[46].mxu1 }
 0xffc   : > { %v10592_v12 = vpop.f32.mrb[47].mxu1  ;;  %v4977_v13 = vsel %vm4077_vm11, %v4975_v31, -inf  ;;  %v4976_v35 = vadd.f32 %v4974_v26, %v12476_v8 }
 0xffd   : > { %4978 = vmax.xlane.f32.xlu0 %v4977_v13 }
 0xffe   : > { %v4980_v37 = vsel %vm4077_vm11, %v4976_v35, -inf }
 0xfff   : > { %4981 = vmax.xlane.f32.xlu1 %v4980_v37 }
0x1010   : > { %5049 = vrot.lane.b32.xlu1 %v12492_v36, %s11293_s1 }
0x1014   : > { %5099 = vrot.lane.b32.xlu1 %v12435_v38, %s11294_s0 }
0x1018   : > { %5149 = vrot.lane.b32.xlu1 %v12440_v42, %s11294_s0 }
0x101c   : > { %5147 = vrot.lane.b32.xlu1 %v12451_v47, %s11294_s0 }
0x108a   : > { %v4979_v39 = vpop.xlane.xlu0 %4978 }
0x108b   : > { %v4983_v40 = vsub.f32 %v4975_v31, %v4979_v39 }
0x108c   : > { %v4982_v41 = vpop.xlane.xlu1 %4981 }
0x108d   : > { %v4985_v44 = vmul.f32 1.442695, %v4983_v40  ;;  %v4984_v46 = vsub.f32 %v4976_v35, %v4982_v41 }
0x108f   : > { %11204 = vpow2.f32 %v4985_v44  ;;  %v4987_v49 = vmul.f32 1.442695, %v4984_v46 }
0x1090   : > { %v5050_v50 = vpop.permute.xlu1 %5049 }
0x1091   : > { %11206 = vpow2.f32 %v4987_v49  ;;  %v5055_v51 = vsel %vm4105_vm10, %v5050_v50, 0 }
0x1092   : > { %10600 = vmatpush3.bf16.msra.mxu1 %v5055_v51 }
0x1093   : > { %10611 = vmatprep.subr.bf16.mxu1 %v11287_v20 }
0x1094   : > { %v5100_v5 = vpop.permute.xlu1 %5099 }
0x1095   : > { %v5105_v17 = vsel %vm3980_vm9, %v5100_v5, 0 }
0x1098   : > { %v5150_v16 = vpop.permute.xlu1 %5149 }
0x1099   : > { %v11205_v52 = vpop.eup %11204  ;;  %v5155_v19 = vsel %vm3980_vm9, %v5150_v16, 0 }
0x109a   : > { %v4989_v53 = vsel %vm4077_vm11, %v11205_v52, 0.0 }
0x109b   : > { %v11207_v56 = vpop.eup %11206  ;;  %4990 = vadd.xlane.f32.xlu0 %v4989_v53 }
0x109c   : > { %v4992_v57 = vsel %vm4077_vm11, %v11207_v56, 0.0  ;;  %v5148_v22 = vpop.permute.xlu1 %5147 }
0x109f   : > { %4993 = vadd.xlane.f32.xlu0 %v4992_v57 }
0x10b5   : > { %5001 = vrot.lane.b32.xlu0 %v12461_v54, %s11293_s1 }
0x10b9   : > { %5097 = vrot.lane.b32.xlu0 %v12442_v43, %s11294_s0 }
0x1128   : > { %v4991_v58 = vpop.xlane.xlu0 %4990 }
0x1129   : > { %11208 = vrcp.f32 %v4991_v58 }
0x112c   : > { %v4994_v62 = vpop.xlane.xlu0 %4993 }
0x112d   : > { %11210 = vrcp.f32 %v4994_v62 }
0x1130   : > { %v5002_v25 = vpop.permute.xlu0 %5001 }
0x1131   : > { %v5007_v0 = vsel %vm4105_vm10, %v5002_v25, 0 }
0x1132   : > { %10594 = vmatpush3.bf16.msra.mxu0 %v5007_v0 }
0x1133   : > { %v11209_v4 = vpop.eup %11208  ;;  %10605 = vmatprep.subr.bf16.mxu0 %v11287_v20 }
0x1134   : > { %v4997_v6 = vmul.f32 %v11209_v4, %v11205_v52  ;;  %v5098_v21 = vpop.permute.xlu0 %5097 }
0x1136   : > { %v4999_v9 = vpack.c.bf16 %v4997_v6, %v4997_v6 }
0x1137   : > { %v11211_v10 = vpop.eup %11210 }
0x1138   : > { %v4998_v11 = vmul.f32 %v11211_v10, %v11207_v56  ;;  %10596 = vmatmul.mubr.msk.bf16.vlgmr.msra.gmra.mrb[32].mxu0 %vm4077_vm11, %v4999_v9 }
0x1139   : > { %10607 = vmatprep.mubr.msk.bf16.mxu0 %vm11288_vm8, %v11287_v20 }
0x113a   : > { %v5000_v18 = vpack.c.bf16 %v4998_v11, %v4998_v11 }
0x113b   : > { %10606 = vmatpush3.bf16.xpose.msra.mxu0 %v5105_v17 }
0x113c   : > { %10602 = vmatmul.mubr.msk.bf16.vlgmr.msra.gmra.mrb[48].mxu1 %vm4077_vm11, %v5000_v18  ;;  %10617 = vmatprep.subr.bf16.mxu0 %v11287_v20 }
0x113d   : > { %10612 = vmatpush3.bf16.xpose.msra.mxu1 %v5155_v19  ;;  %10613 = vmatprep.mubr.msk.bf16.mxu1 %vm11288_vm8, %v11287_v20 }
0x113e   : > { %10623 = vmatprep.subr.bf16.mxu1 %v11287_v20 }
0x1142   : > { %10608 = vmatmul.mubr.msk.bf16.vlgmr.msra.gmra.mrb[36].mxu0 %vm3980_vm9, %v5098_v21 }
0x1143   : > { %10619 = vmatprep.mubr.msk.bf16.mxu0 %vm11288_vm8, %v11287_v20 }
0x1144   : > { %10614 = vmatmul.mubr.msk.bf16.vlgmr.msra.gmra.mrb[52].mxu1 %vm3980_vm9, %v5148_v22 }
0x1145   : > { %10625 = vmatprep.mubr.msk.bf16.mxu1 %vm11288_vm8, %v11287_v20 }
0x120b   : > { %v12685_v23 = vpop.f32.mrb[32].mxu0 }
0x120c   : > { %v10597_v24 = vpop.f32.mrb[33].mxu0 }
0x120d   : > { %v5046_v26 = vpop.f32.mrb[34].mxu0 }
0x120e   : > { %v10598_v27 = vpop.f32.mrb[35].mxu0 }
0x120f   : > { %v12687_v30 = vpop.f32.mrb[48].mxu1 }
0x1210   : > { %v10984_v31 = vpack.i.bf16 %v12687_v30, %v12685_v23  ;;  %v10603_v45 = vpop.f32.mrb[49].mxu1 }
0x1211   : > { %v5094_v12 = vpop.f32.mrb[50].mxu1 }
0x1212   : > { %v10604_v13 = vpop.f32.mrb[51].mxu1 }
0x1215   : > { %v5141_v35 = vpop.f32.mrb[36].mxu0 }
0x1216   : > { %v5197_v37 = vmul.f32 0.25, %v5141_v35  ;;  %v10609_v39 = vpop.f32.mrb[37].mxu0 }
0x1217   : > { %v5144_v40 = vpop.f32.mrb[38].mxu0  ;;  %v5191_v41 = vpop.f32.mrb[52].mxu1 }
0x1218   : > { %v5198_v44 = vmul.f32 0.25, %v5191_v41  ;;  %v10610_v46 = vpop.f32.mrb[39].mxu0  ;;  %v10615_v49 = vpop.f32.mrb[53].mxu1  ;;  %v5199_v50 = vadd.f32 %v5197_v37, %v12471_v33 }
0x1219   : > { %v5194_v51 = vpop.f32.mrb[54].mxu1 }
0x121a   : > { %v10616_v52 = vpop.f32.mrb[55].mxu1  ;;  %v5201_v53 = vsel %vm4077_vm11, %v5199_v50, -inf  ;;  %v5200_v56 = vadd.f32 %v5198_v44, %v12476_v8 }
0x121b   : > { %5202 = vmax.xlane.f32.xlu0 %v5201_v53 }
0x121c   : > { %v5204_v57 = vsel %vm4077_vm11, %v5200_v56, -inf }
0x121d   : > { %5205 = vmax.xlane.f32.xlu1 %v5204_v57 }
0x122e   : > { %5273 = vrot.lane.b32.xlu1 %v12492_v36, %s11294_s0 }
0x1232   : > { %5323 = vrot.lane.b32.xlu1 %v12435_v38, %s11295_s2 }
0x1236   : > { %5373 = vrot.lane.b32.xlu1 %v12440_v42, %s11295_s2 }
0x123a   : > { %5371 = vrot.lane.b32.xlu1 %v12451_v47, %s11295_s2 }
0x12a8   : > { %v5203_v58 = vpop.xlane.xlu0 %5202 }
0x12a9   : > { %v5207_v62 = vsub.f32 %v5199_v50, %v5203_v58 }
0x12aa   : > { %v5206_v25 = vpop.xlane.xlu1 %5205 }
0x12ab   : > { %v5209_v0 = vmul.f32 1.442695, %v5207_v62  ;;  %v5208_v4 = vsub.f32 %v5200_v56, %v5206_v25 }
0x12ad   : > { %11212 = vpow2.f32 %v5209_v0  ;;  %v5211_v5 = vmul.f32 1.442695, %v5208_v4 }
0x12ae   : > { %v5274_v6 = vpop.permute.xlu1 %5273 }
0x12af   : > { %11214 = vpow2.f32 %v5211_v5  ;;  %v5279_v9 = vsel %vm4105_vm10, %v5274_v6, 0 }
0x12b0   : > { %10624 = vmatpush3.bf16.msra.mxu1 %v5279_v9 }
0x12b1   : > { %10635 = vmatprep.subr.bf16.mxu1 %v11287_v20 }
0x12b2   : > { %v5324_v26 = vpop.permute.xlu1 %5323 }
0x12b3   : > { %v5329_v37 = vsel %vm3980_vm9, %v5324_v26, 0 }
0x12b6   : > { %v5374_v35 = vpop.permute.xlu1 %5373 }
0x12b7   : > { %v11213_v10 = vpop.eup %11212  ;;  %v5379_v40 = vsel %vm3980_vm9, %v5374_v35, 0 }
0x12b8   : > { %v5213_v11 = vsel %vm4077_vm11, %v11213_v10, 0.0 }
0x12b9   : > { %v11215_v16 = vpop.eup %11214  ;;  %5214 = vadd.xlane.f32.xlu0 %v5213_v11 }
0x12ba   : > { %v5216_v17 = vsel %vm4077_vm11, %v11215_v16, 0.0  ;;  %v5372_v44 = vpop.permute.xlu1 %5371 }
0x12bd   : > { %5217 = vadd.xlane.f32.xlu0 %v5216_v17 }
0x12d3   : > { %5225 = vrot.lane.b32.xlu0 %v12461_v54, %s11294_s0 }
0x12d7   : > { %5321 = vrot.lane.b32.xlu0 %v12442_v43, %s11295_s2 }
0x1346   : > { %v5215_v18 = vpop.xlane.xlu0 %5214 }
0x1347   : > { %11216 = vrcp.f32 %v5215_v18 }
0x134a   : > { %v5218_v19 = vpop.xlane.xlu0 %5217 }
0x134b   : > { %11218 = vrcp.f32 %v5218_v19 }
0x134e   : > { %v5226_v21 = vpop.permute.xlu0 %5225 }
0x134f   : > { %v5231_v22 = vsel %vm4105_vm10, %v5226_v21, 0 }
0x1350   : > { %10618 = vmatpush3.bf16.msra.mxu0 %v5231_v22 }
0x1351   : > { %v11217_v24 = vpop.eup %11216  ;;  %10629 = vmatprep.subr.bf16.mxu0 %v11287_v20 }
0x1352   : > { %v5221_v27 = vmul.f32 %v11217_v24, %v11213_v10  ;;  %v5322_v41 = vpop.permute.xlu0 %5321 }
0x1354   : > { %v5223_v45 = vpack.c.bf16 %v5221_v27, %v5221_v27 }
0x1355   : > { %v11219_v12 = vpop.eup %11218 }
0x1356   : > { %v5222_v13 = vmul.f32 %v11219_v12, %v11215_v16  ;;  %10620 = vmatmul.mubr.msk.bf16.vlgmr.msra.gmra.mrb[40].mxu0 %vm4077_vm11, %v5223_v45 }
0x1357   : > { %10631 = vmatprep.mubr.msk.bf16.mxu0 %vm11288_vm8, %v11287_v20 }
0x1358   : > { %v5224_v39 = vpack.c.bf16 %v5222_v13, %v5222_v13 }
0x1359   : > { %10630 = vmatpush3.bf16.xpose.msra.mxu0 %v5329_v37 }
0x135a   : > { %10626 = vmatmul.mubr.msk.bf16.vlgmr.msra.gmra.mrb[56].mxu1 %vm4077_vm11, %v5224_v39  ;;  %10641 = vmatprep.subr.bf16.mxu0 %v11287_v20 }
0x135b   : > { %10636 = vmatpush3.bf16.xpose.msra.mxu1 %v5379_v40  ;;  %10637 = vmatprep.mubr.msk.bf16.mxu1 %vm11288_vm8, %v11287_v20 }
0x135c   : > { %10647 = vmatprep.subr.bf16.mxu1 %v11287_v20 }
0x1360   : > { %10632 = vmatmul.mubr.msk.bf16.vlgmr.msra.gmra.mrb[44].mxu0 %vm3980_vm9, %v5322_v41 }
0x1361   : > { %10643 = vmatprep.mubr.msk.bf16.mxu0 %vm11288_vm8, %v11287_v20 }
0x1362   : > { %10638 = vmatmul.mubr.msk.bf16.vlgmr.msra.gmra.mrb[60].mxu1 %vm3980_vm9, %v5372_v44 }
0x1363   : > { %10649 = vmatprep.mubr.msk.bf16.mxu1 %vm11288_vm8, %v11287_v20 }
0x1429   : > { %v12729_v46 = vpop.f32.mrb[40].mxu0 }
0x142a   : > { %v10621_v49 = vpop.f32.mrb[41].mxu0 }
0x142b   : > { %v5270_v50 = vpop.f32.mrb[42].mxu0 }
0x142c   : > { %v10622_v51 = vpop.f32.mrb[43].mxu0 }
0x142d   : > { %v12731_v52 = vpop.f32.mrb[56].mxu1 }
0x142e   : > { %v10989_v53 = vpack.i.bf16 %v12731_v52, %v12729_v46  ;;  %v10627_v56 = vpop.f32.mrb[57].mxu1 }
0x142f   : > { %v5318_v57 = vpop.f32.mrb[58].mxu1 }
0x1430   : > { %v10628_v58 = vpop.f32.mrb[59].mxu1 }
0x1433   : > { %v5365_v62 = vpop.f32.mrb[44].mxu0 }
0x1434   : > { %v5421_v25 = vmul.f32 0.25, %v5365_v62  ;;  %v10633_v0 = vpop.f32.mrb[45].mxu0 }
0x1435   : > { %v5368_v4 = vpop.f32.mrb[46].mxu0  ;;  %v5415_v5 = vpop.f32.mrb[60].mxu1 }
0x1436   : > { %v5422_v6 = vmul.f32 0.25, %v5415_v5  ;;  %v10634_v9 = vpop.f32.mrb[47].mxu0  ;;  %v10639_v10 = vpop.f32.mrb[61].mxu1  ;;  %v5423_v11 = vadd.f32 %v5421_v25, %v12471_v33 }
0x1437   : > { %v5418_v16 = vpop.f32.mrb[62].mxu1 }
0x1438   : > { %v10640_v17 = vpop.f32.mrb[63].mxu1  ;;  %v5425_v18 = vsel %vm4077_vm11, %v5423_v11, -inf  ;;  %v5424_v19 = vadd.f32 %v5422_v6, %v12476_v8 }
0x1439   : > { %5426 = vmax.xlane.f32.xlu0 %v5425_v18 }
0x143a   : > { %v5428_v21 = vsel %vm4077_vm11, %v5424_v19, -inf }
0x143b   : > { %5429 = vmax.xlane.f32.xlu1 %v5428_v21 }
0x144c   : > { %5497 = vrot.lane.b32.xlu1 %v12492_v36, %s11295_s2 }
0x1450   : > { %5547 = vrot.lane.b32.xlu1 %v12435_v38, %s11296_s24 }
0x1454   : > { %5597 = vrot.lane.b32.xlu1 %v12440_v42, %s11296_s24 }
0x1458   : > { %5595 = vrot.lane.b32.xlu1 %v12451_v47, %s11296_s24 }
0x14c6   : > { %v5427_v22 = vpop.xlane.xlu0 %5426 }
0x14c7   : > { %v5431_v24 = vsub.f32 %v5423_v11, %v5427_v22 }
0x14c8   : > { %v5430_v26 = vpop.xlane.xlu1 %5429 }
0x14c9   : > { %v5433_v27 = vmul.f32 1.442695, %v5431_v24  ;;  %v5432_v45 = vsub.f32 %v5424_v19, %v5430_v26 }
0x14cb   : > { %11220 = vpow2.f32 %v5433_v27  ;;  %v5435_v12 = vmul.f32 1.442695, %v5432_v45 }
0x14cc   : > { %v5498_v13 = vpop.permute.xlu1 %5497 }
0x14cd   : > { %11222 = vpow2.f32 %v5435_v12  ;;  %v5503_v35 = vsel %vm4105_vm10, %v5498_v13, 0 }
0x14ce   : > { %10648 = vmatpush3.bf16.msra.mxu1 %v5503_v35 }
0x14cf   : > { %10659 = vmatprep.subr.bf16.mxu1 %v11287_v20 }
0x14d0   : > { %v5548_v50 = vpop.permute.xlu1 %5547 }
0x14d4   : > { %v5598_v62 = vpop.permute.xlu1 %5597 }
0x14d5   : > { %v11221_v38 = vpop.eup %11220  ;;  %v5603_v0 = vsel %vm3980_vm9, %v5598_v62, 0  ;;  %v11041_v62 = vld [vmem:[%s11415_s21 + $0x28] sm:$0xff]  }
0x14d6   : > { %v5437_v42 = vsel %vm4077_vm11, %v11221_v38, 0.0 }
0x14d7   : > { %v11223_v37 = vpop.eup %11222  ;;  %5438 = vadd.xlane.f32.xlu0 %v5437_v42 }
0x14d8   : > { %v5440_v47 = vsel %vm4077_vm11, %v11223_v37, 0.0  ;;  %v5596_v5 = vpop.permute.xlu1 %5595 }
0x14db   : > { %5441 = vadd.xlane.f32.xlu0 %v5440_v47 }
0x14f1   : > { %5449 = vrot.lane.b32.xlu0 %v12461_v54, %s11295_s2 }
0x14f5   : > { %5545 = vrot.lane.b32.xlu0 %v12442_v43, %s11296_s24  ;;  %v5553_v43 = vsel %vm3980_vm9, %v5548_v50, 0 }
0x1564   : > { %v5439_v39 = vpop.xlane.xlu0 %5438 }
0x1565   : > { %11224 = vrcp.f32 %v5439_v39 }
0x1568   : > { %v5442_v40 = vpop.xlane.xlu0 %5441 }
0x1569   : > { %11226 = vrcp.f32 %v5442_v40 }
0x156c   : > { %v5450_v41 = vpop.permute.xlu0 %5449 }
0x156d   : > { %v5455_v44 = vsel %vm4105_vm10, %v5450_v41, 0 }
0x156e   : > { %10642 = vmatpush3.bf16.msra.mxu0 %v5455_v44 }
0x156f   : > { %v11225_v49 = vpop.eup %11224  ;;  %10653 = vmatprep.subr.bf16.mxu0 %v11287_v20 }
0x1570   : > { %v5445_v51 = vmul.f32 %v11225_v49, %v11221_v38  ;;  %v5546_v4 = vpop.permute.xlu0 %5545 }
0x1572   : > { %v5447_v56 = vpack.c.bf16 %v5445_v51, %v5445_v51  ;;  %v11037_v51 = vld [vmem:[%s11415_s21 + $0x8] sm:$0xff]  }
0x1573   : > { %v11227_v57 = vpop.eup %11226 }
0x1574   : > { %v5446_v58 = vmul.f32 %v11227_v57, %v11223_v37  ;;  %10644 = vmatmul.mubr.msk.bf16.vlgmr.msra.gmra.mrb[48].mxu0 %vm4077_vm11, %v5447_v56  ;;  %v11038_v56 = vld [vmem:[%s11415_s21 + $0x10] sm:$0xff]   ;;  %v11039_v57 = vld [vmem:[%s11415_s21 + $0x18] sm:$0xff]  }
0x1575   : > { %10655 = vmatprep.mubr.msk.bf16.mxu0 %vm11288_vm8, %v11287_v20 }
0x1576   : > { %v5448_v25 = vpack.c.bf16 %v5446_v58, %v5446_v58  ;;  %v11040_v58 = vld [vmem:[%s11415_s21 + $0x20] sm:$0xff]  }
0x1577   : > { %10654 = vmatpush3.bf16.xpose.msra.mxu0 %v5553_v43  ;;  %v11042_v43 = vld [vmem:[%s11415_s21 + $0x30] sm:$0xff]  }
0x1578   : > { %10650 = vmatmul.mubr.msk.bf16.vlgmr.msra.gmra.mrb[64].mxu1 %vm4077_vm11, %v5448_v25  ;;  %10665 = vmatprep.subr.bf16.mxu0 %v11287_v20  ;;  %v11043_v25 = vld [vmem:[%s11415_s21 + $0x38] sm:$0xff]  }
0x1579   : > { %10660 = vmatpush3.bf16.xpose.msra.mxu1 %v5603_v0  ;;  %10661 = vmatprep.mubr.msk.bf16.mxu1 %vm11288_vm8, %v11287_v20 }
0x157a   : > { %10671 = vmatprep.subr.bf16.mxu1 %v11287_v20 }
0x157e   : > { %10656 = vmatmul.mubr.msk.bf16.vlgmr.msra.gmra.mrb[52].mxu0 %vm3980_vm9, %v5546_v4 }
0x157f   : > { %10667 = vmatprep.mubr.msk.bf16.mxu0 %vm11288_vm8, %v11287_v20 }
0x1580   : > { %10662 = vmatmul.mubr.msk.bf16.vlgmr.msra.gmra.mrb[68].mxu1 %vm3980_vm9, %v5596_v5 }
0x1581   : > { %10673 = vmatprep.mubr.msk.bf16.mxu1 %vm11288_vm8, %v11287_v20 }
0x1647   : > { %v5491_v6 = vpop.f32.mrb[48].mxu0 }
0x1648   : > { %v10645_v9 = vpop.f32.mrb[49].mxu0 }
0x1649   : > { %v5494_v10 = vpop.f32.mrb[50].mxu0 }
0x164a   : > { %v10646_v11 = vpop.f32.mrb[51].mxu0 }
0x164b   : > { %v5539_v16 = vpop.f32.mrb[64].mxu1 }
0x164c   : > { %v10994_v17 = vpack.i.bf16 %v5539_v16, %v5491_v6  ;;  %v10651_v18 = vpop.f32.mrb[65].mxu1 }
0x164d   : > { %v5542_v19 = vpop.f32.mrb[66].mxu1 }
0x164e   : > { %v10652_v21 = vpop.f32.mrb[67].mxu1 }
0x1651   : > { %v5589_v22 = vpop.f32.mrb[52].mxu0 }
0x1652   : > { %v5645_v24 = vmul.f32 0.25, %v5589_v22  ;;  %v10657_v26 = vpop.f32.mrb[53].mxu0 }
0x1653   : > { %v5592_v27 = vpop.f32.mrb[54].mxu0  ;;  %v5639_v45 = vpop.f32.mrb[68].mxu1 }
0x1654   : > { %v5646_v12 = vmul.f32 0.25, %v5639_v45  ;;  %v10658_v13 = vpop.f32.mrb[55].mxu0  ;;  %v10663_v35 = vpop.f32.mrb[69].mxu1  ;;  %v5647_v38 = vadd.f32 %v5645_v24, %v12471_v33 }
0x1655   : > { %v5642_v42 = vpop.f32.mrb[70].mxu1 }
0x1656   : > { %v10664_v37 = vpop.f32.mrb[71].mxu1  ;;  %v5649_v47 = vsel %vm4077_vm11, %v5647_v38, -inf  ;;  %v5648_v39 = vadd.f32 %v5646_v12, %v12476_v8 }
0x1657   : > { %5650 = vmax.xlane.f32.xlu0 %v5649_v47 }
0x1658   : > { %v5652_v40 = vsel %vm4077_vm11, %v5648_v39, -inf }
0x1659   : > { %5653 = vmax.xlane.f32.xlu1 %v5652_v40 }
0x166a   : > { %5721 = vrot.lane.b32.xlu1 %v12492_v36, %s11296_s24 }
0x166e   : > { %10970 = vrot.lane.b32.xlu1 %v10969_v60, %s11296_s24 }
0x1672   : > { %10975 = vrot.lane.b32.xlu1 %v10974_v3, %s11295_s2 }
0x1676   : > { %10985 = vrot.lane.b32.xlu1 %v10984_v31, %s11293_s1  ;;  %s13284_s1 = scalar_lea.vmem %s13248_s16, %s11407_s29 }
0x167a   : > { %10995 = vrot.lane.b32.xlu1 %v10994_v17, %s11291_s12 }
0x16e4   : > { %v5651_v33 = vpop.xlane.xlu0 %5650 }
0x16e5   : > { %v5655_v8 = vsub.f32 %v5647_v38, %v5651_v33 }
0x16e6   : > { %v5654_v36 = vpop.xlane.xlu1 %5653 }
0x16e7   : > { %v5657_v41 = vmul.f32 1.442695, %v5655_v8  ;;  %v5656_v44 = vsub.f32 %v5648_v39, %v5654_v36 }
0x16e9   : > { %11228 = vpow2.f32 %v5657_v41  ;;  %v5659_v34 = vmul.f32 1.442695, %v5656_v44 }
0x16ea   : > { %v5722_v59 = vpop.permute.xlu1 %5721 }
0x16eb   : > { %11230 = vpow2.f32 %v5659_v34  ;;  %v5727_v60 = vsel %vm4105_vm10, %v5722_v59, 0 }
0x16ec   : > { %10672 = vmatpush3.bf16.msra.mxu1 %v5727_v60 }
0x16ee   : > { %v10971_v18 = vpop.permute.xlu1 %10970 }
0x16ef   : > { %v10973_v22 = vunpack.i.h.bf16 %v10971_v18  ;;  %v10972_v24 = vunpack.i.l.bf16 %v10971_v18  ;;  %v6027_v18 = vld [vmem:[%s11443_s6 + $0xc8] sm:$0xff] }
0x16f1   : > { %v5826_v35 = vsel %vm3980_vm9, %v12515_v1, %v10973_v22  ;;  %v5825_v38 = vsel %vm3980_vm9, %v12511_v55, %v10972_v24 }
0x16f2   : > { %v10976_v19 = vpop.permute.xlu1 %10975 }
0x16f3   : > { %v11229_v61 = vpop.eup %11228  ;;  %v10978_v26 = vunpack.i.h.bf16 %v10976_v19 }
0x16f4   : > { %v5661_v2 = vsel %vm4077_vm11, %v11229_v61, 0.0 }
0x16f5   : > { %v11231_v3 = vpop.eup %11230  ;;  %5662 = vadd.xlane.f32.xlu0 %v5661_v2  ;;  %v5829_v37 = vsel %vm5827_vm12, %v5826_v35, %v10978_v26 }
0x16f6   : > { %v5664_v23 = vsel %vm4077_vm11, %v11231_v3, 0.0  ;;  %v10986_v27 = vpop.permute.xlu1 %10985 }
0x16f7   : > { %v10988_v8 = vunpack.i.h.bf16 %v10986_v27  ;;  %v10987_v36 = vunpack.i.l.bf16 %v10986_v27 }
0x16f9   : > { %5665 = vadd.xlane.f32.xlu0 %v5664_v23 }
0x16fa   : > { %v10996_v41 = vpop.permute.xlu1 %10995 }
0x16fb   : > { %v10998_v1 = vunpack.i.h.bf16 %v10996_v41 }
0x170f   : > { %5673 = vrot.lane.b32.xlu0 %v12461_v54, %s11296_s24  ;;  %s13285_s24 = scalar_lea.vmem %s13249_s17, %s11407_s29 }
0x1713   : > { %10980 = vrot.lane.b32.xlu0 %v10979_v15, %s11294_s0 }
0x1717   : > { %10990 = vrot.lane.b32.xlu0 %v10989_v53, %s11292_s7  ;;  %v11036_v53 = vld [vmem:[%s11415_s21] sm:$0xff]   ;;  %s13283_s7 = scalar_lea.vmem %s13243_s11, %s11407_s29  ;;  %s11297_s21 = smov [#allocation2]  }
0x1718   : > { %s8655_s22 = sshll.u32 %s11297_s21, 4  ;;  %s8656_s22 = int_to_ptr.vmem [resolvable:$true] %s8655_s22 }
0x1719   : > { %p11253_p9 = scmp.lt.s32.totalorder %s8656_s22, %s8656_s22 }
0x1782   : > { %v5663_v30 = vpop.xlane.xlu0 %5662 }
0x1783   : > { %11232 = vrcp.f32 %v5663_v30 }
0x1786   : > { %v5666_v31 = vpop.xlane.xlu0 %5665 }
0x1787   : > { %11234 = vrcp.f32 %v5666_v31 }
0x178a   : > { %v5674_v49 = vpop.permute.xlu0 %5673 }
0x178b   : > { %v5679_v50 = vsel %vm4105_vm10, %v5674_v49, 0 }
0x178c   : > { %10666 = vmatpush3.bf16.msra.mxu0 %v5679_v50 }
0x178d   : > { %v11233_v54 = vpop.eup %11232  ;;  %10677 = vmatprep.subr.bf16.mxu0 %v11287_v20 }
0x178e   : > { %v5669_v7 = vmul.f32 %v11233_v54, %v11229_v61  ;;  %v10981_v21 = vpop.permute.xlu0 %10980  ;;  %v10997_v61 = vunpack.i.l.bf16 %v10996_v41  ;;  %v9492_v54 = vld [vmem:[%s13281_s27] ss:$0 sm:$0xff]  ;;  %s11246_s27 = scalar_lea.vmem %s8656_s22, 256 }
0x178f   : > { %v10983_v45 = vunpack.i.h.bf16 %v10981_v21  ;;  %v10982_v12 = vunpack.i.l.bf16 %v10981_v21  ;;  %v6058_v41 = vld [vmem:[%s11443_s6 + $0x1c0] sm:$0xff]  ;;  %p11247_p6 = scmp.ne.s32.totalorder %s8656_s22, %s11246_s27  ;;  %p11254_p10 = scmp.lt.s32.totalorder %s11246_s27, %s11246_s27 }
0x1790   : > { %v5671_v14 = vpack.c.bf16 %v5669_v7, %v5669_v7 }
0x1791   : > { %v11235_v15 = vpop.eup %11234  ;;  %v5832_v39 = vsel %vm5830_vm13, %v5829_v37, %v10983_v45  ;;  %v6035_v37 = vld [vmem:[%s11443_s6 + $0x108] sm:$0xff]  ;;  %p11248_p7 = pnand %p11247_p6, %p10703_p5  ;;  %p11255_p11 = por %p11254_p10, %p11253_p9 }
0x1792   : > { %v5670_v46 = vmul.f32 %v11235_v15, %v11231_v3  ;;  %10668 = vmatmul.mubr.msk.bf16.vlgmr.msra.gmra.mrb[56].mxu0 %vm4077_vm11, %v5671_v14  ;;  %v10991_v13 = vpop.permute.xlu0 %10990  ;;  %v5835_v34 = vsel %vm5833_vm14, %v5832_v39, %v10988_v8  ;;  %v6043_v39 = vld [vmem:[%s11443_s6 + $0x148] sm:$0xff] }
0x1793   : > { %10693 = vmatprep.mubr.msk.bf16.mxu0 %vm11288_vm8, %v11287_v20  ;;  %10678 = vmatpush3.bf16.msra.mxu0 %v11036_v53  ;;  %v10993_v40 = vunpack.i.h.bf16 %v10991_v13  ;;  %v10992_v33 = vunpack.i.l.bf16 %v10991_v13  ;;  %v9538_v8 = vcombine.high %v6035_v37, %v6043_v39  ;;  %p11249_p8 = pneg %p11248_p7 }
0x1794   : > { %v5672_v52 = vpack.c.bf16 %v5670_v46, %v5670_v46  ;;  %10679 = vmatprep.subr.bf16.mxu0 %v11287_v20 }
0x1795   : > { %v5838_v60 = vsel %vm5836_vm15, %v5835_v34, %v10993_v40  ;;  %p11256_p12 = pnand %p11255_p11, %p11249_p8 }
0x1796   : > { %10674 = vmatmul.mubr.msk.bf16.vlgmr.msra.gmra.mrb[72].mxu1 %vm4077_vm11, %v5672_v52  ;;  %v5841_v30 = vsel %vm5839_vm0, %v5838_v60, %v10998_v1 }
0x1797   : > { %6886 = vmatprep.mubr.bf16.mxu1 %v11286_v63  ;;  %10680 = vmatpush3.bf16.msra.mxu0 %v11037_v51  ;;  %v11244_v51 = vld [vmem:[#allocation2] sm:$0xff] }
0x1798   : > { %10681 = vmatprep.subr.bf16.mxu0 %v11287_v20 }
0x179b   : > { %10682 = vmatpush3.bf16.msra.mxu0 %v11038_v56 }
0x179c   : > { %10683 = vmatprep.subr.bf16.mxu0 %v11287_v20 }
0x179f   : > { %10684 = vmatpush3.bf16.msra.mxu0 %v11039_v57  ;;  %v11245_v57 = vld [vmem:[#allocation2 + $0x8] sm:$0xff] }
0x17a0   : > { %10685 = vmatprep.subr.bf16.mxu0 %v11287_v20 }
0x17a3   : > { %10686 = vmatpush3.bf16.msra.mxu0 %v11040_v58 }
0x17a4   : > { %10687 = vmatprep.subr.bf16.mxu0 %v11287_v20 }
0x17a7   : > { %10688 = vmatpush3.bf16.msra.mxu0 %v11041_v62  ;;  %v6002_v62 = vld [vmem:[%s11443_s6] sm:$0xff] }
0x17a8   : > { %10689 = vmatprep.subr.bf16.mxu0 %v11287_v20 }
0x17ab   : > { %10690 = vmatpush3.bf16.msra.mxu0 %v11042_v43  ;;  %v6010_v43 = vld [vmem:[%s11443_s6 + $0x40] sm:$0xff] }
0x17ac   : > { %10691 = vmatprep.subr.bf16.mxu0 %v11287_v20  ;;  %v10977_v20 = vunpack.i.l.bf16 %v10976_v19 }
0x17ae   : > { %v5828_v42 = vsel %vm5827_vm12, %v5825_v38, %v10977_v20  ;;  %v6034_v38 = vld [vmem:[%s11443_s6 + $0x100] sm:$0xff] }
0x17af   : > { %10692 = vmatpush3.bf16.msra.mxu0 %v11043_v25  ;;  %v5831_v47 = vsel %vm5830_vm13, %v5828_v42, %v10982_v12  ;;  %v6003_v25 = vld [vmem:[%s11443_s6 + $0x8] sm:$0xff]  ;;  %v6042_v42 = vld [vmem:[%s11443_s6 + $0x140] sm:$0xff] }
0x17b0   : > { %v5834_v44 = vsel %vm5833_vm14, %v5831_v47, %v10987_v36  ;;  %v9536_v47 = vcombine.high %v6034_v38, %v6042_v42  ;;  %v9535_v40 = vcombine.low %v6034_v38, %v6042_v42  ;;  %v6050_v36 = vld [vmem:[%s11443_s6 + $0x180] sm:$0xff] }
0x17b1   : > { %v5837_v59 = vsel %vm5836_vm15, %v5834_v44, %v10992_v33  ;;  %v9537_v33 = vcombine.low %v6035_v37, %v6043_v39  ;;  %v6051_v44 = vld [vmem:[%s11443_s6 + $0x188] sm:$0xff]  ;;  %v9552_v34 = vcombine.high %v6050_v36, %v6058_v41  ;;  %v9551_v60 = vcombine.low %v6050_v36, %v6058_v41 }
0x17b2   : > { %v5840_v23 = vsel %vm5839_vm0, %v5837_v59, %v10997_v61  ;;  %v6059_v59 = vld [vmem:[%s11443_s6 + $0x1c8] sm:$0xff] }
0x17b3   : > { %v9553_v1 = vcombine.low %v6051_v44, %v6059_v59  ;;  %v9554_v61 = vcombine.high %v6051_v44, %v6059_v59 }
0x1865   : > { %v5715_v0 = vpop.f32.mrb[56].mxu0 }
0x1866   : > { %v10669_v4 = vpop.f32.mrb[57].mxu0 }
0x1867   : > { %v5718_v5 = vpop.f32.mrb[58].mxu0  ;;  %v9504_v4 = vcombine.high %v6002_v62, %v6010_v43 }
0x1868   : > { %v10670_v6 = vpop.f32.mrb[59].mxu0  ;;  %v6011_v5 = vld [vmem:[%s11443_s6 + $0x48] sm:$0xff] }
0x1869   : > { %v5763_v9 = vpop.f32.mrb[72].mxu1  ;;  %v6018_v6 = vld [vmem:[%s11443_s6 + $0x80] sm:$0xff]  ;;  %6854 = vmatprep.subr.bf16.mxu1 %v9504_v4 }
0x186a   : > { %v10999_v10 = vpack.i.bf16 %v5763_v9, %v5715_v0  ;;  %v10675_v11 = vpop.f32.mrb[73].mxu1  ;;  %v9503_v0 = vcombine.low %v6002_v62, %v6010_v43  ;;  %v6026_v9 = vld [vmem:[%s11443_s6 + $0xc0] sm:$0xff]  ;;  %v6107_v43 = vld [vmem:[%s11443_s6 + $0x348] sm:$0xff] }
0x186b   : > { %v5766_v16 = vpop.f32.mrb[74].mxu1  ;;  %v9506_v11 = vcombine.high %v6003_v25, %v6011_v5  ;;  %v9519_v21 = vcombine.low %v6018_v6, %v6026_v9 }
0x186c   : > { %11000 = vrot.lane.b32.xlu0 %v10999_v10, %s11290_s8  ;;  %v10676_v17 = vpop.f32.mrb[75].mxu1  ;;  %v9505_v10 = vcombine.low %v6003_v25, %v6011_v5  ;;  %v9520_v16 = vcombine.high %v6018_v6, %v6026_v9  ;;  %6855 = vmatpush1.bf16.msra.mxu1 %v9503_v0  ;;  %v6114_v5 = vld [vmem:[%s11443_s6 + $0x380] sm:$0xff]  ;;  %v6115_v9 = vld [vmem:[%s11443_s6 + $0x388] sm:$0xff] }
0x186d   : > { %v6019_v17 = vld [vmem:[%s11443_s6 + $0x88] sm:$0xff]  ;;  %6897 = vmatprep.subr.bf16.mxu0 %v9506_v11  ;;  %v6122_v6 = vld [vmem:[%s11443_s6 + $0x3c0] sm:$0xff] }
0x186e   : > { %v9522_v19 = vcombine.high %v6019_v17, %v6027_v18  ;;  %6856 = vmatprep.subr.bf16.mxu1 %v9520_v16  ;;  %v9521_v22 = vcombine.low %v6019_v17, %v6027_v18  ;;  %v6123_v11 = vld [vmem:[%s11443_s6 + $0x3c8] sm:$0xff]  ;;  %v9615_v16 = vcombine.low %v6114_v5, %v6122_v6 }
0x186f   : > { %v9617_v17 = vcombine.low %v6115_v9, %v6123_v11  ;;  %v9618_v18 = vcombine.high %v6115_v9, %v6123_v11  ;;  %v6084_v11 = vld [vmem:[%s11443_s6 + $0x290] sm:$0xff] }
0x1870   : > { %6857 = vmatpush1.bf16.msra.mxu1 %v9519_v21  ;;  %v6012_v21 = vld [vmem:[%s11443_s6 + $0x50] sm:$0xff] }
0x1871   : > { %6858 = vmatprep.subr.bf16.mxu1 %v9536_v47 }
0x1874   : > { %6859 = vmatpush1.bf16.msra.mxu1 %v9535_v40 }
0x1875   : > { %6860 = vmatprep.subr.bf16.mxu1 %v9552_v34  ;;  %v9502_v34 = vld [vmem:[%s13283_s7] ss:$0 sm:$0xff] }
0x1878   : > { %6861 = vmatpush1.bf16.msra.mxu1 %v9551_v60  ;;  %v6028_v60 = vld [vmem:[%s11443_s6 + $0xd0] sm:$0xff] }
0x18de   : > { %v11001_v55 = vpop.permute.xlu0 %11000 }
0x18df   : > { %v11003_v2 = vunpack.i.h.bf16 %v11001_v55  ;;  %v11002_v3 = vunpack.i.l.bf16 %v11001_v55  ;;  %v6066_v55 = vld [vmem:[%s11443_s6 + $0x200] sm:$0xff] }
0x18e1   : > { %v5844_v31 = vsel %vm5842_vm1, %v5841_v30, %v11003_v2  ;;  %v5843_v49 = vsel %vm5842_vm1, %v5840_v23, %v11002_v3  ;;  %v6074_v2 = vld [vmem:[%s11443_s6 + $0x240] sm:$0xff]  ;;  %v6067_v3 = vld [vmem:[%s11443_s6 + $0x208] sm:$0xff] }
0x18e2   : > { %v5845_v50 = vpack.c.bf16 %v5844_v31, %v5843_v49  ;;  %v9568_v23 = vcombine.high %v6066_v55, %v6074_v2  ;;  %v6075_v30 = vld [vmem:[%s11443_s6 + $0x248] sm:$0xff]  ;;  %v9567_v31 = vcombine.low %v6066_v55, %v6074_v2 }
0x18e3   : > { %v9569_v49 = vcombine.low %v6067_v3, %v6075_v30 }
0x18e4   : > { %10694 = vmatmul.mubr.bf16.vlgmr.msra.gmra.mrb[60].mxu0 %v5845_v50  ;;  %v9570_v50 = vcombine.high %v6067_v3, %v6075_v30  ;;  %6862 = vmatprep.subr.bf16.mxu1 %v9568_v23  ;;  %v6036_v30 = vld [vmem:[%s11443_s6 + $0x110] sm:$0xff] }
0x18e5   : > { %6929 = vmatprep.mubr.bf16.mxu0 %v11286_v63  ;;  %6898 = vmatpush1.bf16.msra.mxu0 %v9505_v10  ;;  %v9616_v10 = vcombine.high %v6114_v5, %v6122_v6 }
0x18e6   : > { %6899 = vmatprep.subr.bf16.mxu0 %v9522_v19  ;;  %6863 = vmatpush1.bf16.msra.mxu1 %v9567_v31  ;;  %v6004_v19 = vld [vmem:[%s11443_s6 + $0x10] sm:$0xff] }
0x18e7   : > { %v6044_v31 = vld [vmem:[%s11443_s6 + $0x150] sm:$0xff] }
0x18e9   : > { %6900 = vmatpush1.bf16.msra.mxu0 %v9521_v22  ;;  %v6005_v22 = vld [vmem:[%s11443_s6 + $0x18] sm:$0xff] }
0x18ea   : > { %6901 = vmatprep.subr.bf16.mxu0 %v9538_v8  ;;  %v9501_v8 = vld [vmem:[%s13282_s19] ss:$0 sm:$0xff] }
0x18ed   : > { %6902 = vmatpush1.bf16.msra.mxu0 %v9537_v33 }
0x18ee   : > { %6903 = vmatprep.subr.bf16.mxu0 %v9554_v61  ;;  %v6029_v61 = vld [vmem:[%s11443_s6 + $0xd8] sm:$0xff] }
0x18f1   : > { %6904 = vmatpush1.bf16.msra.mxu0 %v9553_v1  ;;  %v6021_v1 = vld [vmem:[%s11443_s6 + $0x98] sm:$0xff] }
0x18f2   : > { %6905 = vmatprep.subr.bf16.mxu0 %v9570_v50  ;;  %v6045_v50 = vld [vmem:[%s11443_s6 + $0x158] sm:$0xff] }
0x18f5   : > { %6906 = vmatpush1.bf16.msra.mxu0 %v9569_v49  ;;  %v6037_v49 = vld [vmem:[%s11443_s6 + $0x118] sm:$0xff] }
0x19b7   : > { %v5951_v7 = vpop.f32.mrb[60].mxu0 }
0x19b8   : > { %v5952_v14 = vadd.f32 %v9492_v54, %v5951_v7  ;;  %v10695_v15 = vpop.f32.mrb[61].mxu0  ;;  %v6090_v7 = vld [vmem:[%s11443_s6 + $0x2c0] sm:$0xff] }
0x19b9   : > { %v5954_v46 = vpop.f32.mrb[62].mxu0 }
0x19ba   : > { %v5955_v52 = vadd.f32 %v9492_v54, %v5954_v46  ;;  %v10696_v53 = vpop.f32.mrb[63].mxu0  ;;  %v5958_v56 = vadd.f32 %v11244_v51, %v5952_v14  ;;  %v6082_v54 = vld [vmem:[%s11443_s6 + $0x280] sm:$0xff]  ;;  %v6083_v14 = vld [vmem:[%s11443_s6 + $0x288] sm:$0xff] }
0x19bb   : > { %v9584_v15 = vcombine.high %v6082_v54, %v6090_v7  ;;  %v6091_v46 = vld [vmem:[%s11443_s6 + $0x2c8] sm:$0xff] }
0x19bc   : > { %5962 = vadd.xlane.f32.xlu1 %v5958_v56  ;;  %v5959_v58 = vadd.f32 %v11245_v57, %v5955_v52  ;;  %v9583_v52 = vcombine.low %v6082_v54, %v6090_v7  ;;  %v9585_v53 = vcombine.low %v6083_v14, %v6091_v46  ;;  %v9586_v51 = vcombine.high %v6083_v14, %v6091_v46  ;;  %v6106_v57 = vld [vmem:[%s11443_s6 + $0x340] sm:$0xff]  ;;  %v6052_v46 = vld [vmem:[%s11443_s6 + $0x190] sm:$0xff] }
0x19bd   : > { %6864 = vmatprep.subr.bf16.mxu1 %v9584_v15  ;;  %v9525_v7 = vcombine.low %v6021_v1, %v6029_v61  ;;  %v9540_v14 = vcombine.high %v6036_v30, %v6044_v31  ;;  %v9542_v15 = vcombine.high %v6037_v49, %v6045_v50 }
0x19be   : > { %5964 = vadd.xlane.f32.xlu0 %v5959_v58  ;;  %6907 = vmatprep.subr.bf16.mxu0 %v9586_v51  ;;  %v6061_v51 = vld [vmem:[%s11443_s6 + $0x1d8] sm:$0xff] }
0x19bf   : > { %6865 = vmatpush1.bf16.msra.mxu1 %v9583_v52  ;;  %6908 = vmatpush1.bf16.msra.mxu0 %v9585_v53  ;;  %v6060_v52 = vld [vmem:[%s11443_s6 + $0x1d0] sm:$0xff]  ;;  %v6053_v53 = vld [vmem:[%s11443_s6 + $0x198] sm:$0xff] }
0x19c0   : > { %v9555_v5 = vcombine.low %v6052_v46, %v6060_v52  ;;  %v9557_v6 = vcombine.low %v6053_v53, %v6061_v51 }
0x1a49   : > { %v5963_v24 = vpop.xlane.xlu1 %5962 }
0x1a4a   : > { %v5967_v26 = vmul.f32 0.0078125, %v5963_v24  ;;  %v9507_v24 = vcombine.low %v6004_v19, %v6012_v21 }
0x1a4b   : > { %v5965_v20 = vpop.xlane.xlu0 %5964 }
0x1a4c   : > { %v12846_v27 = vsub.f32 %v5958_v56, %v5967_v26  ;;  %v5968_v45 = vmul.f32 0.0078125, %v5965_v20  ;;  %v6098_v56 = vld [vmem:[%s11443_s6 + $0x300] sm:$0xff]  ;;  %v9508_v26 = vcombine.high %v6004_v19, %v6012_v21  ;;  %v6013_v20 = vld [vmem:[%s11443_s6 + $0x58] sm:$0xff] }
0x1a4d   : > { %v9600_v62 = vcombine.high %v6098_v56, %v6106_v57  ;;  %v9599_v25 = vcombine.low %v6098_v56, %v6106_v57  ;;  %v9539_v56 = vcombine.low %v6036_v30, %v6044_v31  ;;  %v9541_v57 = vcombine.low %v6037_v49, %v6045_v50  ;;  %v6022_v30 = vld [vmem:[%s11443_s6 + $0xa0] sm:$0xff]  ;;  %v6023_v49 = vld [vmem:[%s11443_s6 + $0xa8] sm:$0xff] }
0x1a4e   : > { %v12848_v12 = vsub.f32 %v5959_v58, %v5968_v45  ;;  %v5971_v13 = vmul.f32 %v12846_v27, %v12846_v27  ;;  %v6099_v58 = vld [vmem:[%s11443_s6 + $0x308] sm:$0xff]  ;;  %v9509_v45 = vcombine.low %v6005_v22, %v6013_v20  ;;  %v6030_v31 = vld [vmem:[%s11443_s6 + $0xe0] sm:$0xff] }
0x1a4f   : > { %v9601_v0 = vcombine.low %v6099_v58, %v6107_v43  ;;  %v9602_v4 = vcombine.high %v6099_v58, %v6107_v43  ;;  %6866 = vmatprep.subr.bf16.mxu1 %v9600_v62  ;;  %v9556_v58 = vcombine.high %v6052_v46, %v6060_v52  ;;  %v9558_v62 = vcombine.high %v6053_v53, %v6061_v51  ;;  %v6068_v43 = vld [vmem:[%s11443_s6 + $0x210] sm:$0xff]  ;;  %v6031_v50 = vld [vmem:[%s11443_s6 + $0xe8] sm:$0xff]  ;;  %v6038_v46 = vld [vmem:[%s11443_s6 + $0x120] sm:$0xff] }
0x1a50   : > { %5973 = vadd.xlane.f32.xlu0 %v5971_v13  ;;  %v5972_v35 = vmul.f32 %v12848_v12, %v12848_v12  ;;  %6867 = vmatpush1.bf16.msra.mxu1 %v9599_v25  ;;  %v9510_v13 = vcombine.high %v6005_v22, %v6013_v20  ;;  %v6076_v25 = vld [vmem:[%s11443_s6 + $0x250] sm:$0xff]  ;;  %v6046_v52 = vld [vmem:[%s11443_s6 + $0x160] sm:$0xff]  ;;  %v6039_v53 = vld [vmem:[%s11443_s6 + $0x128] sm:$0xff] }
0x1a51   : > { %6909 = vmatprep.subr.bf16.mxu0 %v9602_v4  ;;  %6868 = vmatprep.subr.bf16.mxu1 %v9616_v10  ;;  %v6077_v4 = vld [vmem:[%s11443_s6 + $0x258] sm:$0xff]  ;;  %v9572_v9 = vcombine.high %v6068_v43, %v6076_v25  ;;  %v9571_v19 = vcombine.low %v6068_v43, %v6076_v25  ;;  %v6108_v20 = vld [vmem:[%s11443_s6 + $0x350] sm:$0xff]  ;;  %v6047_v51 = vld [vmem:[%s11443_s6 + $0x168] sm:$0xff] }
0x1a52   : > { %6910 = vmatpush1.bf16.msra.mxu0 %v9601_v0  ;;  %v6069_v0 = vld [vmem:[%s11443_s6 + $0x218] sm:$0xff]  ;;  %v6054_v43 = vld [vmem:[%s11443_s6 + $0x1a0] sm:$0xff] }
0x1a53   : > { %6911 = vmatprep.subr.bf16.mxu0 %v9618_v18  ;;  %v9574_v10 = vcombine.high %v6069_v0, %v6077_v4  ;;  %v6093_v18 = vld [vmem:[%s11443_s6 + $0x2d8] sm:$0xff]  ;;  %v9573_v21 = vcombine.low %v6069_v0, %v6077_v4  ;;  %v6062_v25 = vld [vmem:[%s11443_s6 + $0x1e0] sm:$0xff]  ;;  %v6055_v0 = vld [vmem:[%s11443_s6 + $0x1a8] sm:$0xff] }
0x1a54   : > { %5975 = vadd.xlane.f32.xlu0 %v5972_v35  ;;  %6869 = vmatpush1.bf16.msra.mxu1 %v9615_v16  ;;  %v6092_v16 = vld [vmem:[%s11443_s6 + $0x2d0] sm:$0xff]  ;;  %v6063_v4 = vld [vmem:[%s11443_s6 + $0x1e8] sm:$0xff] }
0x1a55   : > { %6940 = vmatprep.subr.bf16.mxu1 %v9508_v26  ;;  %v9588_v22 = vcombine.high %v6084_v11, %v6092_v16  ;;  %v6100_v26 = vld [vmem:[%s11443_s6 + $0x310] sm:$0xff] }
0x1a56   : > { %6912 = vmatpush1.bf16.msra.mxu0 %v9617_v17  ;;  %v6085_v17 = vld [vmem:[%s11443_s6 + $0x298] sm:$0xff] }
0x1a57   : > { %6983 = vmatprep.subr.bf16.mxu0 %v9510_v13  ;;  %v6109_v13 = vld [vmem:[%s11443_s6 + $0x358] sm:$0xff] }
0x1add   : > { %v5974_v35 = vpop.xlane.xlu0 %5973 }
0x1ade   : > { %v5977_v38 = vmul.f32 0.0078125, %v5974_v35  ;;  %v9587_v35 = vcombine.low %v6084_v11, %v6092_v16  ;;  %v6070_v11 = vld [vmem:[%s11443_s6 + $0x220] sm:$0xff] }
0x1adf   : > { %v6078_v16 = vld [vmem:[%s11443_s6 + $0x260] sm:$0xff] }
0x1ae0   : > { %v5979_v42 = vadd.f32 1e-05, %v5977_v38  ;;  %v9589_v38 = vcombine.low %v6085_v17, %v6093_v18 }
0x1ae1   : > { %v5976_v37 = vpop.xlane.xlu0 %5975 }
0x1ae2   : > { %11236 = vrsqrt.f32 %v5979_v42  ;;  %v5978_v47 = vmul.f32 0.0078125, %v5976_v37  ;;  %v9604_v42 = vcombine.high %v6100_v26, %v6108_v20 }
0x1ae4   : > { %v5980_v39 = vadd.f32 1e-05, %v5978_v47  ;;  %v6116_v47 = vld [vmem:[%s11443_s6 + $0x390] sm:$0xff] }
0x1ae6   : > { %11238 = vrsqrt.f32 %v5980_v39  ;;  %v6124_v39 = vld [vmem:[%s11443_s6 + $0x3d0] sm:$0xff] }
0x1aec   : > { %v11237_v40 = vpop.eup %11236 }
0x1aed   : > { %v5983_v33 = vmul.f32 %v11237_v40, %v12846_v27  ;;  %v6020_v27 = vld [vmem:[%s11443_s6 + $0x90] sm:$0xff]  ;;  %v6117_v40 = vld [vmem:[%s11443_s6 + $0x398] sm:$0xff] }
0x1aee   : > { %v9524_v23 = vcombine.high %v6020_v27, %v6028_v60  ;;  %v9523_v54 = vcombine.low %v6020_v27, %v6028_v60  ;;  %v6007_v27 = vld [vmem:[%s11443_s6 + $0x28] sm:$0xff] }
0x1aef   : > { %v5991_v41 = vmul.f32 %v9501_v8, %v5983_v33  ;;  %v6125_v33 = vld [vmem:[%s11443_s6 + $0x3d8] sm:$0xff]  ;;  %v6015_v60 = vld [vmem:[%s11443_s6 + $0x68] sm:$0xff] }
0x1af0   : > { %v11239_v36 = vpop.eup %11238 }
0x1af1   : > { %v5984_v44 = vmul.f32 %v11239_v36, %v12848_v12  ;;  %v12898_v55 = vadd.f32 %v9502_v34, %v5991_v41  ;;  %v9526_v12 = vcombine.high %v6021_v1, %v6029_v61  ;;  %v9620_v41 = vcombine.high %v6116_v47, %v6124_v39 }
0x1af2   : > { %v9619_v1 = vcombine.low %v6116_v47, %v6124_v39  ;;  %v9621_v61 = vcombine.low %v6117_v40, %v6125_v33  ;;  %v6102_v47 = vld [vmem:[%s11443_s6 + $0x320] sm:$0xff] }
0x1af3   : > { %v5992_v59 = vmul.f32 %v9501_v8, %v5984_v44  ;;  %v9603_v8 = vcombine.low %v6100_v26, %v6108_v20  ;;  %v9622_v44 = vcombine.high %v6117_v40, %v6125_v33  ;;  %v6086_v26 = vld [vmem:[%s11443_s6 + $0x2a0] sm:$0xff]  ;;  %v6103_v40 = vld [vmem:[%s11443_s6 + $0x328] sm:$0xff] }
0x1af4   : > { %v6094_v20 = vld [vmem:[%s11443_s6 + $0x2e0] sm:$0xff]  ;;  %v6111_v33 = vld [vmem:[%s11443_s6 + $0x368] sm:$0xff] }
0x1af5   : > { %v12900_v2 = vadd.f32 %v9502_v34, %v5992_v59  ;;  %v6006_v34 = vld [vmem:[%s11443_s6 + $0x20] sm:$0xff] }
0x1af6   : > { %v6014_v59 = vld [vmem:[%s11443_s6 + $0x60] sm:$0xff] }
0x1af7   : > { %v12904_v3 = vpack.c.bf16 %v12900_v2, %v12898_v55  ;;  %v6110_v39 = vld [vmem:[%s11443_s6 + $0x360] sm:$0xff] }
0x1af9   : > { %6887 = vmatmul.mubr.bf16.vlgmr.msra.gmra.mrb[76].mxu1 %v12904_v3  ;;  %6930 = vmatmul.mubr.bf16.vlgmr.msra.gmra.mrb[64].mxu0 %v12904_v3 }
0x1afa   : > { %6941 = vmatpush1.bf16.msra.mxu1 %v9507_v24  ;;  %6984 = vmatpush1.bf16.msra.mxu0 %v9509_v45  ;;  %v9590_v24 = vcombine.high %v6085_v17, %v6093_v18  ;;  %v6101_v45 = vld [vmem:[%s11443_s6 + $0x318] sm:$0xff]  ;;  %v6071_v17 = vld [vmem:[%s11443_s6 + $0x228] sm:$0xff] }
0x1afb   : > { %6942 = vmatprep.subr.bf16.mxu1 %v9524_v23  ;;  %6985 = vmatprep.subr.bf16.mxu0 %v9526_v12  ;;  %v9606_v37 = vcombine.high %v6101_v45, %v6109_v13  ;;  %v9605_v36 = vcombine.low %v6101_v45, %v6109_v13  ;;  %v9512_v23 = vcombine.high %v6006_v34, %v6014_v59  ;;  %v6079_v18 = vld [vmem:[%s11443_s6 + $0x268] sm:$0xff] }
0x1afc   : > { %6972 = vmatprep.mubr.bf16.mxu1 %v11286_v63  ;;  %7015 = vmatprep.mubr.bf16.mxu0 %v11286_v63  ;;  %v9514_v12 = vcombine.high %v6007_v27, %v6015_v60  ;;  %v6087_v45 = vld [vmem:[%s11443_s6 + $0x2a8] sm:$0xff] }
0x1afd   : > { %v6095_v13 = vld [vmem:[%s11443_s6 + $0x2e8] sm:$0xff] }
0x1afe   : > { %6943 = vmatpush1.bf16.msra.mxu1 %v9523_v54  ;;  %6986 = vmatpush1.bf16.msra.mxu0 %v9525_v7  ;;  %v9511_v54 = vcombine.low %v6006_v34, %v6014_v59  ;;  %v9513_v7 = vcombine.low %v6007_v27, %v6015_v60  ;;  %v6118_v34 = vld [vmem:[%s11443_s6 + $0x3a0] sm:$0xff]  ;;  %v6119_v27 = vld [vmem:[%s11443_s6 + $0x3a8] sm:$0xff] }
0x1aff   : > { %6944 = vmatprep.subr.bf16.mxu1 %v9540_v14  ;;  %6987 = vmatprep.subr.bf16.mxu0 %v9542_v15  ;;  %v9528_v14 = vcombine.high %v6022_v30, %v6030_v31  ;;  %v9530_v15 = vcombine.high %v6023_v49, %v6031_v50  ;;  %v6126_v59 = vld [vmem:[%s11443_s6 + $0x3e0] sm:$0xff]  ;;  %v6127_v60 = vld [vmem:[%s11443_s6 + $0x3e8] sm:$0xff] }
0x1b02   : > { %6945 = vmatpush1.bf16.msra.mxu1 %v9539_v56  ;;  %6988 = vmatpush1.bf16.msra.mxu0 %v9541_v57  ;;  %v9527_v56 = vcombine.low %v6022_v30, %v6030_v31  ;;  %v9529_v57 = vcombine.low %v6023_v49, %v6031_v50  ;;  %v6008_v30 = vld [vmem:[%s11443_s6 + $0x30] sm:$0xff]  ;;  %v6009_v49 = vld [vmem:[%s11443_s6 + $0x38] sm:$0xff] }
0x1b03   : > { %6946 = vmatprep.subr.bf16.mxu1 %v9556_v58  ;;  %6989 = vmatprep.subr.bf16.mxu0 %v9558_v62  ;;  %v9544_v58 = vcombine.high %v6038_v46, %v6046_v52  ;;  %v9546_v62 = vcombine.high %v6039_v53, %v6047_v51  ;;  %v6016_v31 = vld [vmem:[%s11443_s6 + $0x70] sm:$0xff]  ;;  %v6017_v50 = vld [vmem:[%s11443_s6 + $0x78] sm:$0xff] }
0x1b06   : > { %6947 = vmatpush1.bf16.msra.mxu1 %v9555_v5  ;;  %6990 = vmatpush1.bf16.msra.mxu0 %v9557_v6  ;;  %v9543_v5 = vcombine.low %v6038_v46, %v6046_v52  ;;  %v9545_v6 = vcombine.low %v6039_v53, %v6047_v51  ;;  %v6024_v46 = vld [vmem:[%s11443_s6 + $0xb0] sm:$0xff]  ;;  %v6025_v53 = vld [vmem:[%s11443_s6 + $0xb8] sm:$0xff] }
0x1b07   : > { %6948 = vmatprep.subr.bf16.mxu1 %v9572_v9  ;;  %6991 = vmatprep.subr.bf16.mxu0 %v9574_v10  ;;  %v9560_v9 = vcombine.high %v6054_v43, %v6062_v25  ;;  %v9562_v10 = vcombine.high %v6055_v0, %v6063_v4  ;;  %v6032_v52 = vld [vmem:[%s11443_s6 + $0xf0] sm:$0xff]  ;;  %v6033_v51 = vld [vmem:[%s11443_s6 + $0xf8] sm:$0xff] }
0x1b0a   : > { %6949 = vmatpush1.bf16.msra.mxu1 %v9571_v19  ;;  %6992 = vmatpush1.bf16.msra.mxu0 %v9573_v21  ;;  %v9559_v19 = vcombine.low %v6054_v43, %v6062_v25  ;;  %v9561_v21 = vcombine.low %v6055_v0, %v6063_v4  ;;  %v6040_v43 = vld [vmem:[%s11443_s6 + $0x130] sm:$0xff]  ;;  %v6041_v0 = vld [vmem:[%s11443_s6 + $0x138] sm:$0xff] }
0x1b0b   : > { %6950 = vmatprep.subr.bf16.mxu1 %v9588_v22  ;;  %6993 = vmatprep.subr.bf16.mxu0 %v9590_v24  ;;  %v9576_v22 = vcombine.high %v6070_v11, %v6078_v16  ;;  %v9578_v24 = vcombine.high %v6071_v17, %v6079_v18  ;;  %v6048_v25 = vld [vmem:[%s11443_s6 + $0x170] sm:$0xff]  ;;  %v6049_v4 = vld [vmem:[%s11443_s6 + $0x178] sm:$0xff] }
0x1b0e   : > { %6951 = vmatpush1.bf16.msra.mxu1 %v9587_v35  ;;  %6994 = vmatpush1.bf16.msra.mxu0 %v9589_v38  ;;  %v9575_v35 = vcombine.low %v6070_v11, %v6078_v16  ;;  %v9577_v38 = vcombine.low %v6071_v17, %v6079_v18  ;;  %v6056_v11 = vld [vmem:[%s11443_s6 + $0x1b0] sm:$0xff]  ;;  %v6057_v17 = vld [vmem:[%s11443_s6 + $0x1b8] sm:$0xff] }
0x1b0f   : > { %6952 = vmatprep.subr.bf16.mxu1 %v9604_v42  ;;  %6995 = vmatprep.subr.bf16.mxu0 %v9606_v37  ;;  %v9592_v42 = vcombine.high %v6086_v26, %v6094_v20  ;;  %v9594_v37 = vcombine.high %v6087_v45, %v6095_v13  ;;  %v6064_v16 = vld [vmem:[%s11443_s6 + $0x1f0] sm:$0xff]  ;;  %v6065_v18 = vld [vmem:[%s11443_s6 + $0x1f8] sm:$0xff] }
0x1b12   : > { %6953 = vmatpush1.bf16.msra.mxu1 %v9603_v8  ;;  %6996 = vmatpush1.bf16.msra.mxu0 %v9605_v36  ;;  %v9591_v8 = vcombine.low %v6086_v26, %v6094_v20  ;;  %v9593_v36 = vcombine.low %v6087_v45, %v6095_v13  ;;  %v6072_v26 = vld [vmem:[%s11443_s6 + $0x230] sm:$0xff]  ;;  %v6073_v45 = vld [vmem:[%s11443_s6 + $0x238] sm:$0xff] }
0x1b13   : > { %6954 = vmatprep.subr.bf16.mxu1 %v9620_v41  ;;  %6997 = vmatprep.subr.bf16.mxu0 %v9622_v44  ;;  %v9608_v41 = vcombine.high %v6102_v47, %v6110_v39  ;;  %v9610_v44 = vcombine.high %v6103_v40, %v6111_v33  ;;  %v6080_v20 = vld [vmem:[%s11443_s6 + $0x270] sm:$0xff]  ;;  %v6081_v13 = vld [vmem:[%s11443_s6 + $0x278] sm:$0xff] }
0x1b16   : > { %6955 = vmatpush1.bf16.msra.mxu1 %v9619_v1  ;;  %6998 = vmatpush1.bf16.msra.mxu0 %v9621_v61  ;;  %v9607_v1 = vcombine.low %v6102_v47, %v6110_v39  ;;  %v9609_v61 = vcombine.low %v6103_v40, %v6111_v33  ;;  %v6096_v47 = vld [vmem:[%s11443_s6 + $0x2f0] sm:$0xff]  ;;  %v6089_v39 = vld [vmem:[%s11443_s6 + $0x2b8] sm:$0xff]  ;;  %v9579_v33 = vcombine.low %v6072_v26, %v6080_v20 }
0x1b17   : > { %7026 = vmatprep.subr.bf16.mxu1 %v9512_v23  ;;  %7069 = vmatprep.subr.bf16.mxu0 %v9514_v12  ;;  %v9624_v23 = vcombine.high %v6118_v34, %v6126_v59  ;;  %v9626_v12 = vcombine.high %v6119_v27, %v6127_v60  ;;  %v6097_v40 = vld [vmem:[%s11443_s6 + $0x2f8] sm:$0xff] }
0x1b19   : > { %6973 = vmatmul.mubr.bf16.vlgmr.msra.gmra.mrb[80].mxu1 %v12904_v3  ;;  %7016 = vmatmul.mubr.bf16.vlgmr.msra.gmra.mrb[68].mxu0 %v12904_v3 }
0x1b1a   : > { %7027 = vmatpush1.bf16.msra.mxu1 %v9511_v54  ;;  %7070 = vmatpush1.bf16.msra.mxu0 %v9513_v7  ;;  %v9623_v54 = vcombine.low %v6118_v34, %v6126_v59  ;;  %v9625_v7 = vcombine.low %v6119_v27, %v6127_v60  ;;  %v6112_v34 = vld [vmem:[%s11443_s6 + $0x370] sm:$0xff]  ;;  %v6105_v59 = vld [vmem:[%s11443_s6 + $0x338] sm:$0xff] }
0x1b1b   : > { %7028 = vmatprep.subr.bf16.mxu1 %v9528_v14  ;;  %7071 = vmatprep.subr.bf16.mxu0 %v9530_v15  ;;  %v9516_v14 = vcombine.high %v6008_v30, %v6016_v31  ;;  %v9518_v15 = vcombine.high %v6009_v49, %v6017_v50  ;;  %v6113_v27 = vld [vmem:[%s11443_s6 + $0x378] sm:$0xff] }
0x1b1c   : > { %7058 = vmatprep.mubr.bf16.mxu1 %v11286_v63  ;;  %7101 = vmatprep.mubr.bf16.mxu0 %v11286_v63 }
0x1b1e   : > { %7029 = vmatpush1.bf16.msra.mxu1 %v9527_v56  ;;  %7072 = vmatpush1.bf16.msra.mxu0 %v9529_v57  ;;  %v9515_v56 = vcombine.low %v6008_v30, %v6016_v31  ;;  %v9517_v57 = vcombine.low %v6009_v49, %v6017_v50  ;;  %v6128_v30 = vld [vmem:[%s11443_s6 + $0x3f0] sm:$0xff]  ;;  %v6121_v31 = vld [vmem:[%s11443_s6 + $0x3b8] sm:$0xff] }
0x1b1f   : > { %7030 = vmatprep.subr.bf16.mxu1 %v9544_v58  ;;  %7073 = vmatprep.subr.bf16.mxu0 %v9546_v62  ;;  %v9532_v58 = vcombine.high %v6024_v46, %v6032_v52  ;;  %v9534_v62 = vcombine.high %v6025_v53, %v6033_v51  ;;  %v6129_v49 = vld [vmem:[%s11443_s6 + $0x3f8] sm:$0xff] }
0x1b22   : > { %7031 = vmatpush1.bf16.msra.mxu1 %v9543_v5  ;;  %7074 = vmatpush1.bf16.msra.mxu0 %v9545_v6  ;;  %v9531_v5 = vcombine.low %v6024_v46, %v6032_v52  ;;  %v9533_v6 = vcombine.low %v6025_v53, %v6033_v51  ;;  %v9629_v46 = vcombine.low %v6121_v31, %v6129_v49  ;;  %v11044_v52 = vld [vmem:[%s11454_s3 + $0x40] sm:$0xff]  }
0x1b23   : > { %7032 = vmatprep.subr.bf16.mxu1 %v9560_v9  ;;  %7075 = vmatprep.subr.bf16.mxu0 %v9562_v10  ;;  %v9548_v9 = vcombine.high %v6040_v43, %v6048_v25  ;;  %v9550_v10 = vcombine.high %v6041_v0, %v6049_v4  ;;  %v11045_v53 = vld [vmem:[%s11454_s3 + $0xc0] sm:$0xff]  }
0x1b24   : > { %v11046_v51 = vld [vmem:[%s11454_s3] sm:$0xff]  }
0x1b26   : > { %7033 = vmatpush1.bf16.msra.mxu1 %v9559_v19  ;;  %7076 = vmatpush1.bf16.msra.mxu0 %v9561_v21  ;;  %v9547_v19 = vcombine.low %v6040_v43, %v6048_v25  ;;  %v9549_v21 = vcombine.low %v6041_v0, %v6049_v4  ;;  %v11051_v43 = vld [vmem:[%s11454_s3 + $0x88] sm:$0xff]   ;;  %v11052_v25 = vld [vmem:[%s11454_s3 + $0x50] sm:$0xff]  }
0x1b27   : > { %7034 = vmatprep.subr.bf16.mxu1 %v9576_v22  ;;  %7077 = vmatprep.subr.bf16.mxu0 %v9578_v24  ;;  %v9564_v22 = vcombine.high %v6056_v11, %v6064_v16  ;;  %v9566_v24 = vcombine.high %v6057_v17, %v6065_v18  ;;  %v11053_v0 = vld [vmem:[%s11454_s3 + $0xd0] sm:$0xff]  }
0x1b28   : > { %v11054_v4 = vld [vmem:[%s11454_s3 + $0x10] sm:$0xff]  }
0x1b2a   : > { %7035 = vmatpush1.bf16.msra.mxu1 %v9575_v35  ;;  %7078 = vmatpush1.bf16.msra.mxu0 %v9577_v38  ;;  %v9563_v35 = vcombine.low %v6056_v11, %v6064_v16  ;;  %v9580_v38 = vcombine.high %v6072_v26, %v6080_v20  ;;  %v11060_v11 = vld [vmem:[%s11454_s3 + $0x60] sm:$0xff]   ;;  %v11068_v26 = vld [vmem:[%s11454_s3 + $0x70] sm:$0xff]  }
0x1b2b   : > { %7036 = vmatprep.subr.bf16.mxu1 %v9592_v42  ;;  %7079 = vmatprep.subr.bf16.mxu0 %v9594_v37  ;;  %v9582_v42 = vcombine.high %v6073_v45, %v6081_v13  ;;  %v6088_v37 = vld [vmem:[%s11443_s6 + $0x2b0] sm:$0xff]  ;;  %v11061_v16 = vld [vmem:[%s11454_s3 + $0xe0] sm:$0xff]  }
0x1b2c   : > { %v9595_v60 = vcombine.low %v6088_v37, %v6096_v47  ;;  %v11069_v20 = vld [vmem:[%s11454_s3 + $0xf0] sm:$0xff]  }
0x1b2e   : > { %7037 = vmatpush1.bf16.msra.mxu1 %v9591_v8  ;;  %7080 = vmatpush1.bf16.msra.mxu0 %v9593_v36  ;;  %v9581_v8 = vcombine.low %v6073_v45, %v6081_v13  ;;  %v9596_v36 = vcombine.high %v6088_v37, %v6096_v47  ;;  %v11070_v45 = vld [vmem:[%s11454_s3 + $0x30] sm:$0xff]   ;;  %v11076_v37 = vld [vmem:[%s11454_s3 + $0x140] sm:$0xff]  }
0x1b2f   : > { %7038 = vmatprep.subr.bf16.mxu1 %v9608_v41  ;;  %7081 = vmatprep.subr.bf16.mxu0 %v9610_v44  ;;  %v9598_v41 = vcombine.high %v6089_v39, %v6097_v40  ;;  %v6104_v44 = vld [vmem:[%s11443_s6 + $0x330] sm:$0xff]  ;;  %v11077_v47 = vld [vmem:[%s11454_s3 + $0x1c0] sm:$0xff]  }
0x1b30   : > { %v9611_v50 = vcombine.low %v6104_v44, %v6112_v34  ;;  %v11071_v13 = vld [vmem:[%s11454_s3 + $0xb0] sm:$0xff]  }
0x1b32   : > { %7039 = vmatpush1.bf16.msra.mxu1 %v9607_v1  ;;  %7082 = vmatpush1.bf16.msra.mxu0 %v9609_v61  ;;  %v9597_v1 = vcombine.low %v6089_v39, %v6097_v40  ;;  %v9612_v61 = vcombine.high %v6104_v44, %v6112_v34  ;;  %v13043_v39 = vld [vmem:[%s11449_s18] sm:$0xff]  ;;  %v6148_v40 = vsub.s32 3, %v12424_v28 }
0x1b33   : > { %7040 = vmatprep.subr.bf16.mxu1 %v9624_v23  ;;  %7083 = vmatprep.subr.bf16.mxu0 %v9626_v12  ;;  %v9614_v23 = vcombine.high %v6105_v59, %v6113_v27  ;;  %v6120_v12 = vld [vmem:[%s11443_s6 + $0x3b0] sm:$0xff] }
0x1b36   : > { %7041 = vmatpush1.bf16.msra.mxu1 %v9623_v54  ;;  %7084 = vmatpush1.bf16.msra.mxu0 %v9625_v7  ;;  %v9613_v54 = vcombine.low %v6105_v59, %v6113_v27  ;;  %v9628_v7 = vcombine.high %v6120_v12, %v6128_v30 }
0x1b37   : > { %7112 = vmatprep.subr.bf16.mxu1 %v9516_v14  ;;  %7155 = vmatprep.subr.bf16.mxu0 %v9518_v15  ;;  %v9630_v14 = vcombine.high %v6121_v31, %v6129_v49  ;;  %v9627_v15 = vcombine.low %v6120_v12, %v6128_v30 }
0x1b39   : > { %7059 = vmatmul.mubr.bf16.vlgmr.msra.gmra.mrb[84].mxu1 %v12904_v3  ;;  %7102 = vmatmul.mubr.bf16.vlgmr.msra.gmra.mrb[72].mxu0 %v12904_v3 }
0x1b3a   : > { %7113 = vmatpush1.bf16.msra.mxu1 %v9515_v56  ;;  %7156 = vmatpush1.bf16.msra.mxu0 %v9517_v57  ;;  %v11047_v56 = vld [vmem:[%s11454_s3 + $0x80] sm:$0xff]   ;;  %v11048_v57 = vld [vmem:[%s11454_s3 + $0x48] sm:$0xff]  }
0x1b3b   : > { %7114 = vmatprep.subr.bf16.mxu1 %v9532_v58  ;;  %7157 = vmatprep.subr.bf16.mxu0 %v9534_v62  ;;  %v11049_v58 = vld [vmem:[%s11454_s3 + $0xc8] sm:$0xff]  }
0x1b3c   : > { %7144 = vmatprep.mubr.bf16.mxu1 %v11286_v63  ;;  %7187 = vmatprep.mubr.bf16.mxu0 %v11286_v63  ;;  %v9565_v63 = vcombine.low %v6057_v17, %v6065_v18  ;;  %v11050_v62 = vld [vmem:[%s11454_s3 + $0x8] sm:$0xff]   ;;  %v11062_v17 = vld [vmem:[%s11454_s3 + $0x20] sm:$0xff]  }
0x1b3d   : > { %v11063_v18 = vld [vmem:[%s11454_s3 + $0xa0] sm:$0xff]  }
0x1b3e   : > { %7115 = vmatpush1.bf16.msra.mxu1 %v9531_v5  ;;  %7158 = vmatpush1.bf16.msra.mxu0 %v9533_v6  ;;  %v11055_v5 = vld [vmem:[%s11454_s3 + $0x90] sm:$0xff]   ;;  %v11057_v6 = vld [vmem:[%s11454_s3 + $0xd8] sm:$0xff]  }
0x1b3f   : > { %7116 = vmatprep.subr.bf16.mxu1 %v9548_v9  ;;  %7159 = vmatprep.subr.bf16.mxu0 %v9550_v10  ;;  %v11058_v9 = vld [vmem:[%s11454_s3 + $0x18] sm:$0xff]  }
0x1b40   : > { %v11059_v10 = vld [vmem:[%s11454_s3 + $0x98] sm:$0xff]  }
0x1b42   : > { %7117 = vmatpush1.bf16.msra.mxu1 %v9547_v19  ;;  %7160 = vmatpush1.bf16.msra.mxu0 %v9549_v21  ;;  %v11064_v19 = vld [vmem:[%s11454_s3 + $0x68] sm:$0xff]  }
0x1b43   : > { %7118 = vmatprep.subr.bf16.mxu1 %v9564_v22  ;;  %7161 = vmatprep.subr.bf16.mxu0 %v9566_v24  ;;  %v11065_v21 = vld [vmem:[%s11454_s3 + $0xe8] sm:$0xff]  }
0x1b44   : > { %v11066_v22 = vld [vmem:[%s11454_s3 + $0x28] sm:$0xff]  }
0x1b45   : > { %v11067_v24 = vld [vmem:[%s11454_s3 + $0xa8] sm:$0xff]  }
0x1b46   : > { %7119 = vmatpush1.bf16.msra.mxu1 %v9563_v35  ;;  %7162 = vmatpush1.bf16.msra.mxu0 %v9565_v63  ;;  %v11072_v35 = vld [vmem:[%s11454_s3 + $0x78] sm:$0xff]  }
0x1b47   : > { %7120 = vmatprep.subr.bf16.mxu1 %v9580_v38  ;;  %7163 = vmatprep.subr.bf16.mxu0 %v9582_v42  ;;  %v11073_v63 = vld [vmem:[%s11454_s3 + $0xf8] sm:$0xff]  }
0x1b48   : > { %v11074_v38 = vld [vmem:[%s11454_s3 + $0x38] sm:$0xff]  }
0x1b49   : > { %v11075_v42 = vld [vmem:[%s11454_s3 + $0xb8] sm:$0xff]  }
0x1b4a   : > { %7121 = vmatpush1.bf16.msra.mxu1 %v9579_v33  ;;  %7164 = vmatpush1.bf16.msra.mxu0 %v9581_v8  ;;  %v6137_v33 = vrot.slane %v13043_v39, %v12432_v32  ;;  %v6145_v8 = vrot.slane %v13043_v39, %v12458_v48 }
0x1b4b   : > { %7122 = vmatprep.subr.bf16.mxu1 %v9596_v36  ;;  %7165 = vmatprep.subr.bf16.mxu0 %v9598_v41  ;;  %v6141_v36 = vrot.slane %v13043_v39, %v12427_v29  ;;  %v6149_v41 = vrot.slane %v13043_v39, %v6148_v40 }
0x1b4e   : > { %7123 = vmatpush1.bf16.msra.mxu1 %v9595_v60  ;;  %7166 = vmatpush1.bf16.msra.mxu0 %v9597_v1 }
0x1b4f   : > { %7124 = vmatprep.subr.bf16.mxu1 %v9612_v61  ;;  %7167 = vmatprep.subr.bf16.mxu0 %v9614_v23 }
0x1b52   : > { %7125 = vmatpush1.bf16.msra.mxu1 %v9611_v50  ;;  %7168 = vmatpush1.bf16.msra.mxu0 %v9613_v54 }
0x1b53   : > { %7126 = vmatprep.subr.bf16.mxu1 %v9628_v7  ;;  %7169 = vmatprep.subr.bf16.mxu0 %v9630_v14 }
0x1b56   : > { %7127 = vmatpush1.bf16.msra.mxu1 %v9627_v15  ;;  %7170 = vmatpush1.bf16.msra.mxu0 %v9629_v46 }
0x1b57   : > { %10169 = vmatprep.subr.bf16.mxu1 %v11044_v52  ;;  %10191 = vmatprep.subr.bf16.mxu0 %v11045_v53 }
0x1b59   : > { %7145 = vmatmul.mubr.bf16.vlgmr.msra.gmra.mrb[88].mxu1 %v12904_v3  ;;  %7188 = vmatmul.mubr.bf16.vlgmr.msra.gmra.mrb[76].mxu0 %v12904_v3  ;;  %v11056_v3 = vld [vmem:[%s11454_s3 + $0x58] sm:$0xff]  }
0x1b5a   : > { %10170 = vmatpush3.bf16.msra.mxu1 %v11046_v51  ;;  %10192 = vmatpush3.bf16.msra.mxu0 %v11047_v56 }
0x1b5b   : > { %10171 = vmatprep.subr.bf16.mxu1 %v11048_v57  ;;  %10193 = vmatprep.subr.bf16.mxu0 %v11049_v58 }
0x1b5e   : > { %10172 = vmatpush3.bf16.msra.mxu1 %v11050_v62  ;;  %10194 = vmatpush3.bf16.msra.mxu0 %v11051_v43 }
0x1b5f   : > { %10173 = vmatprep.subr.bf16.mxu1 %v11052_v25  ;;  %10195 = vmatprep.subr.bf16.mxu0 %v11053_v0 }
0x1b62   : > { %10174 = vmatpush3.bf16.msra.mxu1 %v11054_v4  ;;  %10196 = vmatpush3.bf16.msra.mxu0 %v11055_v5  ;;  %v11078_v4 = vld [vmem:[%s11454_s3 + $0x100] sm:$0xff]  }
0x1b63   : > { %10175 = vmatprep.subr.bf16.mxu1 %v11056_v3  ;;  %10197 = vmatprep.subr.bf16.mxu0 %v11057_v6  ;;  %v11079_v5 = vld [vmem:[%s11454_s3 + $0x180] sm:$0xff]   ;;  %v11080_v3 = vld [vmem:[%s11454_s3 + $0x148] sm:$0xff]  }
0x1b64   : > { %v11081_v6 = vld [vmem:[%s11454_s3 + $0x1c8] sm:$0xff]  }
0x1b66   : > { %10176 = vmatpush3.bf16.msra.mxu1 %v11058_v9  ;;  %10198 = vmatpush3.bf16.msra.mxu0 %v11059_v10  ;;  %v11082_v9 = vld [vmem:[%s11454_s3 + $0x108] sm:$0xff]  }
0x1b67   : > { %10177 = vmatprep.subr.bf16.mxu1 %v11060_v11  ;;  %10199 = vmatprep.subr.bf16.mxu0 %v11061_v16  ;;  %v11083_v10 = vld [vmem:[%s11454_s3 + $0x188] sm:$0xff]   ;;  %v11084_v11 = vld [vmem:[%s11454_s3 + $0x150] sm:$0xff]  }
0x1b68   : > { %v11085_v16 = vld [vmem:[%s11454_s3 + $0x1d0] sm:$0xff]  }
0x1b6a   : > { %10178 = vmatpush3.bf16.msra.mxu1 %v11062_v17  ;;  %10200 = vmatpush3.bf16.msra.mxu0 %v11063_v18  ;;  %v11086_v17 = vld [vmem:[%s11454_s3 + $0x110] sm:$0xff]  }
0x1b6b   : > { %10179 = vmatprep.subr.bf16.mxu1 %v11064_v19  ;;  %10201 = vmatprep.subr.bf16.mxu0 %v11065_v21  ;;  %v11087_v18 = vld [vmem:[%s11454_s3 + $0x190] sm:$0xff]   ;;  %v11088_v19 = vld [vmem:[%s11454_s3 + $0x158] sm:$0xff]  }
0x1b6c   : > { %v11089_v21 = vld [vmem:[%s11454_s3 + $0x1d8] sm:$0xff]  }
0x1b6e   : > { %10180 = vmatpush3.bf16.msra.mxu1 %v11066_v22  ;;  %10202 = vmatpush3.bf16.msra.mxu0 %v11067_v24  ;;  %v11090_v22 = vld [vmem:[%s11454_s3 + $0x118] sm:$0xff]  }
0x1b6f   : > { %10181 = vmatprep.subr.bf16.mxu1 %v11068_v26  ;;  %10203 = vmatprep.subr.bf16.mxu0 %v11069_v20  ;;  %v11091_v24 = vld [vmem:[%s11454_s3 + $0x198] sm:$0xff]   ;;  %v11092_v26 = vld [vmem:[%s11454_s3 + $0x160] sm:$0xff]  }
0x1b70   : > { %v11093_v20 = vld [vmem:[%s11454_s3 + $0x1e0] sm:$0xff]  }
0x1b72   : > { %10182 = vmatpush3.bf16.msra.mxu1 %v11070_v45  ;;  %10204 = vmatpush3.bf16.msra.mxu0 %v11071_v13  ;;  %v11094_v45 = vld [vmem:[%s11454_s3 + $0x120] sm:$0xff]  }
0x1b73   : > { %10183 = vmatprep.subr.bf16.mxu1 %v11072_v35  ;;  %10205 = vmatprep.subr.bf16.mxu0 %v11073_v63  ;;  %v11095_v13 = vld [vmem:[%s11454_s3 + $0x1a0] sm:$0xff]   ;;  %v11096_v35 = vld [vmem:[%s11454_s3 + $0x168] sm:$0xff]  }
0x1b74   : > { %v11097_v63 = vld [vmem:[%s11454_s3 + $0x1e8] sm:$0xff]  }
0x1b76   : > { %10184 = vmatpush3.bf16.msra.mxu1 %v11074_v38  ;;  %10206 = vmatpush3.bf16.msra.mxu0 %v11075_v42  ;;  %v6152_v38 = vsub.s32 4, %v12424_v28  ;;  %v6160_v42 = vsub.s32 6, %v12424_v28 }
0x1b77   : > { %10213 = vmatprep.subr.bf16.mxu1 %v11076_v37  ;;  %10235 = vmatprep.subr.bf16.mxu0 %v11077_v47  ;;  %v6156_v37 = vsub.s32 5, %v12424_v28  ;;  %v6164_v47 = vsub.s32 7, %v12424_v28 }
0x1bcc   : > { %v6888_v44 = vpop.f32.mrb[76].mxu1  ;;  %v6931_v34 = vpop.f32.mrb[64].mxu0 }
0x1bcd   : > { %v6889_v59 = vadd.f32 %v6888_v44, %v6137_v33  ;;  %v6932_v27 = vadd.f32 %v6931_v34, %v6145_v8  ;;  %v6890_v60 = vpop.f32.mrb[77].mxu1  ;;  %v6933_v1 = vpop.f32.mrb[65].mxu0  ;;  %v11100_v44 = vld [vmem:[%s11454_s3 + $0x170] sm:$0xff]  }
0x1bce   : > { %v6891_v61 = vadd.f32 %v6890_v60, %v6141_v36  ;;  %v6934_v23 = vadd.f32 %v6933_v1, %v6149_v41  ;;  %v6892_v12 = vpop.f32.mrb[78].mxu1  ;;  %v6935_v30 = vpop.f32.mrb[66].mxu0  ;;  %v11101_v34 = vld [vmem:[%s11454_s3 + $0x1f0] sm:$0xff]  }
0x1bcf   : > { %v6893_v31 = vadd.f32 %v6892_v12, %v6137_v33  ;;  %v6936_v49 = vadd.f32 %v6935_v30, %v6145_v8  ;;  %v6894_v50 = vpop.f32.mrb[79].mxu1  ;;  %v6937_v54 = vpop.f32.mrb[67].mxu0  ;;  %v7198_v15 = vmax.f32 %v6889_v59, 0.0  ;;  %v7200_v46 = vmax.f32 %v6932_v27, 0.0  ;;  %v11098_v33 = vld [vmem:[%s11454_s3 + $0x128] sm:$0xff]  }
0x1bd0   : > { %v6895_v7 = vadd.f32 %v6894_v50, %v6141_v36  ;;  %v6938_v14 = vadd.f32 %v6937_v54, %v6149_v41  ;;  %v7199_v51 = vmax.f32 %v6891_v61, 0.0  ;;  %v7201_v56 = vmax.f32 %v6934_v23, 0.0  ;;  %v11099_v8 = vld [vmem:[%s11454_s3 + $0x1a8] sm:$0xff]   ;;  %v11102_v61 = vld [vmem:[%s11454_s3 + $0x130] sm:$0xff]   ;;  %v11104_v50 = vld [vmem:[%s11454_s3 + $0x178] sm:$0xff]  }
0x1bd1   : > { %v7214_v52 = vmax.f32 %v6893_v31, 0.0  ;;  %v7216_v53 = vmax.f32 %v6936_v49, 0.0  ;;  %v6153_v36 = vrot.slane %v13043_v39, %v6152_v38  ;;  %v6161_v41 = vrot.slane %v13043_v39, %v6160_v42  ;;  %v11103_v23 = vld [vmem:[%s11454_s3 + $0x1b0] sm:$0xff]   ;;  %v11105_v54 = vld [vmem:[%s11454_s3 + $0x1f8] sm:$0xff]  }
0x1bd2   : > { %v7215_v57 = vmax.f32 %v6895_v7, 0.0  ;;  %v7217_v58 = vmax.f32 %v6938_v14, 0.0  ;;  %v6157_v59 = vrot.slane %v13043_v39, %v6156_v37  ;;  %v6165_v27 = vrot.slane %v13043_v39, %v6164_v47 }
0x1bd3   : > { %v7230_v62 = vpack.c.bf16 %v7214_v52, %v7198_v15  ;;  %v7232_v43 = vpack.c.bf16 %v7216_v53, %v7200_v46 }
0x1bd4   : > { %v7231_v25 = vpack.c.bf16 %v7215_v57, %v7199_v51  ;;  %v7233_v0 = vpack.c.bf16 %v7217_v58, %v7201_v56  ;;  %v11106_v58 = vld [vmem:[%s11454_s3 + $0x138] sm:$0xff]  }
0x1bd6   : > { %8309 = vmatprep.mubr.bf16.mxu1 %v7231_v25  ;;  %8350 = vmatprep.mubr.bf16.mxu0 %v7233_v0 }
0x1bd7   : > { %8310 = vmatmul.mubr.bf16.vlgmr.msra.gmra.mrb[92].mxu1 %v7230_v62  ;;  %8351 = vmatmul.mubr.bf16.vlgmr.msra.gmra.mrb[80].mxu0 %v7232_v43  ;;  %v11107_v62 = vld [vmem:[%s11454_s3 + $0x1b8] sm:$0xff]  }
0x1bd8   : > { %10214 = vmatpush3.bf16.msra.mxu1 %v11078_v4  ;;  %10236 = vmatpush3.bf16.msra.mxu0 %v11079_v5  ;;  %v11108_v5 = vld [vmem:[%s11454_s3 + $0x240] sm:$0xff]  }
0x1bd9   : > { %10215 = vmatprep.subr.bf16.mxu1 %v11080_v3  ;;  %10237 = vmatprep.subr.bf16.mxu0 %v11081_v6  ;;  %v11109_v3 = vld [vmem:[%s11454_s3 + $0x2c0] sm:$0xff]  }
0x1bdc   : > { %10216 = vmatpush3.bf16.msra.mxu1 %v11082_v9  ;;  %10238 = vmatpush3.bf16.msra.mxu0 %v11083_v10 }
0x1bdd   : > { %10217 = vmatprep.subr.bf16.mxu1 %v11084_v11  ;;  %10239 = vmatprep.subr.bf16.mxu0 %v11085_v16 }
0x1be0   : > { %10218 = vmatpush3.bf16.msra.mxu1 %v11086_v17  ;;  %10240 = vmatpush3.bf16.msra.mxu0 %v11087_v18 }
0x1be1   : > { %10219 = vmatprep.subr.bf16.mxu1 %v11088_v19  ;;  %10241 = vmatprep.subr.bf16.mxu0 %v11089_v21  ;;  %v11110_v21 = vld [vmem:[%s11454_s3 + $0x200] sm:$0xff]  }
0x1be4   : > { %10220 = vmatpush3.bf16.msra.mxu1 %v11090_v22  ;;  %10242 = vmatpush3.bf16.msra.mxu0 %v11091_v24  ;;  %v11111_v22 = vld [vmem:[%s11454_s3 + $0x280] sm:$0xff]   ;;  %v11112_v24 = vld [vmem:[%s11454_s3 + $0x248] sm:$0xff]  }
0x1be5   : > { %10221 = vmatprep.subr.bf16.mxu1 %v11092_v26  ;;  %10243 = vmatprep.subr.bf16.mxu0 %v11093_v20  ;;  %v11113_v26 = vld [vmem:[%s11454_s3 + $0x2c8] sm:$0xff]  }
0x1be6   : > { %v11114_v20 = vld [vmem:[%s11454_s3 + $0x208] sm:$0xff]  }
0x1be8   : > { %10222 = vmatpush3.bf16.msra.mxu1 %v11094_v45  ;;  %10244 = vmatpush3.bf16.msra.mxu0 %v11095_v13  ;;  %v11115_v45 = vld [vmem:[%s11454_s3 + $0x288] sm:$0xff]   ;;  %v11116_v13 = vld [vmem:[%s11454_s3 + $0x250] sm:$0xff]  }
0x1be9   : > { %10223 = vmatprep.subr.bf16.mxu1 %v11096_v35  ;;  %10245 = vmatprep.subr.bf16.mxu0 %v11097_v63  ;;  %v11117_v35 = vld [vmem:[%s11454_s3 + $0x2d0] sm:$0xff]  }
0x1bea   : > { %v11118_v63 = vld [vmem:[%s11454_s3 + $0x210] sm:$0xff]  }
0x1bec   : > { %v6974_v60 = vpop.f32.mrb[80].mxu1  ;;  %v7017_v1 = vpop.f32.mrb[68].mxu0  ;;  %10224 = vmatpush3.bf16.msra.mxu1 %v11098_v33  ;;  %10246 = vmatpush3.bf16.msra.mxu0 %v11099_v8  ;;  %v11119_v33 = vld [vmem:[%s11454_s3 + $0x290] sm:$0xff]   ;;  %v11120_v8 = vld [vmem:[%s11454_s3 + $0x258] sm:$0xff]  }
0x1bed   : > { %v6975_v12 = vadd.f32 %v6974_v60, %v6153_v36  ;;  %v7018_v30 = vadd.f32 %v7017_v1, %v6161_v41  ;;  %v6976_v31 = vpop.f32.mrb[81].mxu1  ;;  %v7019_v49 = vpop.f32.mrb[69].mxu0  ;;  %10225 = vmatprep.subr.bf16.mxu1 %v11100_v44  ;;  %10247 = vmatprep.subr.bf16.mxu0 %v11101_v34  ;;  %v11123_v44 = vld [vmem:[%s11454_s3 + $0x298] sm:$0xff]   ;;  %v11124_v34 = vld [vmem:[%s11454_s3 + $0x260] sm:$0xff]   ;;  %v11128_v1 = vld [vmem:[%s11454_s3 + $0x268] sm:$0xff]  }
0x1bee   : > { %v6977_v7 = vadd.f32 %v6976_v31, %v6157_v59  ;;  %v7020_v14 = vadd.f32 %v7019_v49, %v6165_v27  ;;  %v6978_v15 = vpop.f32.mrb[82].mxu1  ;;  %v7021_v39 = vpop.f32.mrb[70].mxu0  ;;  %v11127_v60 = vld [vmem:[%s11454_s3 + $0x2a0] sm:$0xff]  }
0x1bef   : > { %v6979_v46 = vadd.f32 %v6978_v15, %v6153_v36  ;;  %v7022_v52 = vadd.f32 %v7021_v39, %v6161_v41  ;;  %v6980_v53 = vpop.f32.mrb[83].mxu1  ;;  %v7023_v51 = vpop.f32.mrb[71].mxu0  ;;  %v7202_v43 = vmax.f32 %v6975_v12, 0.0  ;;  %v7204_v25 = vmax.f32 %v7018_v30, 0.0  ;;  %v11121_v36 = vld [vmem:[%s11454_s3 + $0x2d8] sm:$0xff]   ;;  %v11130_v12 = vld [vmem:[%s11454_s3 + $0x228] sm:$0xff]  }
0x1bf0   : > { %v6981_v56 = vadd.f32 %v6980_v53, %v6157_v59  ;;  %v7024_v57 = vadd.f32 %v7023_v51, %v6165_v27  ;;  %10226 = vmatpush3.bf16.msra.mxu1 %v11102_v61  ;;  %10248 = vmatpush3.bf16.msra.mxu0 %v11103_v23  ;;  %v7203_v6 = vmax.f32 %v6977_v7, 0.0  ;;  %v7205_v9 = vmax.f32 %v7020_v14, 0.0  ;;  %v11122_v41 = vld [vmem:[%s11454_s3 + $0x218] sm:$0xff]   ;;  %v11125_v59 = vld [vmem:[%s11454_s3 + $0x2e0] sm:$0xff]   ;;  %v11129_v61 = vld [vmem:[%s11454_s3 + $0x2e8] sm:$0xff]  }
0x1bf1   : > { %v7218_v0 = vmax.f32 %v6979_v46, 0.0  ;;  %v7220_v4 = vmax.f32 %v7022_v52, 0.0  ;;  %10227 = vmatprep.subr.bf16.mxu1 %v11104_v50  ;;  %10249 = vmatprep.subr.bf16.mxu0 %v11105_v54  ;;  %v11126_v27 = vld [vmem:[%s11454_s3 + $0x220] sm:$0xff]   ;;  %v13124_v23 = vld [vmem:[%s11449_s18 + $0x8] sm:$0xff]  ;;  %v11132_v50 = vld [vmem:[%s11454_s3 + $0x270] sm:$0xff]  }
0x1bf2   : > { %v7219_v10 = vmax.f32 %v6981_v56, 0.0  ;;  %v7221_v11 = vmax.f32 %v7024_v57, 0.0  ;;  %v11131_v30 = vld [vmem:[%s11454_s3 + $0x2a8] sm:$0xff]   ;;  %v6169_v31 = vrot.slane %v13124_v23, %v12432_v32  ;;  %v6177_v49 = vrot.slane %v13124_v23, %v12458_v48  ;;  %v11133_v54 = vld [vmem:[%s11454_s3 + $0x2f0] sm:$0xff]   ;;  %v11136_v56 = vld [vmem:[%s11454_s3 + $0x278] sm:$0xff]  }
0x1bf3   : > { %v7234_v16 = vpack.c.bf16 %v7218_v0, %v7202_v43  ;;  %v7236_v17 = vpack.c.bf16 %v7220_v4, %v7204_v25  ;;  %v6173_v7 = vrot.slane %v13124_v23, %v12427_v29  ;;  %v6181_v14 = vrot.slane %v13124_v23, %v6148_v40  ;;  %v11134_v46 = vld [vmem:[%s11454_s3 + $0x230] sm:$0xff]   ;;  %v11137_v29 = vld [vmem:[%s11454_s3 + $0x2f8] sm:$0xff]  }
0x1bf4   : > { %v7235_v18 = vpack.c.bf16 %v7219_v10, %v7203_v6  ;;  %v7237_v19 = vpack.c.bf16 %v7221_v11, %v7205_v9  ;;  %10228 = vmatpush3.bf16.msra.mxu1 %v11106_v58  ;;  %10250 = vmatpush3.bf16.msra.mxu0 %v11107_v62  ;;  %v11135_v32 = vld [vmem:[%s11454_s3 + $0x2b0] sm:$0xff]   ;;  %v11138_v6 = vld [vmem:[%s11454_s3 + $0x238] sm:$0xff]  }
0x1bf5   : > { %10257 = vmatprep.subr.bf16.mxu1 %v11108_v5  ;;  %10279 = vmatprep.subr.bf16.mxu0 %v11109_v3  ;;  %v11139_v9 = vld [vmem:[%s11454_s3 + $0x2b8] sm:$0xff]  }
0x1bf6   : > { %8391 = vmatprep.mubr.bf16.mxu1 %v7235_v18  ;;  %8432 = vmatprep.mubr.bf16.mxu0 %v7237_v19  ;;  %v11140_v18 = vld [vmem:[%s11454_s3 + $0x340] sm:$0xff]  }
0x1bf7   : > { %8392 = vmatmul.mubr.bf16.vlgmr.msra.gmra.mrb[96].mxu1 %v7234_v16  ;;  %8433 = vmatmul.mubr.bf16.vlgmr.msra.gmra.mrb[84].mxu0 %v7236_v17  ;;  %v11141_v19 = vld [vmem:[%s11454_s3 + $0x3c0] sm:$0xff]  }
0x1bf8   : > { %10258 = vmatpush3.bf16.msra.mxu1 %v11110_v21  ;;  %10280 = vmatpush3.bf16.msra.mxu0 %v11111_v22 }
0x1bf9   : > { %10259 = vmatprep.subr.bf16.mxu1 %v11112_v24  ;;  %10281 = vmatprep.subr.bf16.mxu0 %v11113_v26 }
0x1bfc   : > { %10260 = vmatpush3.bf16.msra.mxu1 %v11114_v20  ;;  %10282 = vmatpush3.bf16.msra.mxu0 %v11115_v45 }
0x1bfd   : > { %10261 = vmatprep.subr.bf16.mxu1 %v11116_v13  ;;  %10283 = vmatprep.subr.bf16.mxu0 %v11117_v35 }
0x1c00   : > { %10262 = vmatpush3.bf16.msra.mxu1 %v11118_v63  ;;  %10284 = vmatpush3.bf16.msra.mxu0 %v11119_v33  ;;  %v11142_v63 = vld [vmem:[%s11454_s3 + $0x300] sm:$0xff]  }
0x1c01   : > { %10263 = vmatprep.subr.bf16.mxu1 %v11120_v8  ;;  %10285 = vmatprep.subr.bf16.mxu0 %v11121_v36  ;;  %v11143_v33 = vld [vmem:[%s11454_s3 + $0x380] sm:$0xff]   ;;  %v11144_v8 = vld [vmem:[%s11454_s3 + $0x348] sm:$0xff]  }
0x1c02   : > { %v11145_v36 = vld [vmem:[%s11454_s3 + $0x3c8] sm:$0xff]  }
0x1c04   : > { %10264 = vmatpush3.bf16.msra.mxu1 %v11122_v41  ;;  %10286 = vmatpush3.bf16.msra.mxu0 %v11123_v44  ;;  %v11146_v41 = vld [vmem:[%s11454_s3 + $0x308] sm:$0xff]  }
0x1c05   : > { %10265 = vmatprep.subr.bf16.mxu1 %v11124_v34  ;;  %10287 = vmatprep.subr.bf16.mxu0 %v11125_v59  ;;  %v11147_v44 = vld [vmem:[%s11454_s3 + $0x388] sm:$0xff]   ;;  %v11148_v34 = vld [vmem:[%s11454_s3 + $0x350] sm:$0xff]  }
0x1c06   : > { %v11149_v59 = vld [vmem:[%s11454_s3 + $0x3d0] sm:$0xff]  }
0x1c08   : > { %10266 = vmatpush3.bf16.msra.mxu1 %v11126_v27  ;;  %10288 = vmatpush3.bf16.msra.mxu0 %v11127_v60  ;;  %v11150_v27 = vld [vmem:[%s11454_s3 + $0x310] sm:$0xff]  }
0x1c09   : > { %10267 = vmatprep.subr.bf16.mxu1 %v11128_v1  ;;  %10289 = vmatprep.subr.bf16.mxu0 %v11129_v61  ;;  %v11151_v60 = vld [vmem:[%s11454_s3 + $0x390] sm:$0xff]   ;;  %v11152_v1 = vld [vmem:[%s11454_s3 + $0x358] sm:$0xff]  }
0x1c0a   : > { %v11153_v61 = vld [vmem:[%s11454_s3 + $0x3d8] sm:$0xff]  }
0x1c0c   : > { %v7060_v15 = vpop.f32.mrb[84].mxu1  ;;  %v7103_v39 = vpop.f32.mrb[72].mxu0  ;;  %10268 = vmatpush3.bf16.msra.mxu1 %v11130_v12  ;;  %10290 = vmatpush3.bf16.msra.mxu0 %v11131_v30  ;;  %v11154_v12 = vld [vmem:[%s11454_s3 + $0x318] sm:$0xff]  }
0x1c0d   : > { %v7061_v52 = vadd.f32 %v7060_v15, %v6169_v31  ;;  %v7104_v53 = vadd.f32 %v7103_v39, %v6177_v49  ;;  %v7062_v48 = vpop.f32.mrb[85].mxu1  ;;  %v7105_v51 = vpop.f32.mrb[73].mxu0  ;;  %10269 = vmatprep.subr.bf16.mxu1 %v11132_v50  ;;  %10291 = vmatprep.subr.bf16.mxu0 %v11133_v54  ;;  %v11155_v30 = vld [vmem:[%s11454_s3 + $0x398] sm:$0xff]   ;;  %v11158_v50 = vld [vmem:[%s11454_s3 + $0x320] sm:$0xff]   ;;  %v11162_v15 = vld [vmem:[%s11454_s3 + $0x328] sm:$0xff]  }
0x1c0e   : > { %v7063_v57 = vadd.f32 %v7062_v48, %v6173_v7  ;;  %v7106_v58 = vadd.f32 %v7105_v51, %v6181_v14  ;;  %v7064_v62 = vpop.f32.mrb[86].mxu1  ;;  %v7107_v40 = vpop.f32.mrb[74].mxu0  ;;  %v11159_v54 = vld [vmem:[%s11454_s3 + $0x3a0] sm:$0xff]   ;;  %v11163_v39 = vld [vmem:[%s11454_s3 + $0x3a8] sm:$0xff]   ;;  %v6189_v48 = vrot.slane %v13124_v23, %v6156_v37  ;;  %v6197_v51 = vrot.slane %v13124_v23, %v6164_v47  ;;  %v11169_v37 = vld [vmem:[%s11454_s3 + $0x3f8] sm:$0xff]  }
0x1c0f   : > { %v7065_v43 = vadd.f32 %v7064_v62, %v6169_v31  ;;  %v7108_v25 = vadd.f32 %v7107_v40, %v6177_v49  ;;  %v7066_v0 = vpop.f32.mrb[87].mxu1  ;;  %v7109_v4 = vpop.f32.mrb[75].mxu0  ;;  %v7206_v10 = vmax.f32 %v7061_v52, 0.0  ;;  %v7208_v11 = vmax.f32 %v7104_v53, 0.0  ;;  %v11156_v31 = vld [vmem:[%s11454_s3 + $0x360] sm:$0xff]   ;;  %v11164_v52 = vld [vmem:[%s11454_s3 + $0x370] sm:$0xff]  }
0x1c10   : > { %v7067_v5 = vadd.f32 %v7066_v0, %v6173_v7  ;;  %v7110_v3 = vadd.f32 %v7109_v4, %v6181_v14  ;;  %10270 = vmatpush3.bf16.msra.mxu1 %v11134_v46  ;;  %10292 = vmatpush3.bf16.msra.mxu0 %v11135_v32  ;;  %v7207_v21 = vmax.f32 %v7063_v57, 0.0  ;;  %v7209_v22 = vmax.f32 %v7106_v58, 0.0  ;;  %v11157_v49 = vld [vmem:[%s11454_s3 + $0x3e0] sm:$0xff]   ;;  %v11160_v7 = vld [vmem:[%s11454_s3 + $0x368] sm:$0xff]   ;;  %v11165_v53 = vld [vmem:[%s11454_s3 + $0x3f0] sm:$0xff]  }
0x1c11   : > { %v7222_v16 = vmax.f32 %v7065_v43, 0.0  ;;  %v7224_v17 = vmax.f32 %v7108_v25, 0.0  ;;  %10271 = vmatprep.subr.bf16.mxu1 %v11136_v56  ;;  %10293 = vmatprep.subr.bf16.mxu0 %v11137_v29  ;;  %v11161_v14 = vld [vmem:[%s11454_s3 + $0x3e8] sm:$0xff]   ;;  %v6185_v46 = vrot.slane %v13124_v23, %v6152_v38  ;;  %v6193_v32 = vrot.slane %v13124_v23, %v6160_v42  ;;  %v11166_v38 = vld [vmem:[%s11454_s3 + $0x330] sm:$0xff]   ;;  %v11168_v43 = vld [vmem:[%s11454_s3 + $0x378] sm:$0xff]  }
0x1c12   : > { %v7223_v24 = vmax.f32 %v7067_v5, 0.0  ;;  %v7225_v26 = vmax.f32 %v7110_v3, 0.0  ;;  %v11167_v57 = vld [vmem:[%s11454_s3 + $0x3b0] sm:$0xff]  }
0x1c13   : > { %v7238_v20 = vpack.c.bf16 %v7222_v16, %v7206_v10  ;;  %v7240_v45 = vpack.c.bf16 %v7224_v17, %v7208_v11  ;;  %v11170_v10 = vld [vmem:[%s11454_s3 + $0x338] sm:$0xff]  }
0x1c14   : > { %v7239_v13 = vpack.c.bf16 %v7223_v24, %v7207_v21  ;;  %v7241_v35 = vpack.c.bf16 %v7225_v26, %v7209_v22  ;;  %10272 = vmatpush3.bf16.msra.mxu1 %v11138_v6  ;;  %10294 = vmatpush3.bf16.msra.mxu0 %v11139_v9  ;;  %v11171_v11 = vld [vmem:[%s11454_s3 + $0x3b8] sm:$0xff]  }
0x1c15   : > { %10301 = vmatprep.subr.bf16.mxu1 %v11140_v18  ;;  %10323 = vmatprep.subr.bf16.mxu0 %v11141_v19 }
0x1c16   : > { %8473 = vmatprep.mubr.bf16.mxu1 %v7239_v13  ;;  %8514 = vmatprep.mubr.bf16.mxu0 %v7241_v35 }
0x1c17   : > { %8474 = vmatmul.mubr.bf16.vlgmr.msra.gmra.mrb[100].mxu1 %v7238_v20  ;;  %8515 = vmatmul.mubr.bf16.vlgmr.msra.gmra.mrb[88].mxu0 %v7240_v45 }
0x1c18   : > { %10302 = vmatpush3.bf16.msra.mxu1 %v11142_v63  ;;  %10324 = vmatpush3.bf16.msra.mxu0 %v11143_v33 }
0x1c19   : > { %10303 = vmatprep.subr.bf16.mxu1 %v11144_v8  ;;  %10325 = vmatprep.subr.bf16.mxu0 %v11145_v36  ;;  %v9631_v8 = vld [vmem:[%s733_s20] ss:$0 sm:$0xff] }
0x1c1c   : > { %10304 = vmatpush3.bf16.msra.mxu1 %v11146_v41  ;;  %10326 = vmatpush3.bf16.msra.mxu0 %v11147_v44 }
0x1c1d   : > { %10305 = vmatprep.subr.bf16.mxu1 %v11148_v34  ;;  %10327 = vmatprep.subr.bf16.mxu0 %v11149_v59 }
0x1c20   : > { %10306 = vmatpush3.bf16.msra.mxu1 %v11150_v27  ;;  %10328 = vmatpush3.bf16.msra.mxu0 %v11151_v60 }
0x1c21   : > { %10307 = vmatprep.subr.bf16.mxu1 %v11152_v1  ;;  %10329 = vmatprep.subr.bf16.mxu0 %v11153_v61 }
0x1c24   : > { %10308 = vmatpush3.bf16.msra.mxu1 %v11154_v12  ;;  %10330 = vmatpush3.bf16.msra.mxu0 %v11155_v30 }
0x1c25   : > { %10309 = vmatprep.subr.bf16.mxu1 %v11156_v31  ;;  %10331 = vmatprep.subr.bf16.mxu0 %v11157_v49 }
0x1c28   : > { %10310 = vmatpush3.bf16.msra.mxu1 %v11158_v50  ;;  %10332 = vmatpush3.bf16.msra.mxu0 %v11159_v54 }
0x1c29   : > { %10311 = vmatprep.subr.bf16.mxu1 %v11160_v7  ;;  %10333 = vmatprep.subr.bf16.mxu0 %v11161_v14 }
0x1c2c   : > { %v7146_v56 = vpop.f32.mrb[88].mxu1  ;;  %v7189_v29 = vpop.f32.mrb[76].mxu0  ;;  %10312 = vmatpush3.bf16.msra.mxu1 %v11162_v15  ;;  %10334 = vmatpush3.bf16.msra.mxu0 %v11163_v39 }
0x1c2d   : > { %v7147_v58 = vadd.f32 %v7146_v56, %v6185_v46  ;;  %v7190_v42 = vadd.f32 %v7189_v29, %v6193_v32  ;;  %v7148_v62 = vpop.f32.mrb[89].mxu1  ;;  %v7191_v40 = vpop.f32.mrb[77].mxu0  ;;  %10313 = vmatprep.subr.bf16.mxu1 %v11164_v52  ;;  %10335 = vmatprep.subr.bf16.mxu0 %v11165_v53 }
0x1c2e   : > { %v7149_v25 = vadd.f32 %v7148_v62, %v6189_v48  ;;  %v7192_v28 = vadd.f32 %v7191_v40, %v6197_v51  ;;  %v7150_v0 = vpop.f32.mrb[90].mxu1  ;;  %v7193_v47 = vpop.f32.mrb[78].mxu0 }
0x1c2f   : > { %v7151_v23 = vadd.f32 %v7150_v0, %v6185_v46  ;;  %v7194_v4 = vadd.f32 %v7193_v47, %v6193_v32  ;;  %v7152_v5 = vpop.f32.mrb[91].mxu1  ;;  %v7195_v3 = vpop.f32.mrb[79].mxu0  ;;  %v7210_v16 = vmax.f32 %v7147_v58, 0.0  ;;  %v7212_v17 = vmax.f32 %v7190_v42, 0.0 }
0x1c30   : > { %v7153_v6 = vadd.f32 %v7152_v5, %v6189_v48  ;;  %v7196_v9 = vadd.f32 %v7195_v3, %v6197_v51  ;;  %10314 = vmatpush3.bf16.msra.mxu1 %v11166_v38  ;;  %10336 = vmatpush3.bf16.msra.mxu0 %v11167_v57  ;;  %v7211_v21 = vmax.f32 %v7149_v25, 0.0  ;;  %v7213_v22 = vmax.f32 %v7192_v28, 0.0 }
0x1c31   : > { %v7226_v18 = vmax.f32 %v7151_v23, 0.0  ;;  %v7228_v19 = vmax.f32 %v7194_v4, 0.0  ;;  %10315 = vmatprep.subr.bf16.mxu1 %v11168_v43  ;;  %10337 = vmatprep.subr.bf16.mxu0 %v11169_v37 }
0x1c32   : > { %v7227_v24 = vmax.f32 %v7153_v6, 0.0  ;;  %v7229_v26 = vmax.f32 %v7196_v9, 0.0 }
0x1c33   : > { %v7242_v20 = vpack.c.bf16 %v7226_v18, %v7210_v16  ;;  %v7244_v45 = vpack.c.bf16 %v7228_v19, %v7212_v17 }
0x1c34   : > { %v7243_v13 = vpack.c.bf16 %v7227_v24, %v7211_v21  ;;  %v7245_v35 = vpack.c.bf16 %v7229_v26, %v7213_v22  ;;  %10316 = vmatpush3.bf16.msra.mxu1 %v11170_v10  ;;  %10338 = vmatpush3.bf16.msra.mxu0 %v11171_v11 }
0x1c36   : > { %8555 = vmatprep.mubr.bf16.mxu1 %v7243_v13  ;;  %8596 = vmatprep.mubr.bf16.mxu0 %v7245_v35 }
0x1c37   : > { %8556 = vmatmul.mubr.bf16.vlgmr.msra.gmra.mrb[104].mxu1 %v7242_v20  ;;  %8597 = vmatmul.mubr.bf16.vlgmr.msra.gmra.mrb[92].mxu0 %v7244_v45 }
0x1caa   : > { %v10185_v63 = vpop.f32.mrb[92].mxu1  ;;  %v10207_v33 = vpop.f32.mrb[80].mxu0 }
0x1cab   : > { %v10186_v36 = vpop.f32.mrb[93].mxu1  ;;  %v10208_v41 = vpop.f32.mrb[81].mxu0 }
0x1cac   : > { %v10187_v44 = vadd.f32 %v10186_v36, %v10185_v63  ;;  %v10209_v34 = vadd.f32 %v10208_v41, %v10207_v33  ;;  %v10188_v59 = vpop.f32.mrb[94].mxu1  ;;  %v10210_v27 = vpop.f32.mrb[82].mxu0 }
0x1cad   : > { %v10189_v60 = vpop.f32.mrb[95].mxu1  ;;  %v10211_v1 = vpop.f32.mrb[83].mxu0 }
0x1cae   : > { %v8312_v61 = vadd.f32 %v10187_v44, %v9631_v8  ;;  %v10190_v12 = vadd.f32 %v10189_v60, %v10188_v59  ;;  %v10212_v30 = vadd.f32 %v10211_v1, %v10210_v27 }
0x1cb0   : > { %v8353_v31 = vadd.f32 %v10209_v34, %v8312_v61  ;;  %v8315_v49 = vadd.f32 %v10190_v12, %v9631_v8 }
0x1cb2   : > { %v8356_v50 = vadd.f32 %v10212_v30, %v8315_v49 }
0x1cca   : > { %v10229_v54 = vpop.f32.mrb[96].mxu1  ;;  %v10251_v7 = vpop.f32.mrb[84].mxu0 }
0x1ccb   : > { %v10230_v14 = vpop.f32.mrb[97].mxu1  ;;  %v10252_v15 = vpop.f32.mrb[85].mxu0 }
0x1ccc   : > { %v10231_v39 = vadd.f32 %v10230_v14, %v10229_v54  ;;  %v10253_v46 = vadd.f32 %v10252_v15, %v10251_v7  ;;  %v10232_v32 = vpop.f32.mrb[98].mxu1  ;;  %v10254_v52 = vpop.f32.mrb[86].mxu0  ;;  %v9760_v7 = vld [vmem:[%s13284_s1] ss:$0 sm:$0xff] }
0x1ccd   : > { %v10233_v53 = vpop.f32.mrb[99].mxu1  ;;  %v10255_v48 = vpop.f32.mrb[87].mxu0 }
0x1cce   : > { %v8394_v51 = vadd.f32 %v10231_v39, %v8353_v31  ;;  %v10234_v56 = vadd.f32 %v10233_v53, %v10232_v32  ;;  %v10256_v29 = vadd.f32 %v10255_v48, %v10254_v52  ;;  %v9761_v39 = vld [vmem:[%s13285_s24] ss:$0 sm:$0xff] }
0x1cd0   : > { %v8435_v38 = vadd.f32 %v10253_v46, %v8394_v51  ;;  %v8397_v57 = vadd.f32 %v10234_v56, %v8356_v50 }
0x1cd2   : > { %v8438_v58 = vadd.f32 %v10256_v29, %v8397_v57 }
0x1cea   : > { %v10273_v42 = vpop.f32.mrb[100].mxu1  ;;  %v10295_v62 = vpop.f32.mrb[88].mxu0 }
0x1ceb   : > { %v10274_v40 = vpop.f32.mrb[101].mxu1  ;;  %v10296_v43 = vpop.f32.mrb[89].mxu0 }
0x1cec   : > { %v10275_v37 = vadd.f32 %v10274_v40, %v10273_v42  ;;  %v10297_v25 = vadd.f32 %v10296_v43, %v10295_v62  ;;  %v10276_v28 = vpop.f32.mrb[102].mxu1  ;;  %v10298_v0 = vpop.f32.mrb[90].mxu0 }
0x1ced   : > { %v10277_v47 = vpop.f32.mrb[103].mxu1  ;;  %v10299_v23 = vpop.f32.mrb[91].mxu0 }
0x1cee   : > { %v8476_v4 = vadd.f32 %v10275_v37, %v8435_v38  ;;  %v10278_v5 = vadd.f32 %v10277_v47, %v10276_v28  ;;  %v10300_v3 = vadd.f32 %v10299_v23, %v10298_v0 }
0x1cf0   : > { %v8517_v6 = vadd.f32 %v10297_v25, %v8476_v4  ;;  %v8479_v9 = vadd.f32 %v10278_v5, %v8438_v58 }
0x1cf2   : > { %v8520_v10 = vadd.f32 %v10300_v3, %v8479_v9 }
0x1d0a   : > { %v10317_v11 = vpop.f32.mrb[104].mxu1  ;;  %v10339_v16 = vpop.f32.mrb[92].mxu0 }
0x1d0b   : > { %v10318_v17 = vpop.f32.mrb[105].mxu1  ;;  %v10340_v18 = vpop.f32.mrb[93].mxu0 }
0x1d0c   : > { %v10319_v19 = vadd.f32 %v10318_v17, %v10317_v11  ;;  %v10341_v21 = vadd.f32 %v10340_v18, %v10339_v16  ;;  %v10320_v22 = vpop.f32.mrb[106].mxu1  ;;  %v10342_v24 = vpop.f32.mrb[94].mxu0 }
0x1d0d   : > { %v10321_v26 = vpop.f32.mrb[107].mxu1  ;;  %v10343_v20 = vpop.f32.mrb[95].mxu0 }
0x1d0e   : > { %v8558_v45 = vadd.f32 %v10319_v19, %v8517_v6  ;;  %v10322_v13 = vadd.f32 %v10321_v26, %v10320_v22  ;;  %v10344_v35 = vadd.f32 %v10343_v20, %v10342_v24 }
0x1d10   : > { %v8599_v63 = vadd.f32 %v10341_v21, %v8558_v45  ;;  %v8561_v33 = vadd.f32 %v10322_v13, %v8520_v10 }
0x1d12   : > { %v8602_v8 = vadd.f32 %v10344_v35, %v8561_v33  ;;  %v8605_v36 = vadd.f32 %v8599_v63, %v12898_v55 }
0x1d14   : > { %8609 = vadd.xlane.f32.xlu1 %v8605_v36  ;;  %v8606_v41 = vadd.f32 %v8602_v8, %v12900_v2 }
0x1d16   : > { %8611 = vadd.xlane.f32.xlu0 %v8606_v41 }
0x1da1   : > { %v8610_v44 = vpop.xlane.xlu1 %8609 }
0x1da2   : > { %v8613_v34 = vmul.f32 0.0078125, %v8610_v44 }
0x1da3   : > { %v8612_v59 = vpop.xlane.xlu0 %8611 }
0x1da4   : > { %v8615_v27 = vsub.f32 %v8605_v36, %v8613_v34  ;;  %v8614_v60 = vmul.f32 0.0078125, %v8612_v59 }
0x1da6   : > { %v8616_v1 = vsub.f32 %v8606_v41, %v8614_v60  ;;  %v8617_v61 = vmul.f32 %v8615_v27, %v8615_v27 }
0x1da8   : > { %8619 = vadd.xlane.f32.xlu1 %v8617_v61  ;;  %v8618_v12 = vmul.f32 %v8616_v1, %v8616_v1 }
0x1daa   : > { %8621 = vadd.xlane.f32.xlu0 %v8618_v12 }
0x1e35   : > { %v8620_v30 = vpop.xlane.xlu1 %8619 }
0x1e36   : > { %v8623_v31 = vmul.f32 0.0078125, %v8620_v30 }
0x1e37   : > { %v8622_v49 = vpop.xlane.xlu0 %8621 }
0x1e38   : > { %v8625_v55 = vadd.f32 1e-05, %v8623_v31  ;;  %v8624_v50 = vmul.f32 0.0078125, %v8622_v49 }
0x1e3a   : > { %11240 = vrsqrt.f32 %v8625_v55  ;;  %v8626_v2 = vadd.f32 1e-05, %v8624_v50 }
0x1e3c   : > { %11242 = vrsqrt.f32 %v8626_v2 }
0x1e44   : > { %v11241_v54 = vpop.eup %11240 }
0x1e45   : > { %v8629_v14 = vmul.f32 %v11241_v54, %v8615_v27 }
0x1e46   : > { %v11243_v15 = vpop.eup %11242 }
0x1e47   : > { %v8630_v46 = vmul.f32 %v11243_v15, %v8616_v1  ;;  %v8637_v32 = vmul.f32 %v9760_v7, %v8629_v14 }
0x1e49   : > { %v8638_v52 = vmul.f32 %v9760_v7, %v8630_v46  ;;  %v8645_v53 = vadd.f32 %v9761_v39, %v8637_v32 }
0x1e4b   : > { %v8646_v48 = vadd.f32 %v9761_v39, %v8638_v52  ;;  %8647 = vst [vmem:[#allocation2] sm:$0xff] %v8645_v53 }
0x1e4d   : > { %8648 = vst [vmem:[#allocation2 + $0x8] sm:$0xff] %v8646_v48 }
0x1e4e   : > { %11259 = shalt.err (!%p11256_p12)
}
0x1e4f   : > { %s13286_s23 = sld [smem:[#allocation16_spill]] }
0x1e55   : > { %s11260_s19 = scalar_lea.hbm %s13286_s23, 256 }
0x1e56   : > { %p11261_p13 = scmp.ne.s32.totalorder %s13286_s23, %s11260_s19  ;;  %p11266_p2 = scmp.lt.u32.totalorder %s11260_s19, %s13286_s23 }
0x1e58   : > { %p11262_p0 = pnand %p11261_p13, %p10703_p5 }
0x1e5a   : > { %p11263_p1 = pneg %p11262_p0 }
0x1e5c   : > { %p11268_p3 = pnand %p11266_p2, %p11263_p1 }
0x1e5e   : > { %11271 = shalt.err (!%p11268_p3)
}
0x1e5f   : > { %s11298_s18 = smov 128   ;;  %s11299_s3 = smov 8  }
0x1e60   : > { %10700 = dma.vmem_to_hbm [thread:$0]  (%p10703_p5), %s8656_s22, 256, %s13286_s23, [#allocation3], %s11298_s18, %s11298_s18, %s11299_s3  }
0x1e61   : > { %11277 = dma.done.wait (%p10703_p5), [#allocation3], 256  }
0x1e62   : > { %11279 = vsyncadd (%p10703_p5), [#allocation3], 4294967040 }
0x1e63 PF: > { %s13287_s0 = sld [smem:[#allocation5_spill]] }
0x1e69   : > { %s29_s27 = sadd.s32 1, %s13287_s0  }
0x1e6a   : > { %p26_p4 = scmp.ge.s32.totalorder %s29_s27, 8  }
0x1e6c   :  { %28 = sbr.rel (!%p26_p4) target bundleno = 13 (0xd), region = 164 }
0x1e73   :  { %8671 = vsyncpa [#allocation3], 1 }
0x1e74   :  { %8673 = vsyncpa [#allocation3 + $0x1], 1 }

</bundles_post_ra>
